<compile_context>
chip_gen: v7x
topology: tpu7x:2x2x1
jax: 0.10.0
libtpu: 0.0.40
codegen_flags: <defaults>
</compile_context>

<pallas_src>
import jax
import jax.numpy as jnp
from jax import lax
from jax.experimental import pallas as pl
from jax.experimental.pallas import tpu as pltpu

HIDDEN_SIZE = 50
INPUT_SIZE = 10
NUM_LAYERS = 2
OUTPUT_SIZE = 1

HP = 128                      # lane-padded hidden size (one 128-lane block per gate)
NG = 4                        # gates, packed order [i, f, o, g]
GP = NG * HP                  # padded gate width (512)
# TODO(synk): shrink HP to 64 (two gates per vreg) and realign f/o/g to the
# c/h lanes with pltpu.roll to halve EUP/VPU gate work and matmul N-width.


def _lstm_kernel(x_ref,       # (T*BP, I)     bf16  time-major, batch-padded
                 wih0_ref,    # (I, GP)       bf16
                 b0_ref,      # (1, GP)       f32   (b_ih + b_hh, layer 0)
                 wrec_ref,    # (2*HP, 2*GP)  bf16  [[Whh0, Wih1],[0, Whh1]]
                 b1_ref,      # (1, GP)       f32   (b_ih + b_hh, layer 1)
                 wfc_ref,     # (HP, OUT)     f32
                 bfc_ref,     # (1, OUT)      f32
                 out_ref,     # (BP, OUT)     f32
                 xg0_ref):    # scratch: (T*BP, GP) f32
    TB = x_ref.shape[0]
    B = out_ref.shape[0]                 # padded batch (multiple of 8)
    T = TB // B

    # ---- hoisted layer-0 input projection: one bf16 MXU call (f32 acc) -----
    # TODO(synk): for long T on v7x, stream this through a time-chunked grid
    # (dimension_semantics=("arbitrary",)) instead of a (T*BP, GP) f32 scratch
    # so VMEM stays O(1) in T.
    xg0_ref[...] = (jnp.dot(x_ref[...], wih0_ref[...],
                            preferred_element_type=jnp.float32)
                    + b0_ref[...])

    # ---- hoisted, loop-invariant loads / broadcasts -------------------------
    wrec = wrec_ref[...]                                   # bf16 (2HP, 2GP)
    b1b = jnp.broadcast_to(b1_ref[...], (B, GP))           # broadcast once

    def gates_to_hc(g, c):
        # packed gate order [i, f, o, g]: one sigmoid slab + one tanh block
        sig = jax.nn.sigmoid(g[:, 0:3 * HP])
        i_g = sig[:, 0 * HP:1 * HP]
        f_g = sig[:, 1 * HP:2 * HP]
        o_g = sig[:, 2 * HP:3 * HP]
        g_g = jnp.tanh(g[:, 3 * HP:4 * HP])
        c_new = f_g * c + i_g * g_g
        h_new = o_g * jnp.tanh(c_new)
        return h_new, c_new

    # Skewed recurrence: one fused MXU issue per step produces both layer-0's
    # recurrent term for step t+1 and layer-1's (ih+hh) gates for step t.
    def step(t, carry):
        rec0, c0, h1, c1 = carry          # rec0 = h0(t-1) @ Whh0 (zeros at t=0)
        row = pl.multiple_of(t * B, 8)
        g0 = xg0_ref[pl.ds(row, B), :] + rec0
        h0n, c0n = gates_to_hc(g0, c0)
        lhs = jnp.concatenate([h0n.astype(jnp.bfloat16),
                               h1.astype(jnp.bfloat16)], axis=-1)   # (B, 2HP)
        fused = jnp.dot(lhs, wrec, preferred_element_type=jnp.float32)
        # TODO(synk): on v5e (128-deep MXU) split this into two independent
        # K=128 matmuls (h0n @ top-half, h1 @ bottom-half) so both pipeline in
        # the MRF; keep the single fused issue on v6e/v7x.
        rec0n = fused[:, 0:GP]            # layer-0 recurrence for step t+1
        g1 = fused[:, GP:2 * GP] + b1b    # layer-1 gates at step t
        h1n, c1n = gates_to_hc(g1, c1)
        return (rec0n, c0n, h1n, c1n)

    zeros_h = jnp.zeros((B, HP), jnp.float32)
    zeros_g = jnp.zeros((B, GP), jnp.float32)
    # Full unroll only for short fixed T; partial unroll keeps cross-iteration
    # overlap without vreg spills / compile-time blowup for long sequences.
    unroll = True if T <= 16 else 8
    _, _, h1_T, _ = lax.fori_loop(0, T, step,
                                  (zeros_g, zeros_h, zeros_h, zeros_h),
                                  unroll=unroll)

    # final Linear on the top layer's last hidden state
    out = (jnp.dot(h1_T, wfc_ref[...], preferred_element_type=jnp.float32)
           + bfc_ref[...])
    out_ref[...] = out.astype(out_ref.dtype)


def lstm_model_forward(x, packed):
    """x: (B, T, input_size) float32. Returns (B, output_size) float32."""
    B, T, I = x.shape
    bp = max(8, ((B + 7) // 8) * 8)                       # sublane-pad batch
    # wrapper-side layout plumbing: time-major, batch-padded, flattened, bf16
    xt = jnp.transpose(x.astype(jnp.bfloat16), (1, 0, 2))  # (T, B, I)
    xt = jnp.pad(xt, ((0, 0), (0, bp - B), (0, 0)))        # (T, BP, I)
    xt = xt.reshape(T * bp, I)                             # (T*BP, I)

    vmem = pl.BlockSpec(memory_space=pltpu.MemorySpace.VMEM)
    args = (xt,
            packed["wih0"], packed["b0"],
            packed["wrec"], packed["b1"],
            packed["wfc"], packed["bfc"])
    # TODO(synk): for large padded batch on v7x, add a grid over >=16-row batch
    # blocks with dimension_semantics=("parallel",) so both TensorCores run an
    # independent shard; prefer growing the per-block batch first (latency-
    # dominated per-step cost is flat up to ~128-256 rows).
    out = pl.pallas_call(
        _lstm_kernel,
        out_shape=jax.ShapeDtypeStruct((bp, OUTPUT_SIZE), jnp.float32),
        in_specs=[vmem] * len(args),
        out_specs=vmem,
        scratch_shapes=[pltpu.VMEM((T * bp, GP), jnp.float32)],
    )(*args)
    return out[:B]


# ---------------------------------------------------------------------------
# Parameter init (raw PyTorch layout) + packing into the kernel layout.
# ---------------------------------------------------------------------------
def init_params(key, input_size=INPUT_SIZE, hidden_size=HIDDEN_SIZE,
                output_size=OUTPUT_SIZE):
    """Raw nn.LSTM/nn.Linear layout: W_ih (4H,in), W_hh (4H,H), b_ih, b_hh per
    layer with gate order [i,f,g,o]; fc W (out,H), b (out,).  U(-1/sqrt(H),+)."""
    H = hidden_size
    k = 1.0 / jnp.sqrt(jnp.float32(H))
    keys = jax.random.split(key, 12)

    def u(kk, shape):
        return jax.random.uniform(kk, shape, jnp.float32, minval=-k, maxval=k)

    return dict(
        wih0=u(keys[0], (4 * H, input_size)),
        whh0=u(keys[1], (4 * H, H)),
        bih0=u(keys[2], (4 * H,)),
        bhh0=u(keys[3], (4 * H,)),
        wih1=u(keys[4], (4 * H, H)),
        whh1=u(keys[5], (4 * H, H)),
        bih1=u(keys[6], (4 * H,)),
        bhh1=u(keys[7], (4 * H,)),
        wfc=u(keys[8], (output_size, H)),
        bfc=u(keys[9], (output_size,)),
    )


def _pack_gate_cols(w, H):
    """w: (in_dim, 4H), PyTorch gate order [i,f,g,o] along columns.
    -> (in_dim, 4*HP): gate order [i,f,o,g], each gate zero-padded to HP lanes."""
    blocks = [w[:, 0 * H:1 * H], w[:, 1 * H:2 * H],
              w[:, 3 * H:4 * H], w[:, 2 * H:3 * H]]        # i, f, o, g
    return jnp.concatenate(
        [jnp.pad(b, ((0, 0), (0, HP - H))) for b in blocks], axis=-1)


def pack_params(p, input_size=INPUT_SIZE, hidden_size=HIDDEN_SIZE):
    H = hidden_size

    def pad_rows(w):                                       # (H, GP) -> (HP, GP)
        return jnp.pad(w, ((0, HP - H), (0, 0)))

    wih0 = _pack_gate_cols(p["wih0"].T, H).astype(jnp.bfloat16)   # (I, GP) bf16
    whh0 = pad_rows(_pack_gate_cols(p["whh0"].T, H))              # (HP, GP) f32
    b0 = _pack_gate_cols((p["bih0"] + p["bhh0"])[None, :], H)     # (1, GP) f32

    wih1 = pad_rows(_pack_gate_cols(p["wih1"].T, H))              # (HP, GP)
    whh1 = pad_rows(_pack_gate_cols(p["whh1"].T, H))              # (HP, GP)
    b1 = _pack_gate_cols((p["bih1"] + p["bhh1"])[None, :], H)     # (1, GP) f32

    # Skew-fused recurrent weight: lhs = [h0(t) | h1(t-1)]  (B, 2*HP)
    #   result[:, :GP] = h0(t) @ whh0                (layer-0 recurrence, t+1)
    #   result[:, GP:] = h0(t) @ wih1 + h1(t-1) @ whh1   (layer-1 gates, t)
    top = jnp.concatenate([whh0, wih1], axis=-1)                  # (HP, 2GP)
    bot = jnp.concatenate([jnp.zeros_like(whh1), whh1], axis=-1)  # (HP, 2GP)
    wrec = jnp.concatenate([top, bot], axis=0).astype(jnp.bfloat16)  # (2HP, 2GP)

    wfc = jnp.pad(p["wfc"].T, ((0, HP - H), (0, 0)))              # (HP, OUT) f32
    bfc = p["bfc"][None, :]                                       # (1, OUT) f32
    return dict(wih0=wih0, b0=b0, wrec=wrec, b1=b1, wfc=wfc, bfc=bfc)


# ---------------------------------------------------------------------------
# Pure-JAX reference (exact PyTorch semantics, full f32).
# ---------------------------------------------------------------------------
def _reference_forward(x, p):
    B, T, _ = x.shape
    H = HIDDEN_SIZE

    def cell(xt, h, c, wih, whh, b):
        g = xt @ wih.T + h @ whh.T + b
        i = jax.nn.sigmoid(g[:, 0 * H:1 * H])
        f = jax.nn.sigmoid(g[:, 1 * H:2 * H])
        gg = jnp.tanh(g[:, 2 * H:3 * H])
        o = jax.nn.sigmoid(g[:, 3 * H:4 * H])
        c = f * c + i * gg
        h = o * jnp.tanh(c)
        return h, c

    h0 = c0 = h1 = c1 = jnp.zeros((B, H), jnp.float32)
    b0 = p["bih0"] + p["bhh0"]
    b1 = p["bih1"] + p["bhh1"]
    for t in range(T):
        xt = x[:, t, :]
        h0, c0 = cell(xt, h0, c0, p["wih0"], p["whh0"], b0)
        h1, c1 = cell(h0, h1, c1, p["wih1"], p["whh1"], b1)
    return h1 @ p["wfc"].T + p["bfc"][None, :]


if __name__ == "__main__":
    key = jax.random.PRNGKey(0)
    kx, kp = jax.random.split(key)

    batch, seq = 2, 8
    x = jax.random.normal(kx, (batch, seq, INPUT_SIZE), jnp.float32)
    raw = init_params(kp)
    packed = pack_params(raw)

    out = lstm_model_forward(x, packed)
    out = jax.block_until_ready(out)

    ref = _reference_forward(x, raw)
    assert out.shape == (batch, OUTPUT_SIZE)
    # bf16 input/recurrent-weight matmuls (f32 accumulation) -> relaxed tolerance
    assert jnp.allclose(out, ref, rtol=2e-2, atol=2e-2), (out, ref)

    print("KERNEL_OK")
</pallas_src>

<mosaic_0001>
module attributes {stable_mosaic.version = 11 : i64} {
  func.func @_lstm_kernel(%arg0: memref<64x10xbf16, #tpu.memory_space<vmem>>, %arg1: memref<10x512xbf16, #tpu.memory_space<vmem>>, %arg2: memref<1x512xf32, #tpu.memory_space<vmem>>, %arg3: memref<256x1024xbf16, #tpu.memory_space<vmem>>, %arg4: memref<1x512xf32, #tpu.memory_space<vmem>>, %arg5: memref<128x1xf32, #tpu.memory_space<vmem>>, %arg6: memref<1x1xf32, #tpu.memory_space<vmem>>, %arg7: memref<8x1xf32, #tpu.memory_space<vmem>>, %arg8: memref<64x512xf32, #tpu.memory_space<vmem>>) attributes {dimension_semantics = [], scalar_prefetch = 0 : i64, scratch_operands = 1 : i64, tpu.core_type = #tpu.core_type<tc>} {
    %c0 = arith.constant 0 : index
    %c0_0 = arith.constant 0 : index
    %0 = vector.load %arg0[%c0, %c0_0] : memref<64x10xbf16, #tpu.memory_space<vmem>>, vector<64x10xbf16>
    %c0_1 = arith.constant 0 : index
    %c0_2 = arith.constant 0 : index
    %1 = vector.load %arg1[%c0_1, %c0_2] : memref<10x512xbf16, #tpu.memory_space<vmem>>, vector<10x512xbf16>
    %cst = arith.constant dense<0.000000e+00> : vector<64x512xf32>
    %2 = tpu.matmul %0, %1, %cst {dimension_numbers = #tpu.dot_dimension_numbers<[1], [0], [0], [1], [0, 0, 1, 1], [], []>} : vector<64x10xbf16>, vector<10x512xbf16>, vector<64x512xf32> -> vector<64x512xf32>
    %c0_3 = arith.constant 0 : index
    %c0_4 = arith.constant 0 : index
    %3 = vector.load %arg2[%c0_3, %c0_4] : memref<1x512xf32, #tpu.memory_space<vmem>>, vector<1x512xf32>
    %4 = vector.broadcast %3 : vector<1x512xf32> to vector<64x512xf32>
    %5 = arith.addf %2, %4 : vector<64x512xf32>
    %c0_5 = arith.constant 0 : index
    %c0_6 = arith.constant 0 : index
    %6 = vector.load %arg8[%c0_5, %c0_6] : memref<64x512xf32, #tpu.memory_space<vmem>>, vector<64x512xf32>
    tpu.vector_store %arg8[%c0_5, %c0_6], %5 {strides = array<i32>} : memref<64x512xf32, #tpu.memory_space<vmem>>, vector<64x512xf32>,
    %c0_7 = arith.constant 0 : index
    %c0_8 = arith.constant 0 : index
    %7 = vector.load %arg3[%c0_7, %c0_8] : memref<256x1024xbf16, #tpu.memory_space<vmem>>, vector<256x1024xbf16>
    %c0_9 = arith.constant 0 : index
    %c0_10 = arith.constant 0 : index
    %8 = vector.load %arg4[%c0_9, %c0_10] : memref<1x512xf32, #tpu.memory_space<vmem>>, vector<1x512xf32>
    %9 = vector.shape_cast %8 : vector<1x512xf32> to vector<1x512xf32>
    %10 = vector.broadcast %9 : vector<1x512xf32> to vector<8x512xf32>
    %cst_11 = arith.constant 0.000000e+00 : f32
    %11 = vector.broadcast %cst_11 : f32 to vector<8x128xf32>
    %cst_12 = arith.constant 0.000000e+00 : f32
    %12 = vector.broadcast %cst_12 : f32 to vector<8x512xf32>
    %c0_i32 = arith.constant 0 : i32
    %c8_i32 = arith.constant 8 : i32
    %13 = arith.muli %c0_i32, %c8_i32 : i32
    %14 = tpu.assume_multiple %13, 8 : i32
    %15 = arith.index_cast %14 : i32 to index
    %c0_13 = arith.constant 0 : index
    %16 = vector.load %arg8[%15, %c0_13] : memref<64x512xf32, #tpu.memory_space<vmem>>, vector<8x512xf32>
    %17 = arith.addf %16, %12 : vector<8x512xf32>
    %18 = vector.extract_strided_slice %17 {offsets = [0, 0], sizes = [8, 384], strides = [1, 1]} : vector<8x512xf32> to vector<8x384xf32>
    %19 = arith.negf %18 : vector<8x384xf32>
    %20 = math.exp %19 : vector<8x384xf32>
    %cst_14 = arith.constant 1.000000e+00 : f32
    %21 = vector.broadcast %cst_14 : f32 to vector<8x384xf32>
    %22 = arith.addf %21, %20 : vector<8x384xf32>
    %23 = arith.divf %21, %22 : vector<8x384xf32>
    %24 = vector.extract_strided_slice %23 {offsets = [0, 0], sizes = [8, 128], strides = [1, 1]} : vector<8x384xf32> to vector<8x128xf32>
    %25 = vector.extract_strided_slice %23 {offsets = [0, 128], sizes = [8, 128], strides = [1, 1]} : vector<8x384xf32> to vector<8x128xf32>
    %26 = vector.extract_strided_slice %23 {offsets = [0, 256], sizes = [8, 128], strides = [1, 1]} : vector<8x384xf32> to vector<8x128xf32>
    %27 = vector.extract_strided_slice %17 {offsets = [0, 384], sizes = [8, 128], strides = [1, 1]} : vector<8x512xf32> to vector<8x128xf32>
    %28 = math.tanh %27 : vector<8x128xf32>
    %29 = arith.mulf %25, %11 : vector<8x128xf32>
    %30 = arith.mulf %24, %28 : vector<8x128xf32>
    %31 = arith.addf %29, %30 : vector<8x128xf32>
    %32 = math.tanh %31 : vector<8x128xf32>
    %33 = arith.mulf %26, %32 : vector<8x128xf32>
    %34 = arith.truncf %33 : vector<8x128xf32> to vector<8x128xbf16>
    %35 = arith.truncf %11 : vector<8x128xf32> to vector<8x128xbf16>
    %36 = tpu.concatenate %34, %35 in 1 : vector<8x128xbf16>, vector<8x128xbf16> -> vector<8x256xbf16>
    %cst_15 = arith.constant dense<0.000000e+00> : vector<8x1024xf32>
    %37 = tpu.matmul %36, %7, %cst_15 {dimension_numbers = #tpu.dot_dimension_numbers<[1], [0], [0], [1], [0, 0, 1, 1], [], []>} : vector<8x256xbf16>, vector<256x1024xbf16>, vector<8x1024xf32> -> vector<8x1024xf32>
    %38 = vector.extract_strided_slice %37 {offsets = [0, 0], sizes = [8, 512], strides = [1, 1]} : vector<8x1024xf32> to vector<8x512xf32>
    %39 = vector.extract_strided_slice %37 {offsets = [0, 512], sizes = [8, 512], strides = [1, 1]} : vector<8x1024xf32> to vector<8x512xf32>
    %40 = arith.addf %39, %10 : vector<8x512xf32>
    %41 = vector.extract_strided_slice %40 {offsets = [0, 0], sizes = [8, 384], strides = [1, 1]} : vector<8x512xf32> to vector<8x384xf32>
    %42 = arith.negf %41 : vector<8x384xf32>
    %43 = math.exp %42 : vector<8x384xf32>
    %cst_16 = arith.constant 1.000000e+00 : f32
    %44 = vector.broadcast %cst_16 : f32 to vector<8x384xf32>
    %45 = arith.addf %44, %43 : vector<8x384xf32>
    %46 = arith.divf %44, %45 : vector<8x384xf32>
    %47 = vector.extract_strided_slice %46 {offsets = [0, 0], sizes = [8, 128], strides = [1, 1]} : vector<8x384xf32> to vector<8x128xf32>
    %48 = vector.extract_strided_slice %46 {offsets = [0, 128], sizes = [8, 128], strides = [1, 1]} : vector<8x384xf32> to vector<8x128xf32>
    %49 = vector.extract_strided_slice %46 {offsets = [0, 256], sizes = [8, 128], strides = [1, 1]} : vector<8x384xf32> to vector<8x128xf32>
    %50 = vector.extract_strided_slice %40 {offsets = [0, 384], sizes = [8, 128], strides = [1, 1]} : vector<8x512xf32> to vector<8x128xf32>
    %51 = math.tanh %50 : vector<8x128xf32>
    %52 = arith.mulf %48, %11 : vector<8x128xf32>
    %53 = arith.mulf %47, %51 : vector<8x128xf32>
    %54 = arith.addf %52, %53 : vector<8x128xf32>
    %55 = math.tanh %54 : vector<8x128xf32>
    %56 = arith.mulf %49, %55 : vector<8x128xf32>
    %c1_i32 = arith.constant 1 : i32
    %c8_i32_17 = arith.constant 8 : i32
    %57 = arith.muli %c1_i32, %c8_i32_17 : i32
    %58 = tpu.assume_multiple %57, 8 : i32
    %59 = arith.index_cast %58 : i32 to index
    %c0_18 = arith.constant 0 : index
    %60 = vector.load %arg8[%59, %c0_18] : memref<64x512xf32, #tpu.memory_space<vmem>>, vector<8x512xf32>
    %61 = arith.addf %60, %38 : vector<8x512xf32>
    %62 = vector.extract_strided_slice %61 {offsets = [0, 0], sizes = [8, 384], strides = [1, 1]} : vector<8x512xf32> to vector<8x384xf32>
    %63 = arith.negf %62 : vector<8x384xf32>
    %64 = math.exp %63 : vector<8x384xf32>
    %cst_19 = arith.constant 1.000000e+00 : f32
    %65 = vector.broadcast %cst_19 : f32 to vector<8x384xf32>
    %66 = arith.addf %65, %64 : vector<8x384xf32>
    %67 = arith.divf %65, %66 : vector<8x384xf32>
    %68 = vector.extract_strided_slice %67 {offsets = [0, 0], sizes = [8, 128], strides = [1, 1]} : vector<8x384xf32> to vector<8x128xf32>
    %69 = vector.extract_strided_slice %67 {offsets = [0, 128], sizes = [8, 128], strides = [1, 1]} : vector<8x384xf32> to vector<8x128xf32>
    %70 = vector.extract_strided_slice %67 {offsets = [0, 256], sizes = [8, 128], strides = [1, 1]} : vector<8x384xf32> to vector<8x128xf32>
    %71 = vector.extract_strided_slice %61 {offsets = [0, 384], sizes = [8, 128], strides = [1, 1]} : vector<8x512xf32> to vector<8x128xf32>
    %72 = math.tanh %71 : vector<8x128xf32>
    %73 = arith.mulf %69, %31 : vector<8x128xf32>
    %74 = arith.mulf %68, %72 : vector<8x128xf32>
    %75 = arith.addf %73, %74 : vector<8x128xf32>
    %76 = math.tanh %75 : vector<8x128xf32>
    %77 = arith.mulf %70, %76 : vector<8x128xf32>
    %78 = arith.truncf %77 : vector<8x128xf32> to vector<8x128xbf16>
    %79 = arith.truncf %56 : vector<8x128xf32> to vector<8x128xbf16>
    %80 = tpu.concatenate %78, %79 in 1 : vector<8x128xbf16>, vector<8x128xbf16> -> vector<8x256xbf16>
    %cst_20 = arith.constant dense<0.000000e+00> : vector<8x1024xf32>
    %81 = tpu.matmul %80, %7, %cst_20 {dimension_numbers = #tpu.dot_dimension_numbers<[1], [0], [0], [1], [0, 0, 1, 1], [], []>} : vector<8x256xbf16>, vector<256x1024xbf16>, vector<8x1024xf32> -> vector<8x1024xf32>
    %82 = vector.extract_strided_slice %81 {offsets = [0, 0], sizes = [8, 512], strides = [1, 1]} : vector<8x1024xf32> to vector<8x512xf32>
    %83 = vector.extract_strided_slice %81 {offsets = [0, 512], sizes = [8, 512], strides = [1, 1]} : vector<8x1024xf32> to vector<8x512xf32>
    %84 = arith.addf %83, %10 : vector<8x512xf32>
    %85 = vector.extract_strided_slice %84 {offsets = [0, 0], sizes = [8, 384], strides = [1, 1]} : vector<8x512xf32> to vector<8x384xf32>
    %86 = arith.negf %85 : vector<8x384xf32>
    %87 = math.exp %86 : vector<8x384xf32>
    %cst_21 = arith.constant 1.000000e+00 : f32
    %88 = vector.broadcast %cst_21 : f32 to vector<8x384xf32>
    %89 = arith.addf %88, %87 : vector<8x384xf32>
    %90 = arith.divf %88, %89 : vector<8x384xf32>
    %91 = vector.extract_strided_slice %90 {offsets = [0, 0], sizes = [8, 128], strides = [1, 1]} : vector<8x384xf32> to vector<8x128xf32>
    %92 = vector.extract_strided_slice %90 {offsets = [0, 128], sizes = [8, 128], strides = [1, 1]} : vector<8x384xf32> to vector<8x128xf32>
    %93 = vector.extract_strided_slice %90 {offsets = [0, 256], sizes = [8, 128], strides = [1, 1]} : vector<8x384xf32> to vector<8x128xf32>
    %94 = vector.extract_strided_slice %84 {offsets = [0, 384], sizes = [8, 128], strides = [1, 1]} : vector<8x512xf32> to vector<8x128xf32>
    %95 = math.tanh %94 : vector<8x128xf32>
    %96 = arith.mulf %92, %54 : vector<8x128xf32>
    %97 = arith.mulf %91, %95 : vector<8x128xf32>
    %98 = arith.addf %96, %97 : vector<8x128xf32>
    %99 = math.tanh %98 : vector<8x128xf32>
    %100 = arith.mulf %93, %99 : vector<8x128xf32>
    %c2_i32 = arith.constant 2 : i32
    %c8_i32_22 = arith.constant 8 : i32
    %101 = arith.muli %c2_i32, %c8_i32_22 : i32
    %102 = tpu.assume_multiple %101, 8 : i32
    %103 = arith.index_cast %102 : i32 to index
    %c0_23 = arith.constant 0 : index
    %104 = vector.load %arg8[%103, %c0_23] : memref<64x512xf32, #tpu.memory_space<vmem>>, vector<8x512xf32>
    %105 = arith.addf %104, %82 : vector<8x512xf32>
    %106 = vector.extract_strided_slice %105 {offsets = [0, 0], sizes = [8, 384], strides = [1, 1]} : vector<8x512xf32> to vector<8x384xf32>
    %107 = arith.negf %106 : vector<8x384xf32>
    %108 = math.exp %107 : vector<8x384xf32>
    %cst_24 = arith.constant 1.000000e+00 : f32
    %109 = vector.broadcast %cst_24 : f32 to vector<8x384xf32>
    %110 = arith.addf %109, %108 : vector<8x384xf32>
    %111 = arith.divf %109, %110 : vector<8x384xf32>
    %112 = vector.extract_strided_slice %111 {offsets = [0, 0], sizes = [8, 128], strides = [1, 1]} : vector<8x384xf32> to vector<8x128xf32>
    %113 = vector.extract_strided_slice %111 {offsets = [0, 128], sizes = [8, 128], strides = [1, 1]} : vector<8x384xf32> to vector<8x128xf32>
    %114 = vector.extract_strided_slice %111 {offsets = [0, 256], sizes = [8, 128], strides = [1, 1]} : vector<8x384xf32> to vector<8x128xf32>
    %115 = vector.extract_strided_slice %105 {offsets = [0, 384], sizes = [8, 128], strides = [1, 1]} : vector<8x512xf32> to vector<8x128xf32>
    %116 = math.tanh %115 : vector<8x128xf32>
    %117 = arith.mulf %113, %75 : vector<8x128xf32>
    %118 = arith.mulf %112, %116 : vector<8x128xf32>
    %119 = arith.addf %117, %118 : vector<8x128xf32>
    %120 = math.tanh %119 : vector<8x128xf32>
    %121 = arith.mulf %114, %120 : vector<8x128xf32>
    %122 = arith.truncf %121 : vector<8x128xf32> to vector<8x128xbf16>
    %123 = arith.truncf %100 : vector<8x128xf32> to vector<8x128xbf16>
    %124 = tpu.concatenate %122, %123 in 1 : vector<8x128xbf16>, vector<8x128xbf16> -> vector<8x256xbf16>
    %cst_25 = arith.constant dense<0.000000e+00> : vector<8x1024xf32>
    %125 = tpu.matmul %124, %7, %cst_25 {dimension_numbers = #tpu.dot_dimension_numbers<[1], [0], [0], [1], [0, 0, 1, 1], [], []>} : vector<8x256xbf16>, vector<256x1024xbf16>, vector<8x1024xf32> -> vector<8x1024xf32>
    %126 = vector.extract_strided_slice %125 {offsets = [0, 0], sizes = [8, 512], strides = [1, 1]} : vector<8x1024xf32> to vector<8x512xf32>
    %127 = vector.extract_strided_slice %125 {offsets = [0, 512], sizes = [8, 512], strides = [1, 1]} : vector<8x1024xf32> to vector<8x512xf32>
    %128 = arith.addf %127, %10 : vector<8x512xf32>
    %129 = vector.extract_strided_slice %128 {offsets = [0, 0], sizes = [8, 384], strides = [1, 1]} : vector<8x512xf32> to vector<8x384xf32>
    %130 = arith.negf %129 : vector<8x384xf32>
    %131 = math.exp %130 : vector<8x384xf32>
    %cst_26 = arith.constant 1.000000e+00 : f32
    %132 = vector.broadcast %cst_26 : f32 to vector<8x384xf32>
    %133 = arith.addf %132, %131 : vector<8x384xf32>
    %134 = arith.divf %132, %133 : vector<8x384xf32>
    %135 = vector.extract_strided_slice %134 {offsets = [0, 0], sizes = [8, 128], strides = [1, 1]} : vector<8x384xf32> to vector<8x128xf32>
    %136 = vector.extract_strided_slice %134 {offsets = [0, 128], sizes = [8, 128], strides = [1, 1]} : vector<8x384xf32> to vector<8x128xf32>
    %137 = vector.extract_strided_slice %134 {offsets = [0, 256], sizes = [8, 128], strides = [1, 1]} : vector<8x384xf32> to vector<8x128xf32>
    %138 = vector.extract_strided_slice %128 {offsets = [0, 384], sizes = [8, 128], strides = [1, 1]} : vector<8x512xf32> to vector<8x128xf32>
    %139 = math.tanh %138 : vector<8x128xf32>
    %140 = arith.mulf %136, %98 : vector<8x128xf32>
    %141 = arith.mulf %135, %139 : vector<8x128xf32>
    %142 = arith.addf %140, %141 : vector<8x128xf32>
    %143 = math.tanh %142 : vector<8x128xf32>
    %144 = arith.mulf %137, %143 : vector<8x128xf32>
    %c3_i32 = arith.constant 3 : i32
    %c8_i32_27 = arith.constant 8 : i32
    %145 = arith.muli %c3_i32, %c8_i32_27 : i32
    %146 = tpu.assume_multiple %145, 8 : i32
    %147 = arith.index_cast %146 : i32 to index
    %c0_28 = arith.constant 0 : index
    %148 = vector.load %arg8[%147, %c0_28] : memref<64x512xf32, #tpu.memory_space<vmem>>, vector<8x512xf32>
    %149 = arith.addf %148, %126 : vector<8x512xf32>
    %150 = vector.extract_strided_slice %149 {offsets = [0, 0], sizes = [8, 384], strides = [1, 1]} : vector<8x512xf32> to vector<8x384xf32>
    %151 = arith.negf %150 : vector<8x384xf32>
    %152 = math.exp %151 : vector<8x384xf32>
    %cst_29 = arith.constant 1.000000e+00 : f32
    %153 = vector.broadcast %cst_29 : f32 to vector<8x384xf32>
    %154 = arith.addf %153, %152 : vector<8x384xf32>
    %155 = arith.divf %153, %154 : vector<8x384xf32>
    %156 = vector.extract_strided_slice %155 {offsets = [0, 0], sizes = [8, 128], strides = [1, 1]} : vector<8x384xf32> to vector<8x128xf32>
    %157 = vector.extract_strided_slice %155 {offsets = [0, 128], sizes = [8, 128], strides = [1, 1]} : vector<8x384xf32> to vector<8x128xf32>
    %158 = vector.extract_strided_slice %155 {offsets = [0, 256], sizes = [8, 128], strides = [1, 1]} : vector<8x384xf32> to vector<8x128xf32>
    %159 = vector.extract_strided_slice %149 {offsets = [0, 384], sizes = [8, 128], strides = [1, 1]} : vector<8x512xf32> to vector<8x128xf32>
    %160 = math.tanh %159 : vector<8x128xf32>
    %161 = arith.mulf %157, %119 : vector<8x128xf32>
    %162 = arith.mulf %156, %160 : vector<8x128xf32>
    %163 = arith.addf %161, %162 : vector<8x128xf32>
    %164 = math.tanh %163 : vector<8x128xf32>
    %165 = arith.mulf %158, %164 : vector<8x128xf32>
    %166 = arith.truncf %165 : vector<8x128xf32> to vector<8x128xbf16>
    %167 = arith.truncf %144 : vector<8x128xf32> to vector<8x128xbf16>
    %168 = tpu.concatenate %166, %167 in 1 : vector<8x128xbf16>, vector<8x128xbf16> -> vector<8x256xbf16>
    %cst_30 = arith.constant dense<0.000000e+00> : vector<8x1024xf32>
    %169 = tpu.matmul %168, %7, %cst_30 {dimension_numbers = #tpu.dot_dimension_numbers<[1], [0], [0], [1], [0, 0, 1, 1], [], []>} : vector<8x256xbf16>, vector<256x1024xbf16>, vector<8x1024xf32> -> vector<8x1024xf32>
    %170 = vector.extract_strided_slice %169 {offsets = [0, 0], sizes = [8, 512], strides = [1, 1]} : vector<8x1024xf32> to vector<8x512xf32>
    %171 = vector.extract_strided_slice %169 {offsets = [0, 512], sizes = [8, 512], strides = [1, 1]} : vector<8x1024xf32> to vector<8x512xf32>
    %172 = arith.addf %171, %10 : vector<8x512xf32>
    %173 = vector.extract_strided_slice %172 {offsets = [0, 0], sizes = [8, 384], strides = [1, 1]} : vector<8x512xf32> to vector<8x384xf32>
    %174 = arith.negf %173 : vector<8x384xf32>
    %175 = math.exp %174 : vector<8x384xf32>
    %cst_31 = arith.constant 1.000000e+00 : f32
    %176 = vector.broadcast %cst_31 : f32 to vector<8x384xf32>
    %177 = arith.addf %176, %175 : vector<8x384xf32>
    %178 = arith.divf %176, %177 : vector<8x384xf32>
    %179 = vector.extract_strided_slice %178 {offsets = [0, 0], sizes = [8, 128], strides = [1, 1]} : vector<8x384xf32> to vector<8x128xf32>
    %180 = vector.extract_strided_slice %178 {offsets = [0, 128], sizes = [8, 128], strides = [1, 1]} : vector<8x384xf32> to vector<8x128xf32>
    %181 = vector.extract_strided_slice %178 {offsets = [0, 256], sizes = [8, 128], strides = [1, 1]} : vector<8x384xf32> to vector<8x128xf32>
    %182 = vector.extract_strided_slice %172 {offsets = [0, 384], sizes = [8, 128], strides = [1, 1]} : vector<8x512xf32> to vector<8x128xf32>
    %183 = math.tanh %182 : vector<8x128xf32>
    %184 = arith.mulf %180, %142 : vector<8x128xf32>
    %185 = arith.mulf %179, %183 : vector<8x128xf32>
    %186 = arith.addf %184, %185 : vector<8x128xf32>
    %187 = math.tanh %186 : vector<8x128xf32>
    %188 = arith.mulf %181, %187 : vector<8x128xf32>
    %c4_i32 = arith.constant 4 : i32
    %c8_i32_32 = arith.constant 8 : i32
    %189 = arith.muli %c4_i32, %c8_i32_32 : i32
    %190 = tpu.assume_multiple %189, 8 : i32
    %191 = arith.index_cast %190 : i32 to index
    %c0_33 = arith.constant 0 : index
    %192 = vector.load %arg8[%191, %c0_33] : memref<64x512xf32, #tpu.memory_space<vmem>>, vector<8x512xf32>
    %193 = arith.addf %192, %170 : vector<8x512xf32>
    %194 = vector.extract_strided_slice %193 {offsets = [0, 0], sizes = [8, 384], strides = [1, 1]} : vector<8x512xf32> to vector<8x384xf32>
    %195 = arith.negf %194 : vector<8x384xf32>
    %196 = math.exp %195 : vector<8x384xf32>
    %cst_34 = arith.constant 1.000000e+00 : f32
    %197 = vector.broadcast %cst_34 : f32 to vector<8x384xf32>
    %198 = arith.addf %197, %196 : vector<8x384xf32>
    %199 = arith.divf %197, %198 : vector<8x384xf32>
    %200 = vector.extract_strided_slice %199 {offsets = [0, 0], sizes = [8, 128], strides = [1, 1]} : vector<8x384xf32> to vector<8x128xf32>
    %201 = vector.extract_strided_slice %199 {offsets = [0, 128], sizes = [8, 128], strides = [1, 1]} : vector<8x384xf32> to vector<8x128xf32>
    %202 = vector.extract_strided_slice %199 {offsets = [0, 256], sizes = [8, 128], strides = [1, 1]} : vector<8x384xf32> to vector<8x128xf32>
    %203 = vector.extract_strided_slice %193 {offsets = [0, 384], sizes = [8, 128], strides = [1, 1]} : vector<8x512xf32> to vector<8x128xf32>
    %204 = math.tanh %203 : vector<8x128xf32>
    %205 = arith.mulf %201, %163 : vector<8x128xf32>
    %206 = arith.mulf %200, %204 : vector<8x128xf32>
    %207 = arith.addf %205, %206 : vector<8x128xf32>
    %208 = math.tanh %207 : vector<8x128xf32>
    %209 = arith.mulf %202, %208 : vector<8x128xf32>
    %210 = arith.truncf %209 : vector<8x128xf32> to vector<8x128xbf16>
    %211 = arith.truncf %188 : vector<8x128xf32> to vector<8x128xbf16>
    %212 = tpu.concatenate %210, %211 in 1 : vector<8x128xbf16>, vector<8x128xbf16> -> vector<8x256xbf16>
    %cst_35 = arith.constant dense<0.000000e+00> : vector<8x1024xf32>
    %213 = tpu.matmul %212, %7, %cst_35 {dimension_numbers = #tpu.dot_dimension_numbers<[1], [0], [0], [1], [0, 0, 1, 1], [], []>} : vector<8x256xbf16>, vector<256x1024xbf16>, vector<8x1024xf32> -> vector<8x1024xf32>
    %214 = vector.extract_strided_slice %213 {offsets = [0, 0], sizes = [8, 512], strides = [1, 1]} : vector<8x1024xf32> to vector<8x512xf32>
    %215 = vector.extract_strided_slice %213 {offsets = [0, 512], sizes = [8, 512], strides = [1, 1]} : vector<8x1024xf32> to vector<8x512xf32>
    %216 = arith.addf %215, %10 : vector<8x512xf32>
    %217 = vector.extract_strided_slice %216 {offsets = [0, 0], sizes = [8, 384], strides = [1, 1]} : vector<8x512xf32> to vector<8x384xf32>
    %218 = arith.negf %217 : vector<8x384xf32>
    %219 = math.exp %218 : vector<8x384xf32>
    %cst_36 = arith.constant 1.000000e+00 : f32
    %220 = vector.broadcast %cst_36 : f32 to vector<8x384xf32>
    %221 = arith.addf %220, %219 : vector<8x384xf32>
    %222 = arith.divf %220, %221 : vector<8x384xf32>
    %223 = vector.extract_strided_slice %222 {offsets = [0, 0], sizes = [8, 128], strides = [1, 1]} : vector<8x384xf32> to vector<8x128xf32>
    %224 = vector.extract_strided_slice %222 {offsets = [0, 128], sizes = [8, 128], strides = [1, 1]} : vector<8x384xf32> to vector<8x128xf32>
    %225 = vector.extract_strided_slice %222 {offsets = [0, 256], sizes = [8, 128], strides = [1, 1]} : vector<8x384xf32> to vector<8x128xf32>
    %226 = vector.extract_strided_slice %216 {offsets = [0, 384], sizes = [8, 128], strides = [1, 1]} : vector<8x512xf32> to vector<8x128xf32>
    %227 = math.tanh %226 : vector<8x128xf32>
    %228 = arith.mulf %224, %186 : vector<8x128xf32>
    %229 = arith.mulf %223, %227 : vector<8x128xf32>
    %230 = arith.addf %228, %229 : vector<8x128xf32>
    %231 = math.tanh %230 : vector<8x128xf32>
    %232 = arith.mulf %225, %231 : vector<8x128xf32>
    %c5_i32 = arith.constant 5 : i32
    %c8_i32_37 = arith.constant 8 : i32
    %233 = arith.muli %c5_i32, %c8_i32_37 : i32
    %234 = tpu.assume_multiple %233, 8 : i32
    %235 = arith.index_cast %234 : i32 to index
    %c0_38 = arith.constant 0 : index
    %236 = vector.load %arg8[%235, %c0_38] : memref<64x512xf32, #tpu.memory_space<vmem>>, vector<8x512xf32>
    %237 = arith.addf %236, %214 : vector<8x512xf32>
    %238 = vector.extract_strided_slice %237 {offsets = [0, 0], sizes = [8, 384], strides = [1, 1]} : vector<8x512xf32> to vector<8x384xf32>
    %239 = arith.negf %238 : vector<8x384xf32>
    %240 = math.exp %239 : vector<8x384xf32>
    %cst_39 = arith.constant 1.000000e+00 : f32
    %241 = vector.broadcast %cst_39 : f32 to vector<8x384xf32>
    %242 = arith.addf %241, %240 : vector<8x384xf32>
    %243 = arith.divf %241, %242 : vector<8x384xf32>
    %244 = vector.extract_strided_slice %243 {offsets = [0, 0], sizes = [8, 128], strides = [1, 1]} : vector<8x384xf32> to vector<8x128xf32>
    %245 = vector.extract_strided_slice %243 {offsets = [0, 128], sizes = [8, 128], strides = [1, 1]} : vector<8x384xf32> to vector<8x128xf32>
    %246 = vector.extract_strided_slice %243 {offsets = [0, 256], sizes = [8, 128], strides = [1, 1]} : vector<8x384xf32> to vector<8x128xf32>
    %247 = vector.extract_strided_slice %237 {offsets = [0, 384], sizes = [8, 128], strides = [1, 1]} : vector<8x512xf32> to vector<8x128xf32>
    %248 = math.tanh %247 : vector<8x128xf32>
    %249 = arith.mulf %245, %207 : vector<8x128xf32>
    %250 = arith.mulf %244, %248 : vector<8x128xf32>
    %251 = arith.addf %249, %250 : vector<8x128xf32>
    %252 = math.tanh %251 : vector<8x128xf32>
    %253 = arith.mulf %246, %252 : vector<8x128xf32>
    %254 = arith.truncf %253 : vector<8x128xf32> to vector<8x128xbf16>
    %255 = arith.truncf %232 : vector<8x128xf32> to vector<8x128xbf16>
    %256 = tpu.concatenate %254, %255 in 1 : vector<8x128xbf16>, vector<8x128xbf16> -> vector<8x256xbf16>
    %cst_40 = arith.constant dense<0.000000e+00> : vector<8x1024xf32>
    %257 = tpu.matmul %256, %7, %cst_40 {dimension_numbers = #tpu.dot_dimension_numbers<[1], [0], [0], [1], [0, 0, 1, 1], [], []>} : vector<8x256xbf16>, vector<256x1024xbf16>, vector<8x1024xf32> -> vector<8x1024xf32>
    %258 = vector.extract_strided_slice %257 {offsets = [0, 0], sizes = [8, 512], strides = [1, 1]} : vector<8x1024xf32> to vector<8x512xf32>
    %259 = vector.extract_strided_slice %257 {offsets = [0, 512], sizes = [8, 512], strides = [1, 1]} : vector<8x1024xf32> to vector<8x512xf32>
    %260 = arith.addf %259, %10 : vector<8x512xf32>
    %261 = vector.extract_strided_slice %260 {offsets = [0, 0], sizes = [8, 384], strides = [1, 1]} : vector<8x512xf32> to vector<8x384xf32>
    %262 = arith.negf %261 : vector<8x384xf32>
    %263 = math.exp %262 : vector<8x384xf32>
    %cst_41 = arith.constant 1.000000e+00 : f32
    %264 = vector.broadcast %cst_41 : f32 to vector<8x384xf32>
    %265 = arith.addf %264, %263 : vector<8x384xf32>
    %266 = arith.divf %264, %265 : vector<8x384xf32>
    %267 = vector.extract_strided_slice %266 {offsets = [0, 0], sizes = [8, 128], strides = [1, 1]} : vector<8x384xf32> to vector<8x128xf32>
    %268 = vector.extract_strided_slice %266 {offsets = [0, 128], sizes = [8, 128], strides = [1, 1]} : vector<8x384xf32> to vector<8x128xf32>
    %269 = vector.extract_strided_slice %266 {offsets = [0, 256], sizes = [8, 128], strides = [1, 1]} : vector<8x384xf32> to vector<8x128xf32>
    %270 = vector.extract_strided_slice %260 {offsets = [0, 384], sizes = [8, 128], strides = [1, 1]} : vector<8x512xf32> to vector<8x128xf32>
    %271 = math.tanh %270 : vector<8x128xf32>
    %272 = arith.mulf %268, %230 : vector<8x128xf32>
    %273 = arith.mulf %267, %271 : vector<8x128xf32>
    %274 = arith.addf %272, %273 : vector<8x128xf32>
    %275 = math.tanh %274 : vector<8x128xf32>
    %276 = arith.mulf %269, %275 : vector<8x128xf32>
    %c6_i32 = arith.constant 6 : i32
    %c8_i32_42 = arith.constant 8 : i32
    %277 = arith.muli %c6_i32, %c8_i32_42 : i32
    %278 = tpu.assume_multiple %277, 8 : i32
    %279 = arith.index_cast %278 : i32 to index
    %c0_43 = arith.constant 0 : index
    %280 = vector.load %arg8[%279, %c0_43] : memref<64x512xf32, #tpu.memory_space<vmem>>, vector<8x512xf32>
    %281 = arith.addf %280, %258 : vector<8x512xf32>
    %282 = vector.extract_strided_slice %281 {offsets = [0, 0], sizes = [8, 384], strides = [1, 1]} : vector<8x512xf32> to vector<8x384xf32>
    %283 = arith.negf %282 : vector<8x384xf32>
    %284 = math.exp %283 : vector<8x384xf32>
    %cst_44 = arith.constant 1.000000e+00 : f32
    %285 = vector.broadcast %cst_44 : f32 to vector<8x384xf32>
    %286 = arith.addf %285, %284 : vector<8x384xf32>
    %287 = arith.divf %285, %286 : vector<8x384xf32>
    %288 = vector.extract_strided_slice %287 {offsets = [0, 0], sizes = [8, 128], strides = [1, 1]} : vector<8x384xf32> to vector<8x128xf32>
    %289 = vector.extract_strided_slice %287 {offsets = [0, 128], sizes = [8, 128], strides = [1, 1]} : vector<8x384xf32> to vector<8x128xf32>
    %290 = vector.extract_strided_slice %287 {offsets = [0, 256], sizes = [8, 128], strides = [1, 1]} : vector<8x384xf32> to vector<8x128xf32>
    %291 = vector.extract_strided_slice %281 {offsets = [0, 384], sizes = [8, 128], strides = [1, 1]} : vector<8x512xf32> to vector<8x128xf32>
    %292 = math.tanh %291 : vector<8x128xf32>
    %293 = arith.mulf %289, %251 : vector<8x128xf32>
    %294 = arith.mulf %288, %292 : vector<8x128xf32>
    %295 = arith.addf %293, %294 : vector<8x128xf32>
    %296 = math.tanh %295 : vector<8x128xf32>
    %297 = arith.mulf %290, %296 : vector<8x128xf32>
    %298 = arith.truncf %297 : vector<8x128xf32> to vector<8x128xbf16>
    %299 = arith.truncf %276 : vector<8x128xf32> to vector<8x128xbf16>
    %300 = tpu.concatenate %298, %299 in 1 : vector<8x128xbf16>, vector<8x128xbf16> -> vector<8x256xbf16>
    %cst_45 = arith.constant dense<0.000000e+00> : vector<8x1024xf32>
    %301 = tpu.matmul %300, %7, %cst_45 {dimension_numbers = #tpu.dot_dimension_numbers<[1], [0], [0], [1], [0, 0, 1, 1], [], []>} : vector<8x256xbf16>, vector<256x1024xbf16>, vector<8x1024xf32> -> vector<8x1024xf32>
    %302 = vector.extract_strided_slice %301 {offsets = [0, 0], sizes = [8, 512], strides = [1, 1]} : vector<8x1024xf32> to vector<8x512xf32>
    %303 = vector.extract_strided_slice %301 {offsets = [0, 512], sizes = [8, 512], strides = [1, 1]} : vector<8x1024xf32> to vector<8x512xf32>
    %304 = arith.addf %303, %10 : vector<8x512xf32>
    %305 = vector.extract_strided_slice %304 {offsets = [0, 0], sizes = [8, 384], strides = [1, 1]} : vector<8x512xf32> to vector<8x384xf32>
    %306 = arith.negf %305 : vector<8x384xf32>
    %307 = math.exp %306 : vector<8x384xf32>
    %cst_46 = arith.constant 1.000000e+00 : f32
    %308 = vector.broadcast %cst_46 : f32 to vector<8x384xf32>
    %309 = arith.addf %308, %307 : vector<8x384xf32>
    %310 = arith.divf %308, %309 : vector<8x384xf32>
    %311 = vector.extract_strided_slice %310 {offsets = [0, 0], sizes = [8, 128], strides = [1, 1]} : vector<8x384xf32> to vector<8x128xf32>
    %312 = vector.extract_strided_slice %310 {offsets = [0, 128], sizes = [8, 128], strides = [1, 1]} : vector<8x384xf32> to vector<8x128xf32>
    %313 = vector.extract_strided_slice %310 {offsets = [0, 256], sizes = [8, 128], strides = [1, 1]} : vector<8x384xf32> to vector<8x128xf32>
    %314 = vector.extract_strided_slice %304 {offsets = [0, 384], sizes = [8, 128], strides = [1, 1]} : vector<8x512xf32> to vector<8x128xf32>
    %315 = math.tanh %314 : vector<8x128xf32>
    %316 = arith.mulf %312, %274 : vector<8x128xf32>
    %317 = arith.mulf %311, %315 : vector<8x128xf32>
    %318 = arith.addf %316, %317 : vector<8x128xf32>
    %319 = math.tanh %318 : vector<8x128xf32>
    %320 = arith.mulf %313, %319 : vector<8x128xf32>
    %c7_i32 = arith.constant 7 : i32
    %c8_i32_47 = arith.constant 8 : i32
    %321 = arith.muli %c7_i32, %c8_i32_47 : i32
    %322 = tpu.assume_multiple %321, 8 : i32
    %323 = arith.index_cast %322 : i32 to index
    %c0_48 = arith.constant 0 : index
    %324 = vector.load %arg8[%323, %c0_48] : memref<64x512xf32, #tpu.memory_space<vmem>>, vector<8x512xf32>
    %325 = arith.addf %324, %302 : vector<8x512xf32>
    %326 = vector.extract_strided_slice %325 {offsets = [0, 0], sizes = [8, 384], strides = [1, 1]} : vector<8x512xf32> to vector<8x384xf32>
    %327 = arith.negf %326 : vector<8x384xf32>
    %328 = math.exp %327 : vector<8x384xf32>
    %cst_49 = arith.constant 1.000000e+00 : f32
    %329 = vector.broadcast %cst_49 : f32 to vector<8x384xf32>
    %330 = arith.addf %329, %328 : vector<8x384xf32>
    %331 = arith.divf %329, %330 : vector<8x384xf32>
    %332 = vector.extract_strided_slice %331 {offsets = [0, 0], sizes = [8, 128], strides = [1, 1]} : vector<8x384xf32> to vector<8x128xf32>
    %333 = vector.extract_strided_slice %331 {offsets = [0, 128], sizes = [8, 128], strides = [1, 1]} : vector<8x384xf32> to vector<8x128xf32>
    %334 = vector.extract_strided_slice %331 {offsets = [0, 256], sizes = [8, 128], strides = [1, 1]} : vector<8x384xf32> to vector<8x128xf32>
    %335 = vector.extract_strided_slice %325 {offsets = [0, 384], sizes = [8, 128], strides = [1, 1]} : vector<8x512xf32> to vector<8x128xf32>
    %336 = math.tanh %335 : vector<8x128xf32>
    %337 = arith.mulf %333, %295 : vector<8x128xf32>
    %338 = arith.mulf %332, %336 : vector<8x128xf32>
    %339 = arith.addf %337, %338 : vector<8x128xf32>
    %340 = math.tanh %339 : vector<8x128xf32>
    %341 = arith.mulf %334, %340 : vector<8x128xf32>
    %342 = arith.truncf %341 : vector<8x128xf32> to vector<8x128xbf16>
    %343 = arith.truncf %320 : vector<8x128xf32> to vector<8x128xbf16>
    %344 = tpu.concatenate %342, %343 in 1 : vector<8x128xbf16>, vector<8x128xbf16> -> vector<8x256xbf16>
    %cst_50 = arith.constant dense<0.000000e+00> : vector<8x1024xf32>
    %345 = tpu.matmul %344, %7, %cst_50 {dimension_numbers = #tpu.dot_dimension_numbers<[1], [0], [0], [1], [0, 0, 1, 1], [], []>} : vector<8x256xbf16>, vector<256x1024xbf16>, vector<8x1024xf32> -> vector<8x1024xf32>
    %346 = vector.extract_strided_slice %345 {offsets = [0, 0], sizes = [8, 512], strides = [1, 1]} : vector<8x1024xf32> to vector<8x512xf32>
    %347 = vector.extract_strided_slice %345 {offsets = [0, 512], sizes = [8, 512], strides = [1, 1]} : vector<8x1024xf32> to vector<8x512xf32>
    %348 = arith.addf %347, %10 : vector<8x512xf32>
    %349 = vector.extract_strided_slice %348 {offsets = [0, 0], sizes = [8, 384], strides = [1, 1]} : vector<8x512xf32> to vector<8x384xf32>
    %350 = arith.negf %349 : vector<8x384xf32>
    %351 = math.exp %350 : vector<8x384xf32>
    %cst_51 = arith.constant 1.000000e+00 : f32
    %352 = vector.broadcast %cst_51 : f32 to vector<8x384xf32>
    %353 = arith.addf %352, %351 : vector<8x384xf32>
    %354 = arith.divf %352, %353 : vector<8x384xf32>
    %355 = vector.extract_strided_slice %354 {offsets = [0, 0], sizes = [8, 128], strides = [1, 1]} : vector<8x384xf32> to vector<8x128xf32>
    %356 = vector.extract_strided_slice %354 {offsets = [0, 128], sizes = [8, 128], strides = [1, 1]} : vector<8x384xf32> to vector<8x128xf32>
    %357 = vector.extract_strided_slice %354 {offsets = [0, 256], sizes = [8, 128], strides = [1, 1]} : vector<8x384xf32> to vector<8x128xf32>
    %358 = vector.extract_strided_slice %348 {offsets = [0, 384], sizes = [8, 128], strides = [1, 1]} : vector<8x512xf32> to vector<8x128xf32>
    %359 = math.tanh %358 : vector<8x128xf32>
    %360 = arith.mulf %356, %318 : vector<8x128xf32>
    %361 = arith.mulf %355, %359 : vector<8x128xf32>
    %362 = arith.addf %360, %361 : vector<8x128xf32>
    %363 = math.tanh %362 : vector<8x128xf32>
    %364 = arith.mulf %357, %363 : vector<8x128xf32>
    %c8_i32_52 = arith.constant 8 : i32
    %c0_53 = arith.constant 0 : index
    %c0_54 = arith.constant 0 : index
    %365 = vector.load %arg5[%c0_53, %c0_54] : memref<128x1xf32, #tpu.memory_space<vmem>>, vector<128x1xf32>
    %cst_55 = arith.constant dense<0.000000e+00> : vector<8x1xf32>
    %366 = tpu.matmul %364, %365, %cst_55 {dimension_numbers = #tpu.dot_dimension_numbers<[1], [0], [0], [1], [0, 0, 1, 1], [], []>} : vector<8x128xf32>, vector<128x1xf32>, vector<8x1xf32> -> vector<8x1xf32>
    %c0_56 = arith.constant 0 : index
    %c0_57 = arith.constant 0 : index
    %367 = vector.load %arg6[%c0_56, %c0_57] : memref<1x1xf32, #tpu.memory_space<vmem>>, vector<1x1xf32>
    %368 = vector.broadcast %367 : vector<1x1xf32> to vector<8x1xf32>
    %369 = arith.addf %366, %368 : vector<8x1xf32>
    %c0_58 = arith.constant 0 : index
    %c0_59 = arith.constant 0 : index
    %370 = vector.load %arg7[%c0_58, %c0_59] : memref<8x1xf32, #tpu.memory_space<vmem>>, vector<8x1xf32>
    tpu.vector_store %arg7[%c0_58, %c0_59], %369 {strides = array<i32>} : memref<8x1xf32, #tpu.memory_space<vmem>>, vector<8x1xf32>,
    return
  }
}

</mosaic_0001>

<bundles_post_ra>
// kernel: tpu_custom_call.1
= control target key start
LH: loop header
LB: loop body
LE: loop exit
PB: predicated region body
PF: predicated region fallthrough
CT: control target
= control target key end

     0   :  { %s5198_s0 = inlined_call_operand.vmem [shape: bf16[64,10], index: 0, kind: input, shape index: {}]   ;;  %s5199_s1 = inlined_call_operand.vmem [shape: bf16[10,512], index: 1, kind: input, shape index: {}]   ;;  %s5200_s2 = inlined_call_operand.vmem [shape: f32[1,512], index: 2, kind: input, shape index: {}]   ;;  %s5201_s3 = inlined_call_operand.hbm [shape: bf16[256,1024], index: 3, kind: input, shape index: {}]   ;;  %s5202_s4 = inlined_call_operand.vmem [shape: f32[1,512], index: 4, kind: input, shape index: {}]   ;;  %s5203_s5 = inlined_call_operand.vmem [shape: f32[128,1], index: 5, kind: input, shape index: {}]   ;;  %s5204_s6 = inlined_call_operand.<no memory space> [shape: f32[1,1], index: 6, kind: input, shape index: {}]   ;;  %s5205_s7 = inlined_call_operand.vmem [shape: f32[8,1], index: 7, kind: output, shape index: {}]  }
   0x1   :  { %v12_v0 = vstv %s5204_s6 }
   0x2   :  { %13 = vst [vmem:[#allocation3] sm:$0x1] %v12_v0 }
   0x3   :  { %14 = vsyncpa [#allocation5], 0  ;;  %s3531_s26 = smov [#allocation4]   ;;  %s3507_s30 = scalar_lea.hbm %s5201_s3, 16384 }
   0x4   :  { %s26_s27 = sshll.u32 %s3531_s26, 4  ;;  %p3508_p0 = scmp.ne.s32.totalorder %s5201_s3, %s3507_s30  ;;  %s27_s27 = int_to_ptr.vmem [resolvable:$true] %s26_s27 }
   0x5   :  { %p3511_p1 = scmp.lt.u32.totalorder %s3507_s30, %s5201_s3 }
   0x7   :  { %p3513_p2 = pnand %p3511_p1, %p3508_p0 }
   0x9   :  { %3516 = shalt.err (!%p3513_p2)
}
   0xa   :  { %s3517_s6 = scalar_lea.vmem %s27_s27, 16384  ;;  %p3522_p4 = scmp.lt.s32.totalorder %s27_s27, %s27_s27 }
   0xb   :  { %p3518_p3 = scmp.ne.s32.totalorder %s27_s27, %s3517_s6  ;;  %p3523_p5 = scmp.lt.s32.totalorder %s3517_s6, %s3517_s6 }
   0xd   :  { %p3524_p6 = por %p3523_p5, %p3522_p4 }
   0xf   :  { %p3525_p7 = pnand %p3524_p6, %p3518_p3 }
  0x11   :  { %3528 = shalt.err (!%p3525_p7)
}
  0x12   :  { %s3532_s12 = smov 512   ;;  %s3533_s13 = smov 32  }
  0x13   :  { %32 = dma.hbm_to_vmem [thread:$0]  %s5201_s3, 16384, %s27_s27, [#allocation5], %s3532_s12, %s3532_s12, %s3533_s13  }
  0x14   :  { %3529 = dma.done.wait [#allocation5], 16384  }
  0x15   :  { %3530 = vsyncadd [#allocation5], 4294950912  ;;  %v5206_v1 = vmov 0   ;;  %vm126_vm0 = vcmask 1044480   ;;  %v3244_v4 = vld [vmem:[%s5198_s0] sm:$0xff]   ;;  %vm113_vm1 = vcmask 80896  }
  0x16   :  { %171 = vmatprep.mubr.bf16.mxu0 %v5206_v1  ;;  %244 = vmatprep.mubr.bf16.mxu1 %v5206_v1  ;;  %v3241_v2 = vld [vmem:[%s5199_s1 + $0x4] ss:$16 sps:$4 sm:$0x1f]   ;;  %v3243_v3 = vld [vmem:[%s5199_s1] ss:$16 sps:$4 sm:$0x1f]  }
  0x17   :  { %2971 = vmatprep.subr.msk.bf16.mxu0 %vm126_vm0, %v3241_v2  ;;  %v128_v5 = vsel %vm126_vm0, %v3243_v3, 0  ;;  %v3245_v6 = vld [vmem:[%s5199_s1 + $0xc] ss:$16 sps:$4 sm:$0x1f]   ;;  %v317_v7 = vld [vmem:[#allocation4] sm:$0xff]  ;;  %vm3536_vm2 = vmmov 0  }
  0x18   :  { %v321_v8 = vld [vmem:[#allocation4 + $0x20] sm:$0xff]  ;;  %140 = vmatpush1.bf16.msra.mxu0 %v128_v5  ;;  %v318_v11 = vld [vmem:[#allocation4 + $0x8] sm:$0xff]  ;;  %2976 = vmatprep.subr.msk.bf16.mxu1 %vm126_vm0, %v3245_v6  ;;  %vm2949_vm3 = vcmask 7168  }
  0x19   :  { %v3247_v9 = vld [vmem:[%s5199_s1 + $0x8] ss:$16 sps:$4 sm:$0x1f]   ;;  %v3612_v10 = vcombine.high %v317_v7, %v321_v8  ;;  %v3614_v13 = vcombine.low %v317_v7, %v321_v8 }
  0x1a   :  { %v322_v12 = vld [vmem:[#allocation4 + $0x28] sm:$0xff]  ;;  %v325_v15 = vld [vmem:[#allocation4 + $0x40] sm:$0xff]  ;;  %v134_v18 = vsel %vm126_vm0, %v3247_v9, 0 }
  0x1b   :  { %5506 = vst [vmem:[#allocation7_spill] sm:$0xff] %v3612_v10  ;;  %5507 = vst [vmem:[#allocation8_spill] sm:$0xff] %v3614_v13  ;;  %v3617_v14 = vcombine.high %v318_v11, %v322_v12  ;;  %v329_v16 = vld [vmem:[#allocation4 + $0x60] sm:$0xff]  ;;  %v326_v17 = vld [vmem:[#allocation4 + $0x48] sm:$0xff]  ;;  %1143 = vmatprep.subr.bf16.mxu0 %v3612_v10  ;;  %2972 = vmatmul.mubr.msk.bf16.vlgmr.msra.gmra.mrb[0].mxu0 %vm113_vm1, %v3244_v4  ;;  %v3624_v23 = vcombine.low %v318_v11, %v322_v12 }
  0x1c   :  { %v3621_v19 = vcombine.high %v325_v15, %v329_v16  ;;  %v330_v20 = vld [vmem:[#allocation4 + $0x68] sm:$0xff]  ;;  %v333_v21 = vld [vmem:[#allocation4 + $0x80] sm:$0xff]  ;;  %213 = vmatpush1.bf16.msra.mxu1 %v134_v18  ;;  %1144 = vmatpush1.bf16.msra.mxu0 %v3614_v13  ;;  %v3630_v25 = vcombine.low %v325_v15, %v329_v16 }
  0x1d   :  { %5508 = vst [vmem:[#allocation9_spill] sm:$0xff] %v3617_v14  ;;  %v337_v22 = vld [vmem:[#allocation4 + $0xa0] sm:$0xff]  ;;  %5510 = vst [vmem:[#allocation11_spill] sm:$0xff] %v3624_v23  ;;  %1184 = vmatprep.subr.bf16.mxu1 %v3617_v14  ;;  %v3628_v24 = vcombine.high %v326_v17, %v330_v20  ;;  %v334_v26 = vld [vmem:[#allocation4 + $0x88] sm:$0xff]  ;;  %181 = vmatprep.mubr.bf16.mxu0 %v5206_v1  ;;  %v3638_v31 = vcombine.low %v326_v17, %v330_v20 }
  0x1e   :  { %5509 = vst [vmem:[#allocation10_spill] sm:$0xff] %v3621_v19  ;;  %5512 = vst [vmem:[#allocation13_spill] sm:$0xff] %v3630_v25  ;;  %v338_v27 = vld [vmem:[#allocation4 + $0xa8] sm:$0xff]  ;;  %v341_v28 = vld [vmem:[#allocation4 + $0xc0] sm:$0xff]  ;;  %1145 = vmatprep.subr.bf16.mxu0 %v3621_v19  ;;  %v3633_v29 = vcombine.high %v333_v21, %v337_v22  ;;  %v3645_v33 = vcombine.low %v333_v21, %v337_v22 }
  0x1f   :  { %5511 = vst [vmem:[#allocation12_spill] sm:$0xff] %v3628_v24  ;;  %v345_v30 = vld [vmem:[#allocation4 + $0xe0] sm:$0xff]  ;;  %2977 = vmatmul.mubr.msk.bf16.vlgmr.msra.gmra.mrb[0].mxu1 %vm113_vm1, %v3244_v4  ;;  %5514 = vst [vmem:[#allocation15_spill] sm:$0xff] %v3638_v31  ;;  %v3643_v32 = vcombine.high %v334_v26, %v338_v27  ;;  %v342_v35 = vld [vmem:[#allocation4 + $0xc8] sm:$0xff]  ;;  %v3651_v37 = vcombine.low %v334_v26, %v338_v27 }
  0x20   :  { %5513 = vst [vmem:[#allocation14_spill] sm:$0xff] %v3633_v29  ;;  %1185 = vmatpush1.bf16.msra.mxu1 %v3624_v23  ;;  %254 = vmatprep.mubr.bf16.mxu1 %v5206_v1  ;;  %5516 = vst [vmem:[#allocation17_spill] sm:$0xff] %v3645_v33  ;;  %v3648_v34 = vcombine.high %v341_v28, %v345_v30  ;;  %v346_v36 = vld [vmem:[#allocation4 + $0xe8] sm:$0xff]  ;;  %v3657_v39 = vcombine.low %v341_v28, %v345_v30  ;;  %v349_v41 = vld [vmem:[#allocation4 + $0x100] sm:$0xff] }
  0x21   :  { %1186 = vmatprep.subr.bf16.mxu1 %v3628_v24  ;;  %1146 = vmatpush1.bf16.msra.mxu0 %v3630_v25  ;;  %5515 = vst [vmem:[#allocation16_spill] sm:$0xff] %v3643_v32  ;;  %5518 = vst [vmem:[#allocation19_spill] sm:$0xff] %v3651_v37  ;;  %v3655_v38 = vcombine.high %v342_v35, %v346_v36  ;;  %v3661_v40 = vcombine.low %v342_v35, %v346_v36  ;;  %v353_v42 = vld [vmem:[#allocation4 + $0x120] sm:$0xff]  ;;  %v350_v43 = vld [vmem:[#allocation4 + $0x108] sm:$0xff] }
  0x22   :  { %1147 = vmatprep.subr.bf16.mxu0 %v3633_v29  ;;  %5517 = vst [vmem:[#allocation18_spill] sm:$0xff] %v3648_v34  ;;  %5520 = vst [vmem:[#allocation21_spill] sm:$0xff] %v3657_v39  ;;  %v3666_v44 = vcombine.high %v349_v41, %v353_v42  ;;  %v354_v45 = vld [vmem:[#allocation4 + $0x128] sm:$0xff]  ;;  %v3670_v47 = vcombine.low %v349_v41, %v353_v42  ;;  %v357_v49 = vld [vmem:[#allocation4 + $0x140] sm:$0xff] }
  0x23   :  { %5519 = vst [vmem:[#allocation20_spill] sm:$0xff] %v3655_v38  ;;  %5521 = vst [vmem:[#allocation22_spill] sm:$0xff] %v3661_v40  ;;  %v3668_v46 = vcombine.high %v350_v43, %v354_v45  ;;  %v3672_v48 = vcombine.low %v350_v43, %v354_v45  ;;  %v361_v50 = vld [vmem:[#allocation4 + $0x160] sm:$0xff]  ;;  %v358_v51 = vld [vmem:[#allocation4 + $0x148] sm:$0xff] }
  0x24   :  { %1187 = vmatpush1.bf16.msra.mxu1 %v3638_v31  ;;  %5522 = vst [vmem:[#allocation23_spill] sm:$0xff] %v3666_v44  ;;  %5524 = vst [vmem:[#allocation25_spill] sm:$0xff] %v3670_v47  ;;  %v3678_v52 = vcombine.high %v357_v49, %v361_v50  ;;  %v362_v53 = vld [vmem:[#allocation4 + $0x168] sm:$0xff]  ;;  %v3682_v55 = vcombine.low %v357_v49, %v361_v50  ;;  %v365_v57 = vld [vmem:[#allocation4 + $0x180] sm:$0xff] }
  0x25   :  { %1188 = vmatprep.subr.bf16.mxu1 %v3643_v32  ;;  %1148 = vmatpush1.bf16.msra.mxu0 %v3645_v33  ;;  %5523 = vst [vmem:[#allocation24_spill] sm:$0xff] %v3668_v46  ;;  %5525 = vst [vmem:[#allocation26_spill] sm:$0xff] %v3672_v48  ;;  %v3680_v54 = vcombine.high %v358_v51, %v362_v53  ;;  %v3684_v56 = vcombine.low %v358_v51, %v362_v53  ;;  %v369_v58 = vld [vmem:[#allocation4 + $0x1a0] sm:$0xff]  ;;  %v366_v59 = vld [vmem:[#allocation4 + $0x188] sm:$0xff] }
  0x26   :  { %1149 = vmatprep.subr.bf16.mxu0 %v3648_v34  ;;  %5526 = vst [vmem:[#allocation27_spill] sm:$0xff] %v3678_v52  ;;  %5528 = vst [vmem:[#allocation29_spill] sm:$0xff] %v3682_v55  ;;  %v3690_v60 = vcombine.high %v365_v57, %v369_v58  ;;  %v370_v61 = vld [vmem:[#allocation4 + $0x1a8] sm:$0xff]  ;;  %v3694_v63 = vcombine.low %v365_v57, %v369_v58  ;;  %v373_v2 = vld [vmem:[#allocation4 + $0x1c0] sm:$0xff] }
  0x27   :  { %5527 = vst [vmem:[#allocation28_spill] sm:$0xff] %v3680_v54  ;;  %5529 = vst [vmem:[#allocation30_spill] sm:$0xff] %v3684_v56  ;;  %v3692_v62 = vcombine.high %v366_v59, %v370_v61  ;;  %v3696_v0 = vcombine.low %v366_v59, %v370_v61  ;;  %v377_v3 = vld [vmem:[#allocation4 + $0x1e0] sm:$0xff]  ;;  %v374_v4 = vld [vmem:[#allocation4 + $0x1c8] sm:$0xff] }
  0x28   :  { %1189 = vmatpush1.bf16.msra.mxu1 %v3651_v37  ;;  %5530 = vst [vmem:[#allocation31_spill] sm:$0xff] %v3690_v60  ;;  %5532 = vst [vmem:[#allocation33_spill] sm:$0xff] %v3694_v63  ;;  %v3702_v5 = vcombine.high %v373_v2, %v377_v3  ;;  %v378_v6 = vld [vmem:[#allocation4 + $0x1e8] sm:$0xff]  ;;  %v3706_v8 = vcombine.low %v373_v2, %v377_v3  ;;  %v381_v11 = vld [vmem:[#allocation4 + $0x200] sm:$0xff] }
  0x29   :  { %1190 = vmatprep.subr.bf16.mxu1 %v3655_v38  ;;  %1150 = vmatpush1.bf16.msra.mxu0 %v3657_v39  ;;  %5531 = vst [vmem:[#allocation32_spill] sm:$0xff] %v3692_v62  ;;  %5533 = vst [vmem:[#allocation34_spill] sm:$0xff] %v3696_v0  ;;  %v3704_v7 = vcombine.high %v374_v4, %v378_v6  ;;  %v3708_v9 = vcombine.low %v374_v4, %v378_v6  ;;  %v385_v12 = vld [vmem:[#allocation4 + $0x220] sm:$0xff]  ;;  %v382_v15 = vld [vmem:[#allocation4 + $0x208] sm:$0xff] }
  0x2a   :  { %1151 = vmatprep.subr.bf16.mxu0 %v3666_v44  ;;  %5534 = vst [vmem:[#allocation35_spill] sm:$0xff] %v3702_v5  ;;  %5536 = vst [vmem:[#allocation37_spill] sm:$0xff] %v3706_v8  ;;  %v3714_v16 = vcombine.high %v381_v11, %v385_v12  ;;  %v386_v17 = vld [vmem:[#allocation4 + $0x228] sm:$0xff]  ;;  %v3718_v20 = vcombine.low %v381_v11, %v385_v12  ;;  %v389_v22 = vld [vmem:[#allocation4 + $0x240] sm:$0xff] }
  0x2b   :  { %5535 = vst [vmem:[#allocation36_spill] sm:$0xff] %v3704_v7  ;;  %5537 = vst [vmem:[#allocation38_spill] sm:$0xff] %v3708_v9  ;;  %v3716_v18 = vcombine.high %v382_v15, %v386_v17  ;;  %v3720_v21 = vcombine.low %v382_v15, %v386_v17  ;;  %v393_v26 = vld [vmem:[#allocation4 + $0x260] sm:$0xff]  ;;  %v390_v27 = vld [vmem:[#allocation4 + $0x248] sm:$0xff] }
  0x2c   :  { %1191 = vmatpush1.bf16.msra.mxu1 %v3661_v40  ;;  %5538 = vst [vmem:[#allocation39_spill] sm:$0xff] %v3714_v16  ;;  %5540 = vst [vmem:[#allocation41_spill] sm:$0xff] %v3718_v20  ;;  %v3726_v28 = vcombine.high %v389_v22, %v393_v26  ;;  %v394_v30 = vld [vmem:[#allocation4 + $0x268] sm:$0xff]  ;;  %v3730_v36 = vcombine.low %v389_v22, %v393_v26  ;;  %v397_v43 = vld [vmem:[#allocation4 + $0x280] sm:$0xff] }
  0x2d   :  { %1192 = vmatprep.subr.bf16.mxu1 %v3668_v46  ;;  %1152 = vmatpush1.bf16.msra.mxu0 %v3670_v47  ;;  %5539 = vst [vmem:[#allocation40_spill] sm:$0xff] %v3716_v18  ;;  %5541 = vst [vmem:[#allocation42_spill] sm:$0xff] %v3720_v21  ;;  %v3728_v35 = vcombine.high %v390_v27, %v394_v30  ;;  %v3732_v41 = vcombine.low %v390_v27, %v394_v30  ;;  %v3248_v42 = vld [vmem:[%s5198_s0 + $0x8] sm:$0xff]   ;;  %v3249_v15 = vld [vmem:[%s5198_s0 + $0x10] sm:$0xff]  }
  0x2e   :  { %1153 = vmatprep.subr.bf16.mxu0 %v3678_v52  ;;  %5542 = vst [vmem:[#allocation43_spill] sm:$0xff] %v3726_v28  ;;  %5544 = vst [vmem:[#allocation45_spill] sm:$0xff] %v3730_v36  ;;  %v401_v45 = vld [vmem:[#allocation4 + $0x2a0] sm:$0xff]  ;;  %v398_v49 = vld [vmem:[#allocation4 + $0x288] sm:$0xff]  ;;  %2973 = vmatmul.mubr.msk.bf16.gmra.mrb[4].mxu0 %vm113_vm1, %v3248_v42 }
  0x2f   :  { %5543 = vst [vmem:[#allocation44_spill] sm:$0xff] %v3728_v35  ;;  %5545 = vst [vmem:[#allocation46_spill] sm:$0xff] %v3732_v41  ;;  %v3742_v50 = vcombine.high %v397_v43, %v401_v45  ;;  %v402_v51 = vld [vmem:[#allocation4 + $0x2a8] sm:$0xff]  ;;  %2978 = vmatmul.mubr.msk.bf16.gmra.mrb[4].mxu1 %vm113_vm1, %v3248_v42  ;;  %v3747_v57 = vcombine.low %v397_v43, %v401_v45  ;;  %191 = vmatprep.mubr.bf16.mxu0 %v5206_v1  ;;  %v405_v59 = vld [vmem:[#allocation4 + $0x2c0] sm:$0xff] }
  0x30   :  { %1193 = vmatpush1.bf16.msra.mxu1 %v3672_v48  ;;  %v3744_v53 = vcombine.high %v398_v49, %v402_v51  ;;  %v3749_v58 = vcombine.low %v398_v49, %v402_v51  ;;  %264 = vmatprep.mubr.bf16.mxu1 %v5206_v1  ;;  %v409_v61 = vld [vmem:[#allocation4 + $0x2e0] sm:$0xff]  ;;  %v406_v2 = vld [vmem:[#allocation4 + $0x2c8] sm:$0xff] }
  0x31   :  { %1194 = vmatprep.subr.bf16.mxu1 %v3680_v54  ;;  %1154 = vmatpush1.bf16.msra.mxu0 %v3682_v55  ;;  %5546 = vst [vmem:[#allocation47_spill] sm:$0xff] %v3742_v50  ;;  %5548 = vst [vmem:[#allocation49_spill] sm:$0xff] %v3747_v57  ;;  %v3757_v3 = vcombine.high %v405_v59, %v409_v61  ;;  %v410_v4 = vld [vmem:[#allocation4 + $0x2e8] sm:$0xff]  ;;  %v3761_v11 = vcombine.low %v405_v59, %v409_v61  ;;  %v413_v17 = vld [vmem:[#allocation4 + $0x300] sm:$0xff] }
  0x32   :  { %1155 = vmatprep.subr.bf16.mxu0 %v3690_v60  ;;  %5547 = vst [vmem:[#allocation48_spill] sm:$0xff] %v3744_v53  ;;  %5549 = vst [vmem:[#allocation50_spill] sm:$0xff] %v3749_v58  ;;  %v3759_v6 = vcombine.high %v406_v2, %v410_v4  ;;  %v3763_v12 = vcombine.low %v406_v2, %v410_v4  ;;  %v417_v22 = vld [vmem:[#allocation4 + $0x320] sm:$0xff]  ;;  %v414_v26 = vld [vmem:[#allocation4 + $0x308] sm:$0xff] }
  0x33   :  { %5550 = vst [vmem:[#allocation51_spill] sm:$0xff] %v3757_v3  ;;  %5552 = vst [vmem:[#allocation53_spill] sm:$0xff] %v3761_v11  ;;  %v3773_v27 = vcombine.high %v413_v17, %v417_v22  ;;  %v418_v30 = vld [vmem:[#allocation4 + $0x328] sm:$0xff]  ;;  %v3778_v43 = vcombine.low %v413_v17, %v417_v22  ;;  %v421_v49 = vld [vmem:[#allocation4 + $0x340] sm:$0xff] }
  0x34   :  { %1195 = vmatpush1.bf16.msra.mxu1 %v3684_v56  ;;  %5551 = vst [vmem:[#allocation52_spill] sm:$0xff] %v3759_v6  ;;  %5553 = vst [vmem:[#allocation54_spill] sm:$0xff] %v3763_v12  ;;  %v3775_v42 = vcombine.high %v414_v26, %v418_v30  ;;  %v3780_v45 = vcombine.low %v414_v26, %v418_v30  ;;  %v425_v51 = vld [vmem:[#allocation4 + $0x360] sm:$0xff]  ;;  %v422_v59 = vld [vmem:[#allocation4 + $0x348] sm:$0xff] }
  0x35   :  { %1196 = vmatprep.subr.bf16.mxu1 %v3692_v62  ;;  %1156 = vmatpush1.bf16.msra.mxu0 %v3694_v63  ;;  %5554 = vst [vmem:[#allocation55_spill] sm:$0xff] %v3773_v27  ;;  %5556 = vst [vmem:[#allocation57_spill] sm:$0xff] %v3778_v43  ;;  %v3788_v61 = vcombine.high %v421_v49, %v425_v51  ;;  %v426_v2 = vld [vmem:[#allocation4 + $0x368] sm:$0xff]  ;;  %v3790_v4 = vcombine.low %v421_v49, %v425_v51  ;;  %v429_v17 = vld [vmem:[#allocation4 + $0x380] sm:$0xff] }
  0x36   :  { %1157 = vmatprep.subr.bf16.mxu0 %v3702_v5  ;;  %2974 = vmatmul.mubr.msk.bf16.gmra.mrb[8].mxu0 %vm113_vm1, %v3249_v15  ;;  %5555 = vst [vmem:[#allocation56_spill] sm:$0xff] %v3775_v42  ;;  %5557 = vst [vmem:[#allocation58_spill] sm:$0xff] %v3780_v45  ;;  %v3795_v22 = vcombine.high %v422_v59, %v426_v2  ;;  %v3797_v26 = vcombine.low %v422_v59, %v426_v2  ;;  %v433_v30 = vld [vmem:[#allocation4 + $0x3a0] sm:$0xff]  ;;  %v442_v59 = vld [vmem:[#allocation4 + $0x3e8] sm:$0xff] }
  0x37   :  { %2979 = vmatmul.mubr.msk.bf16.gmra.mrb[8].mxu1 %vm113_vm1, %v3249_v15  ;;  %201 = vmatprep.mubr.bf16.mxu0 %v5206_v1  ;;  %5558 = vst [vmem:[#allocation59_spill] sm:$0xff] %v3788_v61  ;;  %5559 = vst [vmem:[#allocation60_spill] sm:$0xff] %v3790_v4  ;;  %v3250_v15 = vld [vmem:[%s5198_s0 + $0x18] sm:$0xff]   ;;  %v437_v49 = vld [vmem:[#allocation4 + $0x3c0] sm:$0xff] }
  0x38   :  { %1197 = vmatpush1.bf16.msra.mxu1 %v3696_v0  ;;  %274 = vmatprep.mubr.bf16.mxu1 %v5206_v1  ;;  %5560 = vst [vmem:[#allocation61_spill] sm:$0xff] %v3795_v22  ;;  %5561 = vst [vmem:[#allocation62_spill] sm:$0xff] %v3797_v26  ;;  %v430_v1 = vld [vmem:[#allocation4 + $0x388] sm:$0xff]  ;;  %v441_v51 = vld [vmem:[#allocation4 + $0x3e0] sm:$0xff] }
  0x39   :  { %1198 = vmatprep.subr.bf16.mxu1 %v3704_v7  ;;  %1158 = vmatpush1.bf16.msra.mxu0 %v3706_v8 }
  0x3a   :  { %1159 = vmatprep.subr.bf16.mxu0 %v3714_v16 }
  0x3c   :  { %1199 = vmatpush1.bf16.msra.mxu1 %v3708_v9 }
  0x3d   :  { %1200 = vmatprep.subr.bf16.mxu1 %v3716_v18  ;;  %1160 = vmatpush1.bf16.msra.mxu0 %v3718_v20 }
  0x3e   :  { %1161 = vmatprep.subr.bf16.mxu0 %v3726_v28  ;;  %2975 = vmatmul.mubr.msk.bf16.gmra.mrb[12].mxu0 %vm113_vm1, %v3250_v15 }
  0x3f   :  { %2980 = vmatmul.mubr.msk.bf16.gmra.mrb[12].mxu1 %vm113_vm1, %v3250_v15 }
  0x40   :  { %1201 = vmatpush1.bf16.msra.mxu1 %v3720_v21 }
  0x41   :  { %1202 = vmatprep.subr.bf16.mxu1 %v3728_v35  ;;  %1162 = vmatpush1.bf16.msra.mxu0 %v3730_v36 }
  0x42   :  { %1163 = vmatprep.subr.bf16.mxu0 %v3742_v50 }
  0x44   :  { %1203 = vmatpush1.bf16.msra.mxu1 %v3732_v41 }
  0x45   :  { %1204 = vmatprep.subr.bf16.mxu1 %v3744_v53  ;;  %1164 = vmatpush1.bf16.msra.mxu0 %v3747_v57  ;;  %v348_v57 = vld [vmem:[#allocation4 + $0xf8] sm:$0xff] }
  0x46   :  { %1165 = vmatprep.subr.bf16.mxu0 %v3757_v3 }
  0x48   :  { %1205 = vmatpush1.bf16.msra.mxu1 %v3749_v58 }
  0x49   :  { %1206 = vmatprep.subr.bf16.mxu1 %v3759_v6  ;;  %1166 = vmatpush1.bf16.msra.mxu0 %v3761_v11  ;;  %v323_v6 = vld [vmem:[#allocation4 + $0x30] sm:$0xff] }
  0x4a   :  { %1167 = vmatprep.subr.bf16.mxu0 %v3773_v27  ;;  %v438_v27 = vld [vmem:[#allocation4 + $0x3c8] sm:$0xff] }
  0x4b   :  { %v3816_v11 = vcombine.high %v438_v27, %v442_v59 }
  0x4c   :  { %1207 = vmatpush1.bf16.msra.mxu1 %v3763_v12  ;;  %v3806_v12 = vcombine.low %v429_v17, %v433_v30 }
  0x4d   :  { %1208 = vmatprep.subr.bf16.mxu1 %v3775_v42  ;;  %1168 = vmatpush1.bf16.msra.mxu0 %v3778_v43  ;;  %v434_v43 = vld [vmem:[#allocation4 + $0x3a8] sm:$0xff]  ;;  %5567 = vst [vmem:[#allocation68_spill] sm:$0xff] %v3816_v11 }
  0x4e   :  { %1169 = vmatprep.subr.bf16.mxu0 %v3788_v61  ;;  %v3802_v42 = vcombine.high %v430_v1, %v434_v43  ;;  %5564 = vst [vmem:[#allocation65_spill] sm:$0xff] %v3806_v12  ;;  %v3810_v2 = vcombine.low %v430_v1, %v434_v43  ;;  %v3812_v61 = vcombine.high %v437_v49, %v441_v51 }
  0x4f   :  { %v3821_v1 = vcombine.low %v437_v49, %v441_v51  ;;  %v3826_v43 = vcombine.low %v438_v27, %v442_v59  ;;  %v57_v27 = vlaneseq }
  0x50   :  { %1209 = vmatpush1.bf16.msra.mxu1 %v3780_v45  ;;  %v3800_v45 = vcombine.high %v429_v17, %v433_v30  ;;  %5563 = vst [vmem:[#allocation64_spill] sm:$0xff] %v3802_v42  ;;  %5565 = vst [vmem:[#allocation66_spill] sm:$0xff] %v3810_v2  ;;  %v5568_v17 = vmov 0   ;;  %v320_v30 = vld [vmem:[#allocation4 + $0x18] sm:$0xff] }
  0x51   :  { %1210 = vmatprep.subr.bf16.mxu1 %v3795_v22  ;;  %1170 = vmatpush1.bf16.msra.mxu0 %v3790_v4  ;;  %5566 = vst [vmem:[#allocation67_spill] sm:$0xff] %v3812_v61  ;;  %v319_v22 = vld [vmem:[#allocation4 + $0x10] sm:$0xff]  ;;  %5569 = vst [vmem:[#allocation69_spill] sm:$0xff] %v3821_v1  ;;  %v3841_v59 = vshrl.u32 %v57_v27, 7 }
  0x52   :  { %5562 = vst [vmem:[#allocation63_spill] sm:$0xff] %v3800_v45  ;;  %1171 = vmatprep.subr.bf16.mxu0 %v3800_v45  ;;  %1175 = vmatprep.mubr.bf16.mxu0 %v5568_v17  ;;  %5570 = vst [vmem:[#allocation70_spill] sm:$0xff] %v3826_v43  ;;  %v3837_v49 = vcombine.low %v319_v22, %v323_v6 }
  0x53   :  { %1216 = vmatprep.mubr.bf16.mxu1 %v5568_v17  ;;  %5574 = vst [vmem:[#allocation74_spill] sm:$0xff] %v3841_v59  ;;  %v5265_v4 = vsub.s32 3, %v3841_v59 }
  0x54   :  { %1211 = vmatpush1.bf16.msra.mxu1 %v3797_v26  ;;  %v324_v26 = vld [vmem:[#allocation4 + $0x38] sm:$0xff] }
  0x55   :  { %1212 = vmatprep.subr.bf16.mxu1 %v3802_v42  ;;  %1172 = vmatpush1.bf16.msra.mxu0 %v3806_v12  ;;  %v3828_v42 = vcombine.high %v319_v22, %v323_v6  ;;  %v3831_v15 = vcombine.high %v320_v30, %v324_v26  ;;  %v3839_v51 = vcombine.low %v320_v30, %v324_v26  ;;  %v5256_v22 = vsub.s32 2, %v3841_v59 }
  0x56   :  { %1173 = vmatprep.subr.bf16.mxu0 %v3812_v61  ;;  %v5246_v61 = vsub.s32 0, %v3841_v59 }
  0x57   :  { %5571 = vst [vmem:[#allocation71_spill] sm:$0xff] %v3828_v42  ;;  %5572 = vst [vmem:[#allocation72_spill] sm:$0xff] %v3831_v15 }
  0x58   :  { %1213 = vmatpush1.bf16.msra.mxu1 %v3810_v2  ;;  %5573 = vst [vmem:[#allocation73_spill] sm:$0xff] %v3839_v51 }
  0x59   :  { %1214 = vmatprep.subr.bf16.mxu1 %v3816_v11  ;;  %1174 = vmatpush1.bf16.msra.mxu0 %v3821_v1  ;;  %v55_v11 = vld [vmem:[%s5200_s2] sm:$0xf]  ;;  %v5249_v1 = vsub.s32 1, %v3841_v59 }
  0x5a   :  { %1225 = vmatprep.subr.bf16.mxu0 %v3828_v42  ;;  %v3850_v42 = vrot.slane %v55_v11, %v5246_v61  ;;  %v3865_v61 = vrot.slane %v55_v11, %v5256_v22 }
  0x5b   :  { %v3854_v6 = vrot.slane %v55_v11, %v5249_v1 }
  0x5c   :  { %1215 = vmatpush1.bf16.msra.mxu1 %v3826_v43  ;;  %5575 = vst [vmem:[#allocation75_spill] sm:$0xff] %v3850_v42  ;;  %5579 = vst [vmem:[#allocation79_spill] sm:$0xff] %v3865_v61 }
  0x5d   :  { %1266 = vmatprep.subr.bf16.mxu1 %v3831_v15  ;;  %5576 = vst [vmem:[#allocation76_spill] sm:$0xff] %v3854_v6 }
  0xee   :  { %v173_v26 = vpop.f32.mrb[0].mxu0 }
  0xef   :  { %v174_v30 = vadd.f32 %v173_v26, %v3850_v42  ;;  %v175_v27 = vpop.f32.mrb[1].mxu0 }
  0xf0   :  { %v176_v15 = vadd.f32 %v175_v27, %v3854_v6  ;;  %v3859_v43 = vpop.f32.mrb[2].mxu0 }
  0xf1   :  { %5577 = vst [vmem:[#allocation77_spill] sm:$0xff] %v3859_v43  ;;  %v2981_v2 = vmul.f32 -1.442695, %v174_v30  ;;  %v3861_v12 = vpop.f32.mrb[3].mxu0  ;;  %v3875_v30 = vrot.slane %v55_v11, %v5265_v4 }
  0xf2   :  { %5578 = vst [vmem:[#allocation78_spill] sm:$0xff] %v3861_v12  ;;  %v246_v45 = vpop.f32.mrb[0].mxu1  ;;  %v2982_v1 = vmul.f32 -1.442695, %v176_v15 }
  0xf3   :  { %v248_v3 = vpop.f32.mrb[1].mxu1  ;;  %3251 = vpow2.f32 %v2981_v2  ;;  %v247_v27 = vadd.f32 %v246_v45, %v3865_v61  ;;  %5582 = vst [vmem:[#allocation82_spill] sm:$0xff] %v3875_v30 }
  0xf4   :  { %v3868_v58 = vpop.f32.mrb[2].mxu1  ;;  %3253 = vpow2.f32 %v2982_v1  ;;  %v249_v22 = vadd.f32 %v248_v3, %v3875_v30  ;;  %v344_v30 = vld [vmem:[#allocation4 + $0xd8] sm:$0xff] }
  0xf5   :  { %5580 = vst [vmem:[#allocation80_spill] sm:$0xff] %v3868_v58  ;;  %v3870_v26 = vpop.f32.mrb[3].mxu1  ;;  %v2983_v12 = vmul.f32 -1.442695, %v247_v27 }
  0xf6   :  { %5581 = vst [vmem:[#allocation81_spill] sm:$0xff] %v3870_v26 }
  0xf7   :  { %3255 = vpow2.f32 %v2983_v12  ;;  %v327_v12 = vld [vmem:[#allocation4 + $0x50] sm:$0xff] }
  0xf8   :  { %3257 = vtanh.f32 %v249_v22  ;;  %v328_v22 = vld [vmem:[#allocation4 + $0x58] sm:$0xff] }
  0xfd   :  { %v3252_v6 = vpop.eup %3251 }
  0xfe   :  { %v3254_v15 = vpop.eup %3253  ;;  %v487_v43 = vadd.f32 1.0, %v3252_v6  ;;  %v331_v6 = vld [vmem:[#allocation4 + $0x70] sm:$0xff] }
  0xff   :  { %v488_v2 = vadd.f32 1.0, %v3254_v15  ;;  %v332_v15 = vld [vmem:[#allocation4 + $0x78] sm:$0xff]  ;;  %v3883_v4 = vcombine.high %v327_v12, %v331_v6 }
 0x100   :  { %3259 = vrcp.f32 %v487_v43 }
 0x101   :  { %3261 = vrcp.f32 %v488_v2  ;;  %v3256_v1 = vpop.eup %3255  ;;  %5584 = vst [vmem:[#allocation84_spill] sm:$0xff] %v3883_v4 }
 0x102   :  { %v3258_v58 = vpop.eup %3257  ;;  %v489_v42 = vadd.f32 1.0, %v3256_v1  ;;  %v3885_v1 = vcombine.high %v328_v22, %v332_v15 }
 0x104   :  { %3263 = vrcp.f32 %v489_v42  ;;  %5585 = vst [vmem:[#allocation85_spill] sm:$0xff] %v3885_v1  ;;  %v336_v42 = vld [vmem:[#allocation4 + $0x98] sm:$0xff] }
 0x10a   :  { %v3260_v26 = vpop.eup %3259 }
 0x10b   :  { %v3262_v45 = vpop.eup %3261  ;;  %v498_v61 = vmul.f32 %v3260_v26, %v3258_v58  ;;  %v335_v58 = vld [vmem:[#allocation4 + $0x90] sm:$0xff] }
 0x10c   :  { %v497_v59 = vmul.f32 0.0, %v3262_v45  ;;  %v339_v26 = vld [vmem:[#allocation4 + $0xb0] sm:$0xff]  ;;  %v3893_v45 = vcombine.low %v328_v22, %v332_v15  ;;  %v3913_v15 = vcombine.high %v344_v30, %v348_v57 }
 0x10e   :  { %v3878_v11 = vadd.f32 %v498_v61, %v497_v59  ;;  %v3264_v3 = vpop.eup %3263  ;;  %v340_v61 = vld [vmem:[#allocation4 + $0xb8] sm:$0xff]  ;;  %v3891_v59 = vcombine.low %v327_v12, %v331_v6  ;;  %5587 = vst [vmem:[#allocation87_spill] sm:$0xff] %v3893_v45  ;;  %v3905_v12 = vcombine.low %v335_v58, %v339_v26  ;;  %5593 = vst [vmem:[#allocation93_spill] sm:$0xff] %v3913_v15 }
 0x10f   :  { %v3907_v6 = vcombine.low %v336_v42, %v340_v61 }
 0x110   :  { %5583 = vst [vmem:[#allocation83_spill] sm:$0xff] %v3878_v11  ;;  %3265 = vtanh.f32 %v3878_v11  ;;  %5586 = vst [vmem:[#allocation86_spill] sm:$0xff] %v3891_v59  ;;  %v347_v11 = vld [vmem:[#allocation4 + $0xf0] sm:$0xff] }
 0x111   :  { %5590 = vst [vmem:[#allocation90_spill] sm:$0xff] %v3905_v12  ;;  %5591 = vst [vmem:[#allocation91_spill] sm:$0xff] %v3907_v6 }
 0x11a   :  { %v3266_v27 = vpop.eup %3265 }
 0x11b   :  { %v501_v43 = vmul.f32 %v3266_v27, %v3264_v3  ;;  %v3897_v3 = vcombine.high %v335_v58, %v339_v26  ;;  %v3899_v27 = vcombine.high %v336_v42, %v340_v61  ;;  %v3919_v26 = vcombine.low %v344_v30, %v348_v57 }
 0x11d   :  { %v3881_v2 = vpack.c.bf16 %v501_v43, %v501_v43  ;;  %5588 = vst [vmem:[#allocation88_spill] sm:$0xff] %v3897_v3  ;;  %5589 = vst [vmem:[#allocation89_spill] sm:$0xff] %v3899_v27  ;;  %v343_v43 = vld [vmem:[#allocation4 + $0xd0] sm:$0xff] }
 0x11e   :  { %v3911_v22 = vcombine.high %v343_v43, %v347_v11  ;;  %v3917_v58 = vcombine.low %v343_v43, %v347_v11  ;;  %5595 = vst [vmem:[#allocation95_spill] sm:$0xff] %v3919_v26 }
 0x11f   :  { %1176 = vmatmul.mubr.bf16.vlgmr.msra.gmra.mrb[16].mxu0 %v3881_v2  ;;  %1217 = vmatmul.mubr.bf16.vlgmr.msra.gmra.mrb[16].mxu1 %v3881_v2 }
 0x120   :  { %1226 = vmatpush1.bf16.msra.mxu0 %v3837_v49  ;;  %1267 = vmatpush1.bf16.msra.mxu1 %v3839_v51  ;;  %5592 = vst [vmem:[#allocation92_spill] sm:$0xff] %v3911_v22  ;;  %v352_v51 = vld [vmem:[#allocation4 + $0x118] sm:$0xff]  ;;  %5594 = vst [vmem:[#allocation94_spill] sm:$0xff] %v3917_v58 }
 0x121   :  { %1227 = vmatprep.subr.bf16.mxu0 %v3883_v4  ;;  %1268 = vmatprep.subr.bf16.mxu1 %v3885_v1  ;;  %v351_v1 = vld [vmem:[#allocation4 + $0x110] sm:$0xff] }
 0x122   :  { %1257 = vmatprep.mubr.bf16.mxu0 %v5568_v17  ;;  %1298 = vmatprep.mubr.bf16.mxu1 %v5568_v17  ;;  %v355_v4 = vld [vmem:[#allocation4 + $0x130] sm:$0xff]  ;;  %v356_v17 = vld [vmem:[#allocation4 + $0x138] sm:$0xff] }
 0x123   :  { %v3923_v42 = vcombine.high %v351_v1, %v355_v4  ;;  %v3925_v61 = vcombine.high %v352_v51, %v356_v17  ;;  %v3929_v11 = vcombine.low %v351_v1, %v355_v4  ;;  %v3931_v57 = vcombine.low %v352_v51, %v356_v17 }
 0x124   :  { %1228 = vmatpush1.bf16.msra.mxu0 %v3891_v59  ;;  %1269 = vmatpush1.bf16.msra.mxu1 %v3893_v45  ;;  %v360_v45 = vld [vmem:[#allocation4 + $0x158] sm:$0xff] }
 0x125   :  { %1229 = vmatprep.subr.bf16.mxu0 %v3897_v3  ;;  %1270 = vmatprep.subr.bf16.mxu1 %v3899_v27  ;;  %5596 = vst [vmem:[#allocation96_spill] sm:$0xff] %v3923_v42  ;;  %5597 = vst [vmem:[#allocation97_spill] sm:$0xff] %v3925_v61  ;;  %v359_v27 = vld [vmem:[#allocation4 + $0x150] sm:$0xff]  ;;  %v364_v59 = vld [vmem:[#allocation4 + $0x178] sm:$0xff] }
 0x126   :  { %v363_v3 = vld [vmem:[#allocation4 + $0x170] sm:$0xff]  ;;  %5598 = vst [vmem:[#allocation98_spill] sm:$0xff] %v3929_v11  ;;  %5599 = vst [vmem:[#allocation99_spill] sm:$0xff] %v3931_v57  ;;  %v3937_v43 = vcombine.high %v360_v45, %v364_v59  ;;  %v3943_v51 = vcombine.low %v360_v45, %v364_v59 }
 0x127   :  { %v3935_v30 = vcombine.high %v359_v27, %v363_v3  ;;  %v3941_v4 = vcombine.low %v359_v27, %v363_v3 }
 0x128   :  { %1230 = vmatpush1.bf16.msra.mxu0 %v3905_v12  ;;  %1271 = vmatpush1.bf16.msra.mxu1 %v3907_v6  ;;  %5601 = vst [vmem:[#allocation101_spill] sm:$0xff] %v3937_v43  ;;  %v368_v6 = vld [vmem:[#allocation4 + $0x198] sm:$0xff]  ;;  %5603 = vst [vmem:[#allocation103_spill] sm:$0xff] %v3943_v51 }
 0x129   :  { %1231 = vmatprep.subr.bf16.mxu0 %v3911_v22  ;;  %1272 = vmatprep.subr.bf16.mxu1 %v3913_v15  ;;  %5600 = vst [vmem:[#allocation100_spill] sm:$0xff] %v3935_v30  ;;  %v367_v15 = vld [vmem:[#allocation4 + $0x190] sm:$0xff]  ;;  %v372_v12 = vld [vmem:[#allocation4 + $0x1b8] sm:$0xff]  ;;  %5602 = vst [vmem:[#allocation102_spill] sm:$0xff] %v3941_v4 }
 0x12a   :  { %v371_v22 = vld [vmem:[#allocation4 + $0x1b0] sm:$0xff]  ;;  %v3949_v17 = vcombine.high %v368_v6, %v372_v12  ;;  %v3955_v59 = vcombine.low %v368_v6, %v372_v12 }
 0x12b   :  { %v3947_v1 = vcombine.high %v367_v15, %v371_v22  ;;  %v3953_v3 = vcombine.low %v367_v15, %v371_v22 }
 0x12c   :  { %1232 = vmatpush1.bf16.msra.mxu0 %v3917_v58  ;;  %1273 = vmatpush1.bf16.msra.mxu1 %v3919_v26  ;;  %5605 = vst [vmem:[#allocation105_spill] sm:$0xff] %v3949_v17  ;;  %v376_v26 = vld [vmem:[#allocation4 + $0x1d8] sm:$0xff]  ;;  %5607 = vst [vmem:[#allocation107_spill] sm:$0xff] %v3955_v59 }
 0x12d   :  { %1233 = vmatprep.subr.bf16.mxu0 %v3923_v42  ;;  %1274 = vmatprep.subr.bf16.mxu1 %v3925_v61  ;;  %5604 = vst [vmem:[#allocation104_spill] sm:$0xff] %v3947_v1  ;;  %v375_v61 = vld [vmem:[#allocation4 + $0x1d0] sm:$0xff]  ;;  %v380_v58 = vld [vmem:[#allocation4 + $0x1f8] sm:$0xff]  ;;  %5606 = vst [vmem:[#allocation106_spill] sm:$0xff] %v3953_v3 }
 0x12e   :  { %v379_v42 = vld [vmem:[#allocation4 + $0x1f0] sm:$0xff]  ;;  %v3961_v27 = vcombine.high %v376_v26, %v380_v58  ;;  %v3967_v12 = vcombine.low %v376_v26, %v380_v58 }
 0x12f   :  { %v3959_v45 = vcombine.high %v375_v61, %v379_v42  ;;  %v3965_v22 = vcombine.low %v375_v61, %v379_v42 }
 0x130   :  { %1234 = vmatpush1.bf16.msra.mxu0 %v3929_v11  ;;  %1275 = vmatpush1.bf16.msra.mxu1 %v3931_v57  ;;  %5609 = vst [vmem:[#allocation109_spill] sm:$0xff] %v3961_v27  ;;  %v384_v57 = vld [vmem:[#allocation4 + $0x218] sm:$0xff]  ;;  %5611 = vst [vmem:[#allocation111_spill] sm:$0xff] %v3967_v12 }
 0x131   :  { %1235 = vmatprep.subr.bf16.mxu0 %v3935_v30  ;;  %1276 = vmatprep.subr.bf16.mxu1 %v3937_v43  ;;  %5608 = vst [vmem:[#allocation108_spill] sm:$0xff] %v3959_v45  ;;  %v383_v43 = vld [vmem:[#allocation4 + $0x210] sm:$0xff]  ;;  %v388_v11 = vld [vmem:[#allocation4 + $0x238] sm:$0xff]  ;;  %5610 = vst [vmem:[#allocation110_spill] sm:$0xff] %v3965_v22 }
 0x132   :  { %v387_v30 = vld [vmem:[#allocation4 + $0x230] sm:$0xff]  ;;  %v3973_v15 = vcombine.high %v384_v57, %v388_v11  ;;  %v3979_v58 = vcombine.low %v384_v57, %v388_v11 }
 0x133   :  { %v3971_v6 = vcombine.high %v383_v43, %v387_v30  ;;  %v3977_v42 = vcombine.low %v383_v43, %v387_v30 }
 0x134   :  { %1236 = vmatpush1.bf16.msra.mxu0 %v3941_v4  ;;  %1277 = vmatpush1.bf16.msra.mxu1 %v3943_v51  ;;  %5613 = vst [vmem:[#allocation113_spill] sm:$0xff] %v3973_v15  ;;  %v392_v51 = vld [vmem:[#allocation4 + $0x258] sm:$0xff]  ;;  %5615 = vst [vmem:[#allocation115_spill] sm:$0xff] %v3979_v58 }
 0x135   :  { %1237 = vmatprep.subr.bf16.mxu0 %v3947_v1  ;;  %1278 = vmatprep.subr.bf16.mxu1 %v3949_v17  ;;  %5612 = vst [vmem:[#allocation112_spill] sm:$0xff] %v3971_v6  ;;  %v391_v17 = vld [vmem:[#allocation4 + $0x250] sm:$0xff]  ;;  %v396_v4 = vld [vmem:[#allocation4 + $0x278] sm:$0xff]  ;;  %5614 = vst [vmem:[#allocation114_spill] sm:$0xff] %v3977_v42 }
 0x136   :  { %v395_v1 = vld [vmem:[#allocation4 + $0x270] sm:$0xff]  ;;  %v3985_v61 = vcombine.high %v392_v51, %v396_v4  ;;  %v3991_v11 = vcombine.low %v392_v51, %v396_v4 }
 0x137   :  { %v3983_v26 = vcombine.high %v391_v17, %v395_v1  ;;  %v3989_v30 = vcombine.low %v391_v17, %v395_v1 }
 0x138   :  { %1238 = vmatpush1.bf16.msra.mxu0 %v3953_v3  ;;  %1279 = vmatpush1.bf16.msra.mxu1 %v3955_v59  ;;  %5617 = vst [vmem:[#allocation117_spill] sm:$0xff] %v3985_v61  ;;  %v400_v59 = vld [vmem:[#allocation4 + $0x298] sm:$0xff]  ;;  %5619 = vst [vmem:[#allocation119_spill] sm:$0xff] %v3991_v11 }
 0x139   :  { %1239 = vmatprep.subr.bf16.mxu0 %v3959_v45  ;;  %1280 = vmatprep.subr.bf16.mxu1 %v3961_v27  ;;  %5616 = vst [vmem:[#allocation116_spill] sm:$0xff] %v3983_v26  ;;  %v399_v27 = vld [vmem:[#allocation4 + $0x290] sm:$0xff]  ;;  %v404_v3 = vld [vmem:[#allocation4 + $0x2b8] sm:$0xff]  ;;  %5618 = vst [vmem:[#allocation118_spill] sm:$0xff] %v3989_v30 }
 0x13a   :  { %v403_v45 = vld [vmem:[#allocation4 + $0x2b0] sm:$0xff]  ;;  %v3997_v43 = vcombine.high %v400_v59, %v404_v3  ;;  %v4003_v4 = vcombine.low %v400_v59, %v404_v3 }
 0x13b   :  { %v3995_v57 = vcombine.high %v399_v27, %v403_v45  ;;  %v4001_v1 = vcombine.low %v399_v27, %v403_v45 }
 0x13c   :  { %1240 = vmatpush1.bf16.msra.mxu0 %v3965_v22  ;;  %1281 = vmatpush1.bf16.msra.mxu1 %v3967_v12  ;;  %5621 = vst [vmem:[#allocation121_spill] sm:$0xff] %v3997_v43  ;;  %v408_v12 = vld [vmem:[#allocation4 + $0x2d8] sm:$0xff]  ;;  %5623 = vst [vmem:[#allocation123_spill] sm:$0xff] %v4003_v4 }
 0x13d   :  { %1241 = vmatprep.subr.bf16.mxu0 %v3971_v6  ;;  %1282 = vmatprep.subr.bf16.mxu1 %v3973_v15  ;;  %5620 = vst [vmem:[#allocation120_spill] sm:$0xff] %v3995_v57  ;;  %v407_v15 = vld [vmem:[#allocation4 + $0x2d0] sm:$0xff]  ;;  %v412_v22 = vld [vmem:[#allocation4 + $0x2f8] sm:$0xff]  ;;  %5622 = vst [vmem:[#allocation122_spill] sm:$0xff] %v4001_v1 }
 0x13e   :  { %v411_v6 = vld [vmem:[#allocation4 + $0x2f0] sm:$0xff]  ;;  %v4009_v17 = vcombine.high %v408_v12, %v412_v22  ;;  %v4015_v3 = vcombine.low %v408_v12, %v412_v22 }
 0x13f   :  { %v4007_v51 = vcombine.high %v407_v15, %v411_v6  ;;  %v4013_v45 = vcombine.low %v407_v15, %v411_v6 }
 0x140   :  { %1242 = vmatpush1.bf16.msra.mxu0 %v3977_v42  ;;  %1283 = vmatpush1.bf16.msra.mxu1 %v3979_v58  ;;  %5625 = vst [vmem:[#allocation125_spill] sm:$0xff] %v4009_v17  ;;  %v416_v58 = vld [vmem:[#allocation4 + $0x318] sm:$0xff]  ;;  %5627 = vst [vmem:[#allocation127_spill] sm:$0xff] %v4015_v3 }
 0x141   :  { %1243 = vmatprep.subr.bf16.mxu0 %v3983_v26  ;;  %1284 = vmatprep.subr.bf16.mxu1 %v3985_v61  ;;  %5624 = vst [vmem:[#allocation124_spill] sm:$0xff] %v4007_v51  ;;  %v415_v61 = vld [vmem:[#allocation4 + $0x310] sm:$0xff]  ;;  %v420_v42 = vld [vmem:[#allocation4 + $0x338] sm:$0xff]  ;;  %5626 = vst [vmem:[#allocation126_spill] sm:$0xff] %v4013_v45 }
 0x142   :  { %v419_v26 = vld [vmem:[#allocation4 + $0x330] sm:$0xff]  ;;  %v4021_v27 = vcombine.high %v416_v58, %v420_v42  ;;  %v4027_v22 = vcombine.low %v416_v58, %v420_v42 }
 0x143   :  { %v4019_v59 = vcombine.high %v415_v61, %v419_v26  ;;  %v4025_v6 = vcombine.low %v415_v61, %v419_v26 }
 0x144   :  { %1244 = vmatpush1.bf16.msra.mxu0 %v3989_v30  ;;  %1285 = vmatpush1.bf16.msra.mxu1 %v3991_v11  ;;  %5629 = vst [vmem:[#allocation129_spill] sm:$0xff] %v4021_v27  ;;  %v424_v11 = vld [vmem:[#allocation4 + $0x358] sm:$0xff]  ;;  %5631 = vst [vmem:[#allocation131_spill] sm:$0xff] %v4027_v22 }
 0x145   :  { %1245 = vmatprep.subr.bf16.mxu0 %v3995_v57  ;;  %1286 = vmatprep.subr.bf16.mxu1 %v3997_v43  ;;  %5628 = vst [vmem:[#allocation128_spill] sm:$0xff] %v4019_v59  ;;  %v423_v43 = vld [vmem:[#allocation4 + $0x350] sm:$0xff]  ;;  %v428_v30 = vld [vmem:[#allocation4 + $0x378] sm:$0xff]  ;;  %5630 = vst [vmem:[#allocation130_spill] sm:$0xff] %v4025_v6 }
 0x146   :  { %v427_v57 = vld [vmem:[#allocation4 + $0x370] sm:$0xff]  ;;  %v4033_v15 = vcombine.high %v424_v11, %v428_v30  ;;  %v4039_v42 = vcombine.low %v424_v11, %v428_v30 }
 0x147   :  { %v4031_v12 = vcombine.high %v423_v43, %v427_v57  ;;  %v4037_v26 = vcombine.low %v423_v43, %v427_v57 }
 0x148   :  { %1246 = vmatpush1.bf16.msra.mxu0 %v4001_v1  ;;  %1287 = vmatpush1.bf16.msra.mxu1 %v4003_v4  ;;  %5633 = vst [vmem:[#allocation133_spill] sm:$0xff] %v4033_v15  ;;  %v432_v4 = vld [vmem:[#allocation4 + $0x398] sm:$0xff]  ;;  %5635 = vst [vmem:[#allocation135_spill] sm:$0xff] %v4039_v42 }
 0x149   :  { %1247 = vmatprep.subr.bf16.mxu0 %v4007_v51  ;;  %1288 = vmatprep.subr.bf16.mxu1 %v4009_v17  ;;  %5632 = vst [vmem:[#allocation132_spill] sm:$0xff] %v4031_v12  ;;  %v431_v17 = vld [vmem:[#allocation4 + $0x390] sm:$0xff]  ;;  %v436_v1 = vld [vmem:[#allocation4 + $0x3b8] sm:$0xff]  ;;  %5634 = vst [vmem:[#allocation134_spill] sm:$0xff] %v4037_v26 }
 0x14a   :  { %v435_v51 = vld [vmem:[#allocation4 + $0x3b0] sm:$0xff]  ;;  %v4045_v61 = vcombine.high %v432_v4, %v436_v1  ;;  %v4051_v30 = vcombine.low %v432_v4, %v436_v1  ;;  %v4069_v4 = vpop.f32.mrb[4].mxu1 }
 0x14b   :  { %v4043_v58 = vcombine.high %v431_v17, %v435_v51  ;;  %v4049_v57 = vcombine.low %v431_v17, %v435_v51  ;;  %5646 = vst [vmem:[#allocation146_spill] sm:$0xff] %v4069_v4  ;;  %v5678_v4 = vld [vmem:[#allocation59_spill] sm:$0xff] }
 0x14c   :  { %1248 = vmatpush1.bf16.msra.mxu0 %v4013_v45  ;;  %1289 = vmatpush1.bf16.msra.mxu1 %v4015_v3  ;;  %5637 = vst [vmem:[#allocation137_spill] sm:$0xff] %v4045_v61  ;;  %v440_v3 = vld [vmem:[#allocation4 + $0x3d8] sm:$0xff]  ;;  %5639 = vst [vmem:[#allocation139_spill] sm:$0xff] %v4051_v30 }
 0x14d   :  { %1249 = vmatprep.subr.bf16.mxu0 %v4019_v59  ;;  %1290 = vmatprep.subr.bf16.mxu1 %v4021_v27  ;;  %5636 = vst [vmem:[#allocation136_spill] sm:$0xff] %v4043_v58  ;;  %v439_v27 = vld [vmem:[#allocation4 + $0x3d0] sm:$0xff]  ;;  %v444_v45 = vld [vmem:[#allocation4 + $0x3f8] sm:$0xff]  ;;  %5638 = vst [vmem:[#allocation138_spill] sm:$0xff] %v4049_v57 }
 0x14e   :  { %v443_v59 = vld [vmem:[#allocation4 + $0x3f0] sm:$0xff]  ;;  %v4057_v43 = vcombine.high %v440_v3, %v444_v45  ;;  %v4065_v51 = vcombine.low %v440_v3, %v444_v45 }
 0x14f   :  { %v4055_v11 = vcombine.high %v439_v27, %v443_v59 }
 0x150   :  { %1250 = vmatpush1.bf16.msra.mxu0 %v4025_v6  ;;  %1291 = vmatpush1.bf16.msra.mxu1 %v4027_v22  ;;  %5641 = vst [vmem:[#allocation141_spill] sm:$0xff] %v4057_v43  ;;  %5644 = vst [vmem:[#allocation144_spill] sm:$0xff] %v4065_v51 }
 0x151   :  { %1251 = vmatprep.subr.bf16.mxu0 %v4031_v12  ;;  %1292 = vmatprep.subr.bf16.mxu1 %v4033_v15  ;;  %5640 = vst [vmem:[#allocation140_spill] sm:$0xff] %v4055_v11  ;;  %v4059_v15 = vpop.f32.mrb[4].mxu0 }
 0x152   :  { %5642 = vst [vmem:[#allocation142_spill] sm:$0xff] %v4059_v15  ;;  %v4067_v1 = vpop.f32.mrb[5].mxu0 }
 0x153   :  { %5645 = vst [vmem:[#allocation145_spill] sm:$0xff] %v4067_v1  ;;  %v4073_v17 = vpop.f32.mrb[6].mxu0  ;;  %v5677_v1 = vld [vmem:[#allocation58_spill] sm:$0xff] }
 0x154   :  { %1252 = vmatpush1.bf16.msra.mxu0 %v4037_v26  ;;  %1293 = vmatpush1.bf16.msra.mxu1 %v4039_v42  ;;  %v4063_v26 = vcombine.low %v439_v27, %v443_v59  ;;  %5647 = vst [vmem:[#allocation147_spill] sm:$0xff] %v4073_v17  ;;  %v4077_v15 = vpop.f32.mrb[7].mxu0  ;;  %v5675_v17 = vld [vmem:[#allocation56_spill] sm:$0xff] }
 0x155   :  { %1253 = vmatprep.subr.bf16.mxu0 %v4043_v58  ;;  %1294 = vmatprep.subr.bf16.mxu1 %v4045_v61  ;;  %v4075_v61 = vpop.f32.mrb[5].mxu1  ;;  %5649 = vst [vmem:[#allocation149_spill] sm:$0xff] %v4077_v15  ;;  %v4089_v45 = vpop.f32.mrb[8].mxu0 }
 0x156   :  { %5643 = vst [vmem:[#allocation143_spill] sm:$0xff] %v4063_v26  ;;  %5648 = vst [vmem:[#allocation148_spill] sm:$0xff] %v4075_v61  ;;  %v4091_v3 = vpop.f32.mrb[9].mxu0  ;;  %v5676_v61 = vld [vmem:[#allocation57_spill] sm:$0xff] }
 0x157   :  { %5652 = vst [vmem:[#allocation152_spill] sm:$0xff] %v4089_v45  ;;  %5653 = vst [vmem:[#allocation153_spill] sm:$0xff] %v4091_v3 }
 0x158   :  { %1254 = vmatpush1.bf16.msra.mxu0 %v4049_v57  ;;  %1295 = vmatpush1.bf16.msra.mxu1 %v4051_v30  ;;  %v4079_v57 = vpop.f32.mrb[6].mxu1 }
 0x159   :  { %1255 = vmatprep.subr.bf16.mxu0 %v4055_v11  ;;  %1296 = vmatprep.subr.bf16.mxu1 %v4057_v43  ;;  %5650 = vst [vmem:[#allocation150_spill] sm:$0xff] %v4079_v57  ;;  %v4081_v59 = vpop.f32.mrb[7].mxu1 }
 0x15a   :  { %5651 = vst [vmem:[#allocation151_spill] sm:$0xff] %v4081_v59  ;;  %v4093_v27 = vpop.f32.mrb[8].mxu1  ;;  %v4097_v59 = vpop.f32.mrb[10].mxu0 }
 0x15b   :  { %5654 = vst [vmem:[#allocation154_spill] sm:$0xff] %v4093_v27  ;;  %5655 = vst [vmem:[#allocation155_spill] sm:$0xff] %v4097_v59  ;;  %v4099_v15 = vpop.f32.mrb[9].mxu1  ;;  %v4103_v57 = vpop.f32.mrb[11].mxu0 }
 0x15c   :  { %1256 = vmatpush1.bf16.msra.mxu0 %v4063_v26  ;;  %1297 = vmatpush1.bf16.msra.mxu1 %v4065_v51  ;;  %5656 = vst [vmem:[#allocation156_spill] sm:$0xff] %v4099_v15  ;;  %5657 = vst [vmem:[#allocation157_spill] sm:$0xff] %v4103_v57  ;;  %v4113_v59 = vpop.f32.mrb[12].mxu0 }
 0x15d   :  { %1372 = vmatprep.subr.bf16.mxu0 %v3612_v10  ;;  %1413 = vmatprep.subr.bf16.mxu1 %v3617_v14  ;;  %5660 = vst [vmem:[#allocation160_spill] sm:$0xff] %v4113_v59  ;;  %v4115_v15 = vpop.f32.mrb[13].mxu0 }
 0x15e   :  { %5661 = vst [vmem:[#allocation161_spill] sm:$0xff] %v4115_v15  ;;  %v4119_v57 = vpop.f32.mrb[14].mxu0  ;;  %v5673_v15 = vld [vmem:[#allocation54_spill] sm:$0xff] }
 0x15f   :  { %1258 = vmatmul.mubr.bf16.vlgmr.msra.gmra.mrb[20].mxu0 %v3881_v2  ;;  %1299 = vmatmul.mubr.bf16.vlgmr.msra.gmra.mrb[20].mxu1 %v3881_v2  ;;  %v4105_v2 = vpop.f32.mrb[10].mxu1  ;;  %5662 = vst [vmem:[#allocation162_spill] sm:$0xff] %v4119_v57  ;;  %v5671_v57 = vld [vmem:[#allocation52_spill] sm:$0xff] }
 0x160   :  { %1373 = vmatpush1.bf16.msra.mxu0 %v3614_v13  ;;  %1414 = vmatpush1.bf16.msra.mxu1 %v3624_v23  ;;  %5658 = vst [vmem:[#allocation158_spill] sm:$0xff] %v4105_v2  ;;  %v4107_v45 = vpop.f32.mrb[11].mxu1 }
 0x161   :  { %1374 = vmatprep.subr.bf16.mxu0 %v3621_v19  ;;  %1415 = vmatprep.subr.bf16.mxu1 %v3628_v24  ;;  %5659 = vst [vmem:[#allocation159_spill] sm:$0xff] %v4107_v45  ;;  %v4121_v2 = vpop.f32.mrb[12].mxu1  ;;  %v4125_v45 = vpop.f32.mrb[15].mxu0 }
 0x162   :  { %5663 = vst [vmem:[#allocation163_spill] sm:$0xff] %v4121_v2  ;;  %5664 = vst [vmem:[#allocation164_spill] sm:$0xff] %v4125_v45  ;;  %v4127_v3 = vpop.f32.mrb[13].mxu1  ;;  %v5669_v45 = vld [vmem:[#allocation50_spill] sm:$0xff]  ;;  %v5674_v2 = vld [vmem:[#allocation55_spill] sm:$0xff] }
 0x163   :  { %5665 = vst [vmem:[#allocation165_spill] sm:$0xff] %v4127_v3  ;;  %v4129_v27 = vpop.f32.mrb[14].mxu1  ;;  %v5672_v3 = vld [vmem:[#allocation53_spill] sm:$0xff] }
 0x164   :  { %1375 = vmatpush1.bf16.msra.mxu0 %v3630_v25  ;;  %1416 = vmatpush1.bf16.msra.mxu1 %v3638_v31  ;;  %5666 = vst [vmem:[#allocation166_spill] sm:$0xff] %v4129_v27  ;;  %v4131_v59 = vpop.f32.mrb[15].mxu1  ;;  %v5670_v27 = vld [vmem:[#allocation51_spill] sm:$0xff] }
 0x165   :  { %1376 = vmatprep.subr.bf16.mxu0 %v3633_v29  ;;  %1417 = vmatprep.subr.bf16.mxu1 %v3643_v32  ;;  %5667 = vst [vmem:[#allocation167_spill] sm:$0xff] %v4131_v59  ;;  %v5668_v59 = vld [vmem:[#allocation49_spill] sm:$0xff] }
 0x168   :  { %1377 = vmatpush1.bf16.msra.mxu0 %v3645_v33  ;;  %1418 = vmatpush1.bf16.msra.mxu1 %v3651_v37 }
 0x169   :  { %1378 = vmatprep.subr.bf16.mxu0 %v3648_v34  ;;  %1419 = vmatprep.subr.bf16.mxu1 %v3655_v38 }
 0x16c   :  { %1379 = vmatpush1.bf16.msra.mxu0 %v3657_v39  ;;  %1420 = vmatpush1.bf16.msra.mxu1 %v3661_v40 }
 0x16d   :  { %1380 = vmatprep.subr.bf16.mxu0 %v3666_v44  ;;  %1421 = vmatprep.subr.bf16.mxu1 %v3668_v46 }
 0x170   :  { %1381 = vmatpush1.bf16.msra.mxu0 %v3670_v47  ;;  %1422 = vmatpush1.bf16.msra.mxu1 %v3672_v48 }
 0x171   :  { %1382 = vmatprep.subr.bf16.mxu0 %v3678_v52  ;;  %1423 = vmatprep.subr.bf16.mxu1 %v3680_v54 }
 0x174   :  { %1383 = vmatpush1.bf16.msra.mxu0 %v3682_v55  ;;  %1424 = vmatpush1.bf16.msra.mxu1 %v3684_v56 }
 0x175   :  { %1384 = vmatprep.subr.bf16.mxu0 %v3690_v60  ;;  %1425 = vmatprep.subr.bf16.mxu1 %v3692_v62 }
 0x178   :  { %1385 = vmatpush1.bf16.msra.mxu0 %v3694_v63  ;;  %1426 = vmatpush1.bf16.msra.mxu1 %v3696_v0 }
 0x179   :  { %1386 = vmatprep.subr.bf16.mxu0 %v3702_v5  ;;  %1427 = vmatprep.subr.bf16.mxu1 %v3704_v7 }
 0x17c   :  { %1387 = vmatpush1.bf16.msra.mxu0 %v3706_v8  ;;  %1428 = vmatpush1.bf16.msra.mxu1 %v3708_v9 }
 0x17d   :  { %1388 = vmatprep.subr.bf16.mxu0 %v3714_v16  ;;  %1429 = vmatprep.subr.bf16.mxu1 %v3716_v18 }
 0x180   :  { %1389 = vmatpush1.bf16.msra.mxu0 %v3718_v20  ;;  %1430 = vmatpush1.bf16.msra.mxu1 %v3720_v21 }
 0x181   :  { %1390 = vmatprep.subr.bf16.mxu0 %v3726_v28  ;;  %1431 = vmatprep.subr.bf16.mxu1 %v3728_v35  ;;  %v5699_v35 = vld [vmem:[#allocation81_spill] sm:$0xff] }
 0x184   :  { %1391 = vmatpush1.bf16.msra.mxu0 %v3730_v36  ;;  %1432 = vmatpush1.bf16.msra.mxu1 %v3732_v41  ;;  %v5696_v41 = vld [vmem:[#allocation76_spill] sm:$0xff] }
 0x185   :  { %1392 = vmatprep.subr.bf16.mxu0 %v3742_v50  ;;  %1433 = vmatprep.subr.bf16.mxu1 %v3744_v53  ;;  %v5695_v50 = vld [vmem:[#allocation80_spill] sm:$0xff] }
 0x188   :  { %1393 = vmatpush1.bf16.msra.mxu0 %v5668_v59  ;;  %1434 = vmatpush1.bf16.msra.mxu1 %v5669_v45  ;;  %v5679_v59 = vld [vmem:[#allocation61_spill] sm:$0xff]  ;;  %v5680_v45 = vld [vmem:[#allocation60_spill] sm:$0xff] }
 0x189   :  { %1394 = vmatprep.subr.bf16.mxu0 %v5670_v27  ;;  %1435 = vmatprep.subr.bf16.mxu1 %v5671_v57  ;;  %v5681_v27 = vld [vmem:[#allocation62_spill] sm:$0xff]  ;;  %v5682_v57 = vld [vmem:[#allocation63_spill] sm:$0xff] }
 0x18c   :  { %1395 = vmatpush1.bf16.msra.mxu0 %v5672_v3  ;;  %1436 = vmatpush1.bf16.msra.mxu1 %v5673_v15  ;;  %v5683_v3 = vld [vmem:[#allocation64_spill] sm:$0xff]  ;;  %v5684_v15 = vld [vmem:[#allocation65_spill] sm:$0xff] }
 0x18d   :  { %1396 = vmatprep.subr.bf16.mxu0 %v5674_v2  ;;  %1437 = vmatprep.subr.bf16.mxu1 %v5675_v17  ;;  %v5685_v2 = vld [vmem:[#allocation66_spill] sm:$0xff]  ;;  %v5686_v17 = vld [vmem:[#allocation67_spill] sm:$0xff] }
 0x190   :  { %1397 = vmatpush1.bf16.msra.mxu0 %v5676_v61  ;;  %1438 = vmatpush1.bf16.msra.mxu1 %v5677_v1  ;;  %v5687_v61 = vld [vmem:[#allocation68_spill] sm:$0xff]  ;;  %v5688_v1 = vld [vmem:[#allocation69_spill] sm:$0xff] }
 0x191   :  { %1398 = vmatprep.subr.bf16.mxu0 %v5678_v4  ;;  %1439 = vmatprep.subr.bf16.mxu1 %v5679_v59  ;;  %v5689_v4 = vld [vmem:[#allocation70_spill] sm:$0xff]  ;;  %v5690_v59 = vld [vmem:[#allocation71_spill] sm:$0xff] }
 0x194   :  { %1399 = vmatpush1.bf16.msra.mxu0 %v5680_v45  ;;  %1440 = vmatpush1.bf16.msra.mxu1 %v5681_v27  ;;  %v5691_v45 = vld [vmem:[#allocation72_spill] sm:$0xff]  ;;  %v5692_v27 = vld [vmem:[#allocation75_spill] sm:$0xff] }
 0x195   :  { %1400 = vmatprep.subr.bf16.mxu0 %v5682_v57  ;;  %1441 = vmatprep.subr.bf16.mxu1 %v5683_v3  ;;  %v5693_v57 = vld [vmem:[#allocation77_spill] sm:$0xff]  ;;  %v5694_v3 = vld [vmem:[#allocation79_spill] sm:$0xff] }
 0x196   :  { %v178_v53 = vadd.f32 %v5693_v57, %v5692_v27 }
 0x198   :  { %1401 = vmatpush1.bf16.msra.mxu0 %v5684_v15  ;;  %1442 = vmatpush1.bf16.msra.mxu1 %v5685_v2  ;;  %v251_v15 = vadd.f32 %v5695_v50, %v5694_v3  ;;  %v5697_v2 = vld [vmem:[#allocation78_spill] sm:$0xff] }
 0x199   :  { %1402 = vmatprep.subr.bf16.mxu0 %v5686_v17  ;;  %1443 = vmatprep.subr.bf16.mxu1 %v5687_v61  ;;  %v180_v36 = vadd.f32 %v5697_v2, %v5696_v41  ;;  %v5698_v17 = vld [vmem:[#allocation82_spill] sm:$0xff] }
 0x19a   :  { %v253_v61 = vadd.f32 %v5699_v35, %v5698_v17 }
 0x19c   :  { %1403 = vmatpush1.bf16.msra.mxu0 %v5688_v1  ;;  %1444 = vmatpush1.bf16.msra.mxu1 %v5689_v4 }
 0x19d   :  { %1454 = vmatprep.subr.bf16.mxu0 %v5690_v59  ;;  %1495 = vmatprep.subr.bf16.mxu1 %v5691_v45 }
 0x1f2   :  { %v1177_v28 = vpop.f32.mrb[16].mxu0  ;;  %v1218_v1 = vpop.f32.mrb[16].mxu1 }
 0x1f3   :  { %v1342_v21 = vadd.f32 %v1177_v28, %v178_v53  ;;  %v1344_v4 = vadd.f32 %v1218_v1, %v251_v15  ;;  %v1179_v20 = vpop.f32.mrb[17].mxu0  ;;  %v1220_v59 = vpop.f32.mrb[17].mxu1 }
 0x1f4   :  { %v1343_v18 = vadd.f32 %v1179_v20, %v180_v36  ;;  %v1345_v45 = vadd.f32 %v1220_v59, %v253_v61  ;;  %v1181_v16 = vpop.f32.mrb[18].mxu0  ;;  %v1222_v9 = vpop.f32.mrb[18].mxu1  ;;  %v5700_v36 = vld [vmem:[#allocation83_spill] sm:$0xff] }
 0x1f5   :  { %v3115_v57 = vmul.f32 -1.442695, %v1342_v21  ;;  %v1182_v27 = vpop.f32.mrb[19].mxu0  ;;  %v1223_v8 = vpop.f32.mrb[19].mxu1 }
 0x1f6   :  { %v3116_v50 = vmul.f32 -1.442695, %v1343_v18  ;;  %v445_v8 = vld [vmem:[%s5202_s4] sm:$0xf] }
 0x1f7   :  { %3267 = vpow2.f32 %v3115_v57  ;;  %v5701_v18 = vld [vmem:[#allocation74_spill] sm:$0xff] }
 0x1f8   :  { %3269 = vpow2.f32 %v3116_v50  ;;  %v5702_v21 = vsub.s32 0, %v5701_v18 }
 0x1f9   :  { %3271 = vtanh.f32 %v1345_v45 }
 0x1fa   :  { %v4201_v61 = vrot.slane %v445_v8, %v5702_v21  ;;  %v5708_v21 = vsub.s32 3, %v5701_v18 }
 0x1fc   :  { %5703 = vst [vmem:[#allocation77_spill] sm:$0xff] %v4201_v61 }
 0x201   :  { %v3268_v2 = vpop.eup %3267 }
 0x202   :  { %v1355_v41 = vadd.f32 1.0, %v3268_v2  ;;  %v3270_v3 = vpop.eup %3269 }
 0x203   :  { %v1356_v35 = vadd.f32 1.0, %v3270_v3  ;;  %v3272_v28 = vpop.eup %3271 }
 0x204   :  { %3273 = vrcp.f32 %v1355_v41  ;;  %v5704_v41 = vsub.s32 1, %v5701_v18 }
 0x205   :  { %3275 = vrcp.f32 %v1356_v35 }
 0x206   :  { %v4205_v1 = vrot.slane %v445_v8, %v5704_v41  ;;  %v4215_v41 = vrot.slane %v445_v8, %v5708_v21 }
 0x208   :  { %5705 = vst [vmem:[#allocation80_spill] sm:$0xff] %v4205_v1  ;;  %5709 = vst [vmem:[#allocation81_spill] sm:$0xff] %v4215_v41 }
 0x20e   :  { %v3274_v53 = vpop.eup %3273 }
 0x20f   :  { %v1366_v15 = vmul.f32 %v3274_v53, %v3272_v28  ;;  %v3276_v20 = vpop.eup %3275 }
 0x210   :  { %v1365_v16 = vmul.f32 %v3276_v20, %v5700_v36  ;;  %v5706_v36 = vsub.s32 2, %v5701_v18 }
 0x212   :  { %v4194_v9 = vadd.f32 %v1366_v15, %v1365_v16  ;;  %v4211_v16 = vrot.slane %v445_v8, %v5706_v36 }
 0x214   :  { %5707 = vst [vmem:[#allocation78_spill] sm:$0xff] %v4211_v16 }
 0x232   :  { %v1259_v59 = vpop.f32.mrb[20].mxu0  ;;  %v1300_v45 = vpop.f32.mrb[20].mxu1 }
 0x233   :  { %v1307_v3 = vadd.f32 %v1259_v59, %v4201_v61  ;;  %v1261_v27 = vpop.f32.mrb[21].mxu0  ;;  %v1302_v57 = vpop.f32.mrb[21].mxu1  ;;  %v1309_v59 = vadd.f32 %v1300_v45, %v4211_v16  ;;  %v3117_v61 = vmul.f32 -1.442695, %v1344_v4 }
 0x234   :  { %v1308_v50 = vadd.f32 %v1261_v27, %v4205_v1  ;;  %v1263_v2 = vpop.f32.mrb[22].mxu0  ;;  %v1304_v35 = vpop.f32.mrb[22].mxu1  ;;  %v1310_v27 = vadd.f32 %v1302_v57, %v4215_v41 }
 0x235   :  { %v3112_v28 = vmul.f32 -1.442695, %v1307_v3  ;;  %v1264_v53 = vpop.f32.mrb[23].mxu0  ;;  %v1305_v15 = vpop.f32.mrb[23].mxu1  ;;  %v3114_v2 = vmul.f32 -1.442695, %v1309_v59 }
 0x236   :  { %v3113_v20 = vmul.f32 -1.442695, %v1308_v50 }
 0x237   :  { %3277 = vpow2.f32 %v3112_v28 }
 0x238   :  { %3279 = vpow2.f32 %v3113_v20 }
 0x239   :  { %3281 = vpow2.f32 %v3117_v61 }
 0x23a   :  { %3283 = vtanh.f32 %v1310_v27 }
 0x23b   :  { %3285 = vpow2.f32 %v3114_v2 }
 0x241   :  { %v3278_v3 = vpop.eup %3277 }
 0x242   :  { %v1320_v35 = vadd.f32 1.0, %v3278_v3  ;;  %v3280_v50 = vpop.eup %3279 }
 0x243   :  { %v1321_v28 = vadd.f32 1.0, %v3280_v50  ;;  %v3282_v53 = vpop.eup %3281 }
 0x244   :  { %3287 = vrcp.f32 %v1320_v35  ;;  %v3284_v15 = vpop.eup %3283  ;;  %v1357_v20 = vadd.f32 1.0, %v3282_v53  ;;  %v5710_v53 = vld [vmem:[#allocation73_spill] sm:$0xff] }
 0x245   :  { %3289 = vrcp.f32 %v1321_v28  ;;  %v3286_v18 = vpop.eup %3285 }
 0x246   :  { %v1322_v4 = vadd.f32 1.0, %v3286_v18  ;;  %3291 = vtanh.f32 %v4194_v9  ;;  %v5712_v18 = vld [vmem:[#allocation85_spill] sm:$0xff] }
 0x247   :  { %3293 = vrcp.f32 %v1357_v20  ;;  %v5714_v20 = vld [vmem:[#allocation87_spill] sm:$0xff] }
 0x248   :  { %3295 = vrcp.f32 %v1322_v4  ;;  %v5717_v4 = vld [vmem:[#allocation90_spill] sm:$0xff] }
 0x24e   :  { %v3288_v8 = vpop.eup %3287 }
 0x24f   :  { %v1331_v36 = vmul.f32 %v3288_v8, %v3284_v15  ;;  %v3290_v45 = vpop.eup %3289  ;;  %v5711_v15 = vld [vmem:[#allocation84_spill] sm:$0xff]  ;;  %v5713_v8 = vld [vmem:[#allocation86_spill] sm:$0xff] }
 0x250   :  { %v1330_v21 = vmul.f32 0.0, %v3290_v45  ;;  %v3292_v57 = vpop.eup %3291  ;;  %v5716_v45 = vld [vmem:[#allocation89_spill] sm:$0xff] }
 0x251   :  { %v3294_v59 = vpop.eup %3293 }
 0x252   :  { %v4220_v61 = vadd.f32 %v1331_v36, %v1330_v21  ;;  %v3296_v27 = vpop.eup %3295  ;;  %v1369_v3 = vmul.f32 %v3294_v59, %v3292_v57  ;;  %v5715_v36 = vld [vmem:[#allocation88_spill] sm:$0xff]  ;;  %v5718_v21 = vld [vmem:[#allocation91_spill] sm:$0xff]  ;;  %v5720_v59 = vld [vmem:[#allocation93_spill] sm:$0xff] }
 0x253   :  { %v5719_v57 = vld [vmem:[#allocation92_spill] sm:$0xff] }
 0x254   :  { %3297 = vtanh.f32 %v4220_v61  ;;  %v4223_v28 = vpack.c.bf16 %v1369_v3, %v1369_v3  ;;  %v5723_v3 = vld [vmem:[#allocation96_spill] sm:$0xff] }
 0x25e   :  { %v3298_v2 = vpop.eup %3297 }
 0x25f   :  { %v1334_v35 = vmul.f32 %v3298_v2, %v3296_v27  ;;  %v5721_v27 = vld [vmem:[#allocation94_spill] sm:$0xff]  ;;  %v5722_v2 = vld [vmem:[#allocation95_spill] sm:$0xff] }
 0x261   :  { %v1371_v50 = vpack.c.bf16 %v1334_v35, %v1334_v35  ;;  %v5724_v35 = vld [vmem:[#allocation97_spill] sm:$0xff] }
 0x263   :  { %1404 = vmatprep.mubr.bf16.mxu0 %v1371_v50  ;;  %1445 = vmatprep.mubr.bf16.mxu1 %v1371_v50 }
 0x264   :  { %1405 = vmatmul.mubr.bf16.vlgmr.msra.gmra.mrb[24].mxu0 %v4223_v28  ;;  %1446 = vmatmul.mubr.bf16.vlgmr.msra.gmra.mrb[24].mxu1 %v4223_v28 }
 0x265   :  { %1455 = vmatpush1.bf16.msra.mxu0 %v3837_v49  ;;  %1496 = vmatpush1.bf16.msra.mxu1 %v5710_v53 }
 0x266   :  { %1486 = vmatprep.mubr.bf16.mxu0 %v1371_v50  ;;  %1527 = vmatprep.mubr.bf16.mxu1 %v1371_v50  ;;  %v5725_v50 = vld [vmem:[#allocation98_spill] sm:$0xff] }
 0x267   :  { %1456 = vmatprep.subr.bf16.mxu0 %v5711_v15  ;;  %1497 = vmatprep.subr.bf16.mxu1 %v5712_v18 }
 0x269   :  { %1457 = vmatpush1.bf16.msra.mxu0 %v5713_v8  ;;  %1498 = vmatpush1.bf16.msra.mxu1 %v5714_v20 }
 0x26a   :  { %1458 = vmatprep.subr.bf16.mxu0 %v5715_v36  ;;  %1499 = vmatprep.subr.bf16.mxu1 %v5716_v45  ;;  %v5726_v36 = vld [vmem:[#allocation99_spill] sm:$0xff]  ;;  %v5727_v45 = vld [vmem:[#allocation100_spill] sm:$0xff] }
 0x26d   :  { %1459 = vmatpush1.bf16.msra.mxu0 %v5717_v4  ;;  %1500 = vmatpush1.bf16.msra.mxu1 %v5718_v21  ;;  %v5728_v4 = vld [vmem:[#allocation101_spill] sm:$0xff]  ;;  %v5729_v21 = vld [vmem:[#allocation102_spill] sm:$0xff] }
 0x26e   :  { %1460 = vmatprep.subr.bf16.mxu0 %v5719_v57  ;;  %1501 = vmatprep.subr.bf16.mxu1 %v5720_v59  ;;  %v5730_v57 = vld [vmem:[#allocation103_spill] sm:$0xff]  ;;  %v5731_v59 = vld [vmem:[#allocation104_spill] sm:$0xff] }
 0x271   :  { %1461 = vmatpush1.bf16.msra.mxu0 %v5721_v27  ;;  %1502 = vmatpush1.bf16.msra.mxu1 %v5722_v2  ;;  %v5732_v27 = vld [vmem:[#allocation105_spill] sm:$0xff]  ;;  %v5733_v2 = vld [vmem:[#allocation106_spill] sm:$0xff] }
 0x272   :  { %1462 = vmatprep.subr.bf16.mxu0 %v5723_v3  ;;  %1503 = vmatprep.subr.bf16.mxu1 %v5724_v35  ;;  %v5734_v3 = vld [vmem:[#allocation107_spill] sm:$0xff]  ;;  %v5735_v35 = vld [vmem:[#allocation108_spill] sm:$0xff] }
 0x275   :  { %1463 = vmatpush1.bf16.msra.mxu0 %v5725_v50  ;;  %1504 = vmatpush1.bf16.msra.mxu1 %v5726_v36  ;;  %v5736_v50 = vld [vmem:[#allocation109_spill] sm:$0xff]  ;;  %v5737_v36 = vld [vmem:[#allocation110_spill] sm:$0xff] }
 0x276   :  { %1464 = vmatprep.subr.bf16.mxu0 %v5727_v45  ;;  %1505 = vmatprep.subr.bf16.mxu1 %v5728_v4  ;;  %v5738_v45 = vld [vmem:[#allocation111_spill] sm:$0xff]  ;;  %v5739_v4 = vld [vmem:[#allocation112_spill] sm:$0xff] }
 0x279   :  { %1465 = vmatpush1.bf16.msra.mxu0 %v5729_v21  ;;  %1506 = vmatpush1.bf16.msra.mxu1 %v5730_v57  ;;  %v5740_v21 = vld [vmem:[#allocation113_spill] sm:$0xff]  ;;  %v5741_v57 = vld [vmem:[#allocation114_spill] sm:$0xff] }
 0x27a   :  { %1466 = vmatprep.subr.bf16.mxu0 %v5731_v59  ;;  %1507 = vmatprep.subr.bf16.mxu1 %v5732_v27  ;;  %v5742_v59 = vld [vmem:[#allocation115_spill] sm:$0xff]  ;;  %v5743_v27 = vld [vmem:[#allocation116_spill] sm:$0xff] }
 0x27d   :  { %1467 = vmatpush1.bf16.msra.mxu0 %v5733_v2  ;;  %1508 = vmatpush1.bf16.msra.mxu1 %v5734_v3  ;;  %v5744_v2 = vld [vmem:[#allocation117_spill] sm:$0xff]  ;;  %v5745_v3 = vld [vmem:[#allocation118_spill] sm:$0xff] }
 0x27e   :  { %1468 = vmatprep.subr.bf16.mxu0 %v5735_v35  ;;  %1509 = vmatprep.subr.bf16.mxu1 %v5736_v50  ;;  %v5746_v35 = vld [vmem:[#allocation119_spill] sm:$0xff]  ;;  %v5747_v50 = vld [vmem:[#allocation120_spill] sm:$0xff] }
 0x281   :  { %1469 = vmatpush1.bf16.msra.mxu0 %v5737_v36  ;;  %1510 = vmatpush1.bf16.msra.mxu1 %v5738_v45  ;;  %v5748_v36 = vld [vmem:[#allocation121_spill] sm:$0xff]  ;;  %v5749_v45 = vld [vmem:[#allocation122_spill] sm:$0xff] }
 0x282   :  { %1470 = vmatprep.subr.bf16.mxu0 %v5739_v4  ;;  %1511 = vmatprep.subr.bf16.mxu1 %v5740_v21  ;;  %v5750_v4 = vld [vmem:[#allocation123_spill] sm:$0xff]  ;;  %v5751_v21 = vld [vmem:[#allocation124_spill] sm:$0xff] }
 0x285   :  { %1471 = vmatpush1.bf16.msra.mxu0 %v5741_v57  ;;  %1512 = vmatpush1.bf16.msra.mxu1 %v5742_v59  ;;  %v5752_v57 = vld [vmem:[#allocation125_spill] sm:$0xff]  ;;  %v5753_v59 = vld [vmem:[#allocation126_spill] sm:$0xff] }
 0x286   :  { %1472 = vmatprep.subr.bf16.mxu0 %v5743_v27  ;;  %1513 = vmatprep.subr.bf16.mxu1 %v5744_v2  ;;  %v5754_v27 = vld [vmem:[#allocation127_spill] sm:$0xff]  ;;  %v5755_v2 = vld [vmem:[#allocation128_spill] sm:$0xff] }
 0x289   :  { %1473 = vmatpush1.bf16.msra.mxu0 %v5745_v3  ;;  %1514 = vmatpush1.bf16.msra.mxu1 %v5746_v35  ;;  %v5756_v3 = vld [vmem:[#allocation129_spill] sm:$0xff] }
 0x28a   :  { %1474 = vmatprep.subr.bf16.mxu0 %v5747_v50  ;;  %1515 = vmatprep.subr.bf16.mxu1 %v5748_v36 }
 0x28d   :  { %1475 = vmatpush1.bf16.msra.mxu0 %v5749_v45  ;;  %1516 = vmatpush1.bf16.msra.mxu1 %v5750_v4  ;;  %v5757_v45 = vld [vmem:[#allocation133_spill] sm:$0xff]  ;;  %v5758_v4 = vld [vmem:[#allocation134_spill] sm:$0xff] }
 0x28e   :  { %1476 = vmatprep.subr.bf16.mxu0 %v5751_v21  ;;  %1517 = vmatprep.subr.bf16.mxu1 %v5752_v57 }
 0x291   :  { %1477 = vmatpush1.bf16.msra.mxu0 %v5753_v59  ;;  %1518 = vmatpush1.bf16.msra.mxu1 %v5754_v27  ;;  %v5759_v59 = vld [vmem:[#allocation137_spill] sm:$0xff]  ;;  %v5760_v27 = vld [vmem:[#allocation138_spill] sm:$0xff] }
 0x292   :  { %1478 = vmatprep.subr.bf16.mxu0 %v5755_v2  ;;  %1519 = vmatprep.subr.bf16.mxu1 %v5756_v3 }
 0x295   :  { %1479 = vmatpush1.bf16.msra.mxu0 %v4025_v6  ;;  %1520 = vmatpush1.bf16.msra.mxu1 %v4027_v22 }
 0x296   :  { %1480 = vmatprep.subr.bf16.mxu0 %v4031_v12  ;;  %1521 = vmatprep.subr.bf16.mxu1 %v5757_v45 }
 0x299   :  { %1481 = vmatpush1.bf16.msra.mxu0 %v5758_v4  ;;  %1522 = vmatpush1.bf16.msra.mxu1 %v4039_v42 }
 0x29a   :  { %1482 = vmatprep.subr.bf16.mxu0 %v4043_v58  ;;  %1523 = vmatprep.subr.bf16.mxu1 %v5759_v59 }
 0x29d   :  { %1483 = vmatpush1.bf16.msra.mxu0 %v5760_v27  ;;  %1524 = vmatpush1.bf16.msra.mxu1 %v4051_v30 }
 0x29e   :  { %1484 = vmatprep.subr.bf16.mxu0 %v4055_v11  ;;  %1525 = vmatprep.subr.bf16.mxu1 %v4057_v43 }
 0x2a1   :  { %1485 = vmatpush1.bf16.msra.mxu0 %v4063_v26  ;;  %1526 = vmatpush1.bf16.msra.mxu1 %v4065_v51 }
 0x2a2   :  { %1601 = vmatprep.subr.bf16.mxu0 %v3612_v10  ;;  %1642 = vmatprep.subr.bf16.mxu1 %v3617_v14 }
 0x2a4   :  { %1487 = vmatmul.mubr.bf16.vlgmr.msra.gmra.mrb[28].mxu0 %v4223_v28  ;;  %1528 = vmatmul.mubr.bf16.vlgmr.msra.gmra.mrb[28].mxu1 %v4223_v28  ;;  %v5761_v28 = vld [vmem:[#allocation37_spill] sm:$0xff] }
 0x2a5   :  { %1602 = vmatpush1.bf16.msra.mxu0 %v3614_v13  ;;  %1643 = vmatpush1.bf16.msra.mxu1 %v3624_v23 }
 0x2a6   :  { %1603 = vmatprep.subr.bf16.mxu0 %v3621_v19  ;;  %1644 = vmatprep.subr.bf16.mxu1 %v3628_v24 }
 0x2a9   :  { %1604 = vmatpush1.bf16.msra.mxu0 %v3630_v25  ;;  %1645 = vmatpush1.bf16.msra.mxu1 %v3638_v31 }
 0x2aa   :  { %1605 = vmatprep.subr.bf16.mxu0 %v3633_v29  ;;  %1646 = vmatprep.subr.bf16.mxu1 %v3643_v32 }
 0x2ad   :  { %1606 = vmatpush1.bf16.msra.mxu0 %v3645_v33  ;;  %1647 = vmatpush1.bf16.msra.mxu1 %v3651_v37 }
 0x2ae   :  { %1607 = vmatprep.subr.bf16.mxu0 %v3648_v34  ;;  %1648 = vmatprep.subr.bf16.mxu1 %v3655_v38 }
 0x2b1   :  { %1608 = vmatpush1.bf16.msra.mxu0 %v3657_v39  ;;  %1649 = vmatpush1.bf16.msra.mxu1 %v3661_v40 }
 0x2b2   :  { %1609 = vmatprep.subr.bf16.mxu0 %v3666_v44  ;;  %1650 = vmatprep.subr.bf16.mxu1 %v3668_v46  ;;  %v5801_v46 = vld [vmem:[#allocation76_spill] sm:$0xff] }
 0x2b5   :  { %1610 = vmatpush1.bf16.msra.mxu0 %v3670_v47  ;;  %1651 = vmatpush1.bf16.msra.mxu1 %v3672_v48  ;;  %v5800_v47 = vld [vmem:[#allocation146_spill] sm:$0xff] }
 0x2b6   :  { %1611 = vmatprep.subr.bf16.mxu0 %v3678_v52  ;;  %1652 = vmatprep.subr.bf16.mxu1 %v3680_v54  ;;  %v5762_v52 = vld [vmem:[#allocation38_spill] sm:$0xff]  ;;  %v5763_v54 = vld [vmem:[#allocation39_spill] sm:$0xff] }
 0x2b9   :  { %1612 = vmatpush1.bf16.msra.mxu0 %v3682_v55  ;;  %1653 = vmatpush1.bf16.msra.mxu1 %v3684_v56  ;;  %v5764_v55 = vld [vmem:[#allocation40_spill] sm:$0xff]  ;;  %v5765_v56 = vld [vmem:[#allocation41_spill] sm:$0xff] }
 0x2ba   :  { %1613 = vmatprep.subr.bf16.mxu0 %v3690_v60  ;;  %1654 = vmatprep.subr.bf16.mxu1 %v3692_v62  ;;  %v5766_v60 = vld [vmem:[#allocation42_spill] sm:$0xff]  ;;  %v5767_v62 = vld [vmem:[#allocation43_spill] sm:$0xff] }
 0x2bd   :  { %1614 = vmatpush1.bf16.msra.mxu0 %v3694_v63  ;;  %1655 = vmatpush1.bf16.msra.mxu1 %v3696_v0  ;;  %v5768_v63 = vld [vmem:[#allocation44_spill] sm:$0xff]  ;;  %v5769_v0 = vld [vmem:[#allocation45_spill] sm:$0xff] }
 0x2be   :  { %1615 = vmatprep.subr.bf16.mxu0 %v3702_v5  ;;  %1656 = vmatprep.subr.bf16.mxu1 %v3704_v7  ;;  %v5770_v5 = vld [vmem:[#allocation46_spill] sm:$0xff]  ;;  %v5771_v7 = vld [vmem:[#allocation47_spill] sm:$0xff] }
 0x2c1   :  { %1616 = vmatpush1.bf16.msra.mxu0 %v5761_v28  ;;  %1657 = vmatpush1.bf16.msra.mxu1 %v5762_v52  ;;  %v5772_v28 = vld [vmem:[#allocation48_spill] sm:$0xff]  ;;  %v5773_v52 = vld [vmem:[#allocation49_spill] sm:$0xff] }
 0x2c2   :  { %1617 = vmatprep.subr.bf16.mxu0 %v5763_v54  ;;  %1658 = vmatprep.subr.bf16.mxu1 %v5764_v55  ;;  %v5774_v54 = vld [vmem:[#allocation50_spill] sm:$0xff]  ;;  %v5775_v55 = vld [vmem:[#allocation51_spill] sm:$0xff] }
 0x2c5   :  { %1618 = vmatpush1.bf16.msra.mxu0 %v5765_v56  ;;  %1659 = vmatpush1.bf16.msra.mxu1 %v5766_v60  ;;  %v5776_v56 = vld [vmem:[#allocation52_spill] sm:$0xff]  ;;  %v5777_v60 = vld [vmem:[#allocation53_spill] sm:$0xff] }
 0x2c6   :  { %1619 = vmatprep.subr.bf16.mxu0 %v5767_v62  ;;  %1660 = vmatprep.subr.bf16.mxu1 %v5768_v63  ;;  %v5778_v62 = vld [vmem:[#allocation54_spill] sm:$0xff]  ;;  %v5779_v63 = vld [vmem:[#allocation55_spill] sm:$0xff] }
 0x2c9   :  { %1620 = vmatpush1.bf16.msra.mxu0 %v5769_v0  ;;  %1661 = vmatpush1.bf16.msra.mxu1 %v5770_v5  ;;  %v5780_v0 = vld [vmem:[#allocation56_spill] sm:$0xff]  ;;  %v5781_v5 = vld [vmem:[#allocation57_spill] sm:$0xff] }
 0x2ca   :  { %1621 = vmatprep.subr.bf16.mxu0 %v5771_v7  ;;  %1662 = vmatprep.subr.bf16.mxu1 %v5772_v28  ;;  %v5782_v7 = vld [vmem:[#allocation58_spill] sm:$0xff]  ;;  %v5783_v28 = vld [vmem:[#allocation59_spill] sm:$0xff] }
 0x2cd   :  { %1622 = vmatpush1.bf16.msra.mxu0 %v5773_v52  ;;  %1663 = vmatpush1.bf16.msra.mxu1 %v5774_v54  ;;  %v5784_v52 = vld [vmem:[#allocation61_spill] sm:$0xff]  ;;  %v5785_v54 = vld [vmem:[#allocation60_spill] sm:$0xff] }
 0x2ce   :  { %1623 = vmatprep.subr.bf16.mxu0 %v5775_v55  ;;  %1664 = vmatprep.subr.bf16.mxu1 %v5776_v56  ;;  %v5786_v55 = vld [vmem:[#allocation62_spill] sm:$0xff]  ;;  %v5787_v56 = vld [vmem:[#allocation63_spill] sm:$0xff] }
 0x2d1   :  { %1624 = vmatpush1.bf16.msra.mxu0 %v5777_v60  ;;  %1665 = vmatpush1.bf16.msra.mxu1 %v5778_v62  ;;  %v5788_v60 = vld [vmem:[#allocation64_spill] sm:$0xff]  ;;  %v5789_v62 = vld [vmem:[#allocation65_spill] sm:$0xff] }
 0x2d2   :  { %1625 = vmatprep.subr.bf16.mxu0 %v5779_v63  ;;  %1666 = vmatprep.subr.bf16.mxu1 %v5780_v0  ;;  %v5790_v63 = vld [vmem:[#allocation66_spill] sm:$0xff]  ;;  %v5791_v0 = vld [vmem:[#allocation67_spill] sm:$0xff] }
 0x2d5   :  { %1626 = vmatpush1.bf16.msra.mxu0 %v5781_v5  ;;  %1667 = vmatpush1.bf16.msra.mxu1 %v5782_v7  ;;  %v5792_v5 = vld [vmem:[#allocation68_spill] sm:$0xff]  ;;  %v5793_v7 = vld [vmem:[#allocation69_spill] sm:$0xff] }
 0x2d6   :  { %1627 = vmatprep.subr.bf16.mxu0 %v5783_v28  ;;  %1668 = vmatprep.subr.bf16.mxu1 %v5784_v52  ;;  %v5794_v28 = vld [vmem:[#allocation70_spill] sm:$0xff]  ;;  %v5795_v52 = vld [vmem:[#allocation71_spill] sm:$0xff] }
 0x2d9   :  { %1628 = vmatpush1.bf16.msra.mxu0 %v5785_v54  ;;  %1669 = vmatpush1.bf16.msra.mxu1 %v5786_v55  ;;  %v5796_v54 = vld [vmem:[#allocation72_spill] sm:$0xff]  ;;  %v5797_v55 = vld [vmem:[#allocation75_spill] sm:$0xff] }
 0x2da   :  { %1629 = vmatprep.subr.bf16.mxu0 %v5787_v56  ;;  %1670 = vmatprep.subr.bf16.mxu1 %v5788_v60  ;;  %v5798_v56 = vld [vmem:[#allocation142_spill] sm:$0xff]  ;;  %v5799_v60 = vld [vmem:[#allocation79_spill] sm:$0xff] }
 0x2db   :  { %v184_v48 = vadd.f32 %v5798_v56, %v5797_v55 }
 0x2dd   :  { %1630 = vmatpush1.bf16.msra.mxu0 %v5789_v62  ;;  %1671 = vmatpush1.bf16.msra.mxu1 %v5790_v63  ;;  %v257_v62 = vadd.f32 %v5800_v47, %v5799_v60  ;;  %v5802_v63 = vld [vmem:[#allocation145_spill] sm:$0xff] }
 0x2de   :  { %1631 = vmatprep.subr.bf16.mxu0 %v5791_v0  ;;  %1672 = vmatprep.subr.bf16.mxu1 %v5792_v5  ;;  %v186_v44 = vadd.f32 %v5802_v63, %v5801_v46  ;;  %v5803_v0 = vld [vmem:[#allocation148_spill] sm:$0xff] }
 0x2df   :  { %v259_v5 = vadd.f32 %v5803_v0, %v5698_v17 }
 0x2e1   :  { %1632 = vmatpush1.bf16.msra.mxu0 %v5793_v7  ;;  %1673 = vmatpush1.bf16.msra.mxu1 %v5794_v28 }
 0x2e2   :  { %1683 = vmatprep.subr.bf16.mxu0 %v5795_v52  ;;  %1724 = vmatprep.subr.bf16.mxu1 %v5796_v54 }
 0x337   :  { %v1406_v40 = vpop.f32.mrb[24].mxu0  ;;  %v1447_v7 = vpop.f32.mrb[24].mxu1 }
 0x338   :  { %v1571_v39 = vadd.f32 %v1406_v40, %v184_v48  ;;  %v1573_v28 = vadd.f32 %v1447_v7, %v257_v62  ;;  %v1408_v38 = vpop.f32.mrb[25].mxu0  ;;  %v1449_v52 = vpop.f32.mrb[25].mxu1 }
 0x339   :  { %v1572_v34 = vadd.f32 %v1408_v38, %v186_v44  ;;  %v1574_v54 = vadd.f32 %v1449_v52, %v259_v5  ;;  %v1410_v37 = vpop.f32.mrb[26].mxu0  ;;  %v1451_v33 = vpop.f32.mrb[26].mxu1 }
 0x33a   :  { %v3121_v56 = vmul.f32 -1.442695, %v1571_v39  ;;  %v1411_v55 = vpop.f32.mrb[27].mxu0  ;;  %v1452_v32 = vpop.f32.mrb[27].mxu1 }
 0x33b   :  { %v3122_v47 = vmul.f32 -1.442695, %v1572_v34  ;;  %v5804_v34 = vld [vmem:[#allocation77_spill] sm:$0xff] }
 0x33c   :  { %3299 = vpow2.f32 %v3121_v56 }
 0x33d   :  { %3301 = vpow2.f32 %v3122_v47 }
 0x33e   :  { %3303 = vtanh.f32 %v1574_v54 }
 0x346   :  { %v3300_v63 = vpop.eup %3299 }
 0x347   :  { %v1584_v46 = vadd.f32 1.0, %v3300_v63  ;;  %v3302_v60 = vpop.eup %3301  ;;  %v3123_v63 = vmul.f32 -1.442695, %v1573_v28 }
 0x348   :  { %v1585_v0 = vadd.f32 1.0, %v3302_v60  ;;  %v3304_v40 = vpop.eup %3303 }
 0x349   :  { %3305 = vrcp.f32 %v1584_v46 }
 0x34a   :  { %3307 = vrcp.f32 %v1585_v0 }
 0x353   :  { %v3306_v48 = vpop.eup %3305 }
 0x354   :  { %v1595_v62 = vmul.f32 %v3306_v48, %v3304_v40  ;;  %v3308_v38 = vpop.eup %3307 }
 0x355   :  { %v1594_v37 = vmul.f32 %v3308_v38, %v4194_v9 }
 0x357   :  { %v4366_v33 = vadd.f32 %v1595_v62, %v1594_v37 }
 0x377   :  { %v1488_v39 = vpop.f32.mrb[28].mxu0  ;;  %v1529_v32 = vpop.f32.mrb[28].mxu1 }
 0x378   :  { %v1536_v44 = vadd.f32 %v1488_v39, %v5804_v34  ;;  %v1490_v52 = vpop.f32.mrb[29].mxu0  ;;  %v1531_v55 = vpop.f32.mrb[29].mxu1  ;;  %v1538_v9 = vadd.f32 %v1529_v32, %v4211_v16 }
 0x379   :  { %v1537_v5 = vadd.f32 %v1490_v52, %v4205_v1  ;;  %v1492_v54 = vpop.f32.mrb[30].mxu0  ;;  %v1533_v46 = vpop.f32.mrb[30].mxu1  ;;  %v1539_v0 = vadd.f32 %v1531_v55, %v4215_v41 }
 0x37a   :  { %v3118_v60 = vmul.f32 -1.442695, %v1536_v44  ;;  %v1493_v7 = vpop.f32.mrb[31].mxu0  ;;  %v1534_v56 = vpop.f32.mrb[31].mxu1  ;;  %v3120_v40 = vmul.f32 -1.442695, %v1538_v9 }
 0x37b   :  { %v3119_v47 = vmul.f32 -1.442695, %v1537_v5 }
 0x37c   :  { %3309 = vpow2.f32 %v3118_v60 }
 0x37d   :  { %3311 = vpow2.f32 %v3119_v47 }
 0x37e   :  { %3313 = vpow2.f32 %v3123_v63 }
 0x37f   :  { %3315 = vtanh.f32 %v1539_v0 }
 0x380   :  { %3317 = vpow2.f32 %v3120_v40 }
 0x386   :  { %v3310_v48 = vpop.eup %3309 }
 0x387   :  { %v1549_v62 = vadd.f32 1.0, %v3310_v48  ;;  %v3312_v38 = vpop.eup %3311 }
 0x388   :  { %v1550_v37 = vadd.f32 1.0, %v3312_v38  ;;  %v3314_v39 = vpop.eup %3313  ;;  %v5807_v38 = vld [vmem:[#allocation90_spill] sm:$0xff] }
 0x389   :  { %3319 = vrcp.f32 %v1549_v62  ;;  %v3316_v44 = vpop.eup %3315  ;;  %v1586_v54 = vadd.f32 1.0, %v3314_v39  ;;  %v5806_v62 = vld [vmem:[#allocation89_spill] sm:$0xff]  ;;  %v5809_v39 = vld [vmem:[#allocation92_spill] sm:$0xff] }
 0x38a   :  { %3321 = vrcp.f32 %v1550_v37  ;;  %v3318_v52 = vpop.eup %3317  ;;  %v5808_v37 = vld [vmem:[#allocation91_spill] sm:$0xff] }
 0x38b   :  { %v1551_v28 = vadd.f32 1.0, %v3318_v52  ;;  %3323 = vtanh.f32 %v4366_v33  ;;  %v5811_v52 = vld [vmem:[#allocation94_spill] sm:$0xff] }
 0x38c   :  { %3325 = vrcp.f32 %v1586_v54  ;;  %v5813_v54 = vld [vmem:[#allocation96_spill] sm:$0xff] }
 0x38d   :  { %3327 = vrcp.f32 %v1551_v28  ;;  %v5816_v28 = vld [vmem:[#allocation99_spill] sm:$0xff] }
 0x393   :  { %v3320_v5 = vpop.eup %3319 }
 0x394   :  { %v1560_v46 = vmul.f32 %v3320_v5, %v3316_v44  ;;  %v3322_v32 = vpop.eup %3321  ;;  %v5810_v44 = vld [vmem:[#allocation93_spill] sm:$0xff]  ;;  %v5812_v5 = vld [vmem:[#allocation95_spill] sm:$0xff] }
 0x395   :  { %v1559_v55 = vmul.f32 %v3322_v32, %v4220_v61  ;;  %v3324_v7 = vpop.eup %3323  ;;  %v5805_v61 = vld [vmem:[#allocation88_spill] sm:$0xff]  ;;  %v5815_v32 = vld [vmem:[#allocation98_spill] sm:$0xff] }
 0x396   :  { %v3326_v56 = vpop.eup %3325 }
 0x397   :  { %v4374_v60 = vadd.f32 %v1560_v46, %v1559_v55  ;;  %v3328_v47 = vpop.eup %3327  ;;  %v1598_v63 = vmul.f32 %v3326_v56, %v3324_v7  ;;  %v5814_v46 = vld [vmem:[#allocation97_spill] sm:$0xff]  ;;  %v5817_v55 = vld [vmem:[#allocation100_spill] sm:$0xff]  ;;  %v5819_v56 = vld [vmem:[#allocation102_spill] sm:$0xff] }
 0x398   :  { %v5818_v7 = vld [vmem:[#allocation101_spill] sm:$0xff] }
 0x399   :  { %3329 = vtanh.f32 %v4374_v60  ;;  %v4377_v48 = vpack.c.bf16 %v1598_v63, %v1598_v63  ;;  %v5822_v63 = vld [vmem:[#allocation105_spill] sm:$0xff] }
 0x3a3   :  { %v3330_v9 = vpop.eup %3329 }
 0x3a4   :  { %v1563_v0 = vmul.f32 %v3330_v9, %v3328_v47  ;;  %v5820_v47 = vld [vmem:[#allocation103_spill] sm:$0xff]  ;;  %v5821_v9 = vld [vmem:[#allocation104_spill] sm:$0xff] }
 0x3a6   :  { %v1600_v40 = vpack.c.bf16 %v1563_v0, %v1563_v0  ;;  %v5823_v0 = vld [vmem:[#allocation106_spill] sm:$0xff] }
 0x3a8   :  { %1633 = vmatprep.mubr.bf16.mxu0 %v1600_v40  ;;  %1674 = vmatprep.mubr.bf16.mxu1 %v1600_v40 }
 0x3a9   :  { %1634 = vmatmul.mubr.bf16.vlgmr.msra.gmra.mrb[32].mxu0 %v4377_v48  ;;  %1675 = vmatmul.mubr.bf16.vlgmr.msra.gmra.mrb[32].mxu1 %v4377_v48 }
 0x3aa   :  { %1684 = vmatpush1.bf16.msra.mxu0 %v3837_v49  ;;  %1725 = vmatpush1.bf16.msra.mxu1 %v5710_v53 }
 0x3ab   :  { %1715 = vmatprep.mubr.bf16.mxu0 %v1600_v40  ;;  %1756 = vmatprep.mubr.bf16.mxu1 %v1600_v40  ;;  %v5824_v40 = vld [vmem:[#allocation107_spill] sm:$0xff] }
 0x3ac   :  { %1685 = vmatprep.subr.bf16.mxu0 %v5711_v15  ;;  %1726 = vmatprep.subr.bf16.mxu1 %v5712_v18 }
 0x3ae   :  { %1686 = vmatpush1.bf16.msra.mxu0 %v5713_v8  ;;  %1727 = vmatpush1.bf16.msra.mxu1 %v5714_v20 }
 0x3af   :  { %1687 = vmatprep.subr.bf16.mxu0 %v5805_v61  ;;  %1728 = vmatprep.subr.bf16.mxu1 %v5806_v62 }
 0x3b2   :  { %1688 = vmatpush1.bf16.msra.mxu0 %v5807_v38  ;;  %1729 = vmatpush1.bf16.msra.mxu1 %v5808_v37 }
 0x3b3   :  { %1689 = vmatprep.subr.bf16.mxu0 %v5809_v39  ;;  %1730 = vmatprep.subr.bf16.mxu1 %v5810_v44 }
 0x3b6   :  { %1690 = vmatpush1.bf16.msra.mxu0 %v5811_v52  ;;  %1731 = vmatpush1.bf16.msra.mxu1 %v5812_v5 }
 0x3b7   :  { %1691 = vmatprep.subr.bf16.mxu0 %v5813_v54  ;;  %1732 = vmatprep.subr.bf16.mxu1 %v5814_v46  ;;  %v5825_v46 = vld [vmem:[#allocation108_spill] sm:$0xff] }
 0x3ba   :  { %1692 = vmatpush1.bf16.msra.mxu0 %v5815_v32  ;;  %1733 = vmatpush1.bf16.msra.mxu1 %v5816_v28  ;;  %v5826_v32 = vld [vmem:[#allocation109_spill] sm:$0xff]  ;;  %v5827_v28 = vld [vmem:[#allocation110_spill] sm:$0xff] }
 0x3bb   :  { %1693 = vmatprep.subr.bf16.mxu0 %v5817_v55  ;;  %1734 = vmatprep.subr.bf16.mxu1 %v5818_v7  ;;  %v5828_v55 = vld [vmem:[#allocation111_spill] sm:$0xff]  ;;  %v5829_v7 = vld [vmem:[#allocation112_spill] sm:$0xff] }
 0x3be   :  { %1694 = vmatpush1.bf16.msra.mxu0 %v5819_v56  ;;  %1735 = vmatpush1.bf16.msra.mxu1 %v5820_v47  ;;  %v5830_v56 = vld [vmem:[#allocation113_spill] sm:$0xff]  ;;  %v5831_v47 = vld [vmem:[#allocation114_spill] sm:$0xff] }
 0x3bf   :  { %1695 = vmatprep.subr.bf16.mxu0 %v5821_v9  ;;  %1736 = vmatprep.subr.bf16.mxu1 %v5822_v63  ;;  %v5832_v9 = vld [vmem:[#allocation115_spill] sm:$0xff]  ;;  %v5833_v63 = vld [vmem:[#allocation116_spill] sm:$0xff] }
 0x3c2   :  { %1696 = vmatpush1.bf16.msra.mxu0 %v5823_v0  ;;  %1737 = vmatpush1.bf16.msra.mxu1 %v5824_v40  ;;  %v5834_v0 = vld [vmem:[#allocation117_spill] sm:$0xff]  ;;  %v5835_v40 = vld [vmem:[#allocation118_spill] sm:$0xff] }
 0x3c3   :  { %1697 = vmatprep.subr.bf16.mxu0 %v5825_v46  ;;  %1738 = vmatprep.subr.bf16.mxu1 %v5826_v32 }
 0x3c6   :  { %1698 = vmatpush1.bf16.msra.mxu0 %v5827_v28  ;;  %1739 = vmatpush1.bf16.msra.mxu1 %v5828_v55  ;;  %v5836_v55 = vld [vmem:[#allocation122_spill] sm:$0xff] }
 0x3c7   :  { %1699 = vmatprep.subr.bf16.mxu0 %v5829_v7  ;;  %1740 = vmatprep.subr.bf16.mxu1 %v5830_v56  ;;  %v5837_v7 = vld [vmem:[#allocation123_spill] sm:$0xff] }
 0x3ca   :  { %1700 = vmatpush1.bf16.msra.mxu0 %v5831_v47  ;;  %1741 = vmatpush1.bf16.msra.mxu1 %v5832_v9  ;;  %v5838_v9 = vld [vmem:[#allocation126_spill] sm:$0xff] }
 0x3cb   :  { %1701 = vmatprep.subr.bf16.mxu0 %v5833_v63  ;;  %1742 = vmatprep.subr.bf16.mxu1 %v5834_v0  ;;  %v5839_v63 = vld [vmem:[#allocation127_spill] sm:$0xff] }
 0x3ce   :  { %1702 = vmatpush1.bf16.msra.mxu0 %v5835_v40  ;;  %1743 = vmatpush1.bf16.msra.mxu1 %v5746_v35 }
 0x3cf   :  { %1703 = vmatprep.subr.bf16.mxu0 %v5747_v50  ;;  %1744 = vmatprep.subr.bf16.mxu1 %v5748_v36 }
 0x3d2   :  { %1704 = vmatpush1.bf16.msra.mxu0 %v5836_v55  ;;  %1745 = vmatpush1.bf16.msra.mxu1 %v5837_v7 }
 0x3d3   :  { %1705 = vmatprep.subr.bf16.mxu0 %v5751_v21  ;;  %1746 = vmatprep.subr.bf16.mxu1 %v5752_v57 }
 0x3d6   :  { %1706 = vmatpush1.bf16.msra.mxu0 %v5838_v9  ;;  %1747 = vmatpush1.bf16.msra.mxu1 %v5839_v63 }
 0x3d7   :  { %1707 = vmatprep.subr.bf16.mxu0 %v5755_v2  ;;  %1748 = vmatprep.subr.bf16.mxu1 %v5756_v3 }
 0x3da   :  { %1708 = vmatpush1.bf16.msra.mxu0 %v4025_v6  ;;  %1749 = vmatpush1.bf16.msra.mxu1 %v4027_v22 }
 0x3db   :  { %1709 = vmatprep.subr.bf16.mxu0 %v4031_v12  ;;  %1750 = vmatprep.subr.bf16.mxu1 %v5757_v45 }
 0x3de   :  { %1710 = vmatpush1.bf16.msra.mxu0 %v5758_v4  ;;  %1751 = vmatpush1.bf16.msra.mxu1 %v4039_v42 }
 0x3df   :  { %1711 = vmatprep.subr.bf16.mxu0 %v4043_v58  ;;  %1752 = vmatprep.subr.bf16.mxu1 %v5759_v59 }
 0x3e2   :  { %1712 = vmatpush1.bf16.msra.mxu0 %v5760_v27  ;;  %1753 = vmatpush1.bf16.msra.mxu1 %v4051_v30 }
 0x3e3   :  { %1713 = vmatprep.subr.bf16.mxu0 %v4055_v11  ;;  %1754 = vmatprep.subr.bf16.mxu1 %v4057_v43  ;;  %v5900_v43 = vld [vmem:[#allocation150_spill] sm:$0xff]  ;;  %v5901_v11 = vld [vmem:[#allocation76_spill] sm:$0xff] }
 0x3e6   :  { %1714 = vmatpush1.bf16.msra.mxu0 %v4063_v26  ;;  %1755 = vmatpush1.bf16.msra.mxu1 %v4065_v51  ;;  %v5842_v51 = vld [vmem:[#allocation19_spill] sm:$0xff] }
 0x3e7   :  { %1830 = vmatprep.subr.bf16.mxu0 %v3612_v10  ;;  %1871 = vmatprep.subr.bf16.mxu1 %v3617_v14  ;;  %v5840_v10 = vld [vmem:[#allocation16_spill] sm:$0xff]  ;;  %v5841_v14 = vld [vmem:[#allocation17_spill] sm:$0xff] }
 0x3e9   :  { %1716 = vmatmul.mubr.bf16.vlgmr.msra.gmra.mrb[36].mxu0 %v4377_v48  ;;  %1757 = vmatmul.mubr.bf16.vlgmr.msra.gmra.mrb[36].mxu1 %v4377_v48  ;;  %v5843_v48 = vld [vmem:[#allocation18_spill] sm:$0xff] }
 0x3ea   :  { %1831 = vmatpush1.bf16.msra.mxu0 %v3614_v13  ;;  %1872 = vmatpush1.bf16.msra.mxu1 %v3624_v23  ;;  %v5844_v13 = vld [vmem:[#allocation20_spill] sm:$0xff]  ;;  %v5845_v23 = vld [vmem:[#allocation21_spill] sm:$0xff] }
 0x3eb   :  { %1832 = vmatprep.subr.bf16.mxu0 %v3621_v19  ;;  %1873 = vmatprep.subr.bf16.mxu1 %v3628_v24  ;;  %v5846_v19 = vld [vmem:[#allocation22_spill] sm:$0xff]  ;;  %v5847_v24 = vld [vmem:[#allocation23_spill] sm:$0xff] }
 0x3ee   :  { %1833 = vmatpush1.bf16.msra.mxu0 %v3630_v25  ;;  %1874 = vmatpush1.bf16.msra.mxu1 %v3638_v31  ;;  %v5848_v25 = vld [vmem:[#allocation24_spill] sm:$0xff]  ;;  %v5849_v31 = vld [vmem:[#allocation25_spill] sm:$0xff] }
 0x3ef   :  { %1834 = vmatprep.subr.bf16.mxu0 %v3633_v29  ;;  %1875 = vmatprep.subr.bf16.mxu1 %v5840_v10  ;;  %v5850_v29 = vld [vmem:[#allocation26_spill] sm:$0xff]  ;;  %v5851_v10 = vld [vmem:[#allocation27_spill] sm:$0xff] }
 0x3f2   :  { %1835 = vmatpush1.bf16.msra.mxu0 %v5841_v14  ;;  %1876 = vmatpush1.bf16.msra.mxu1 %v5842_v51  ;;  %v5852_v14 = vld [vmem:[#allocation28_spill] sm:$0xff]  ;;  %v5853_v51 = vld [vmem:[#allocation29_spill] sm:$0xff] }
 0x3f3   :  { %1836 = vmatprep.subr.bf16.mxu0 %v5843_v48  ;;  %1877 = vmatprep.subr.bf16.mxu1 %v5844_v13  ;;  %v5854_v48 = vld [vmem:[#allocation30_spill] sm:$0xff]  ;;  %v5855_v13 = vld [vmem:[#allocation31_spill] sm:$0xff] }
 0x3f6   :  { %1837 = vmatpush1.bf16.msra.mxu0 %v5845_v23  ;;  %1878 = vmatpush1.bf16.msra.mxu1 %v5846_v19  ;;  %v5856_v23 = vld [vmem:[#allocation32_spill] sm:$0xff]  ;;  %v5857_v19 = vld [vmem:[#allocation33_spill] sm:$0xff] }
 0x3f7   :  { %1838 = vmatprep.subr.bf16.mxu0 %v5847_v24  ;;  %1879 = vmatprep.subr.bf16.mxu1 %v5848_v25  ;;  %v5858_v24 = vld [vmem:[#allocation34_spill] sm:$0xff]  ;;  %v5859_v25 = vld [vmem:[#allocation35_spill] sm:$0xff] }
 0x3fa   :  { %1839 = vmatpush1.bf16.msra.mxu0 %v5849_v31  ;;  %1880 = vmatpush1.bf16.msra.mxu1 %v5850_v29  ;;  %v5860_v31 = vld [vmem:[#allocation36_spill] sm:$0xff]  ;;  %v5861_v29 = vld [vmem:[#allocation37_spill] sm:$0xff] }
 0x3fb   :  { %1840 = vmatprep.subr.bf16.mxu0 %v5851_v10  ;;  %1881 = vmatprep.subr.bf16.mxu1 %v5852_v14  ;;  %v5862_v10 = vld [vmem:[#allocation38_spill] sm:$0xff]  ;;  %v5863_v14 = vld [vmem:[#allocation39_spill] sm:$0xff] }
 0x3fe   :  { %1841 = vmatpush1.bf16.msra.mxu0 %v5853_v51  ;;  %1882 = vmatpush1.bf16.msra.mxu1 %v5854_v48  ;;  %v5864_v51 = vld [vmem:[#allocation40_spill] sm:$0xff]  ;;  %v5865_v48 = vld [vmem:[#allocation41_spill] sm:$0xff] }
 0x3ff   :  { %1842 = vmatprep.subr.bf16.mxu0 %v5855_v13  ;;  %1883 = vmatprep.subr.bf16.mxu1 %v5856_v23  ;;  %v5866_v13 = vld [vmem:[#allocation42_spill] sm:$0xff]  ;;  %v5867_v23 = vld [vmem:[#allocation43_spill] sm:$0xff] }
 0x402   :  { %1843 = vmatpush1.bf16.msra.mxu0 %v5857_v19  ;;  %1884 = vmatpush1.bf16.msra.mxu1 %v5858_v24  ;;  %v5868_v19 = vld [vmem:[#allocation44_spill] sm:$0xff]  ;;  %v5869_v24 = vld [vmem:[#allocation45_spill] sm:$0xff] }
 0x403   :  { %1844 = vmatprep.subr.bf16.mxu0 %v5859_v25  ;;  %1885 = vmatprep.subr.bf16.mxu1 %v5860_v31  ;;  %v5870_v25 = vld [vmem:[#allocation46_spill] sm:$0xff]  ;;  %v5871_v31 = vld [vmem:[#allocation47_spill] sm:$0xff] }
 0x406   :  { %1845 = vmatpush1.bf16.msra.mxu0 %v5861_v29  ;;  %1886 = vmatpush1.bf16.msra.mxu1 %v5862_v10  ;;  %v5872_v29 = vld [vmem:[#allocation48_spill] sm:$0xff]  ;;  %v5873_v10 = vld [vmem:[#allocation49_spill] sm:$0xff] }
 0x407   :  { %1846 = vmatprep.subr.bf16.mxu0 %v5863_v14  ;;  %1887 = vmatprep.subr.bf16.mxu1 %v5864_v51  ;;  %v5874_v14 = vld [vmem:[#allocation50_spill] sm:$0xff]  ;;  %v5875_v51 = vld [vmem:[#allocation51_spill] sm:$0xff] }
 0x40a   :  { %1847 = vmatpush1.bf16.msra.mxu0 %v5865_v48  ;;  %1888 = vmatpush1.bf16.msra.mxu1 %v5866_v13  ;;  %v5876_v48 = vld [vmem:[#allocation52_spill] sm:$0xff]  ;;  %v5877_v13 = vld [vmem:[#allocation53_spill] sm:$0xff] }
 0x40b   :  { %1848 = vmatprep.subr.bf16.mxu0 %v5867_v23  ;;  %1889 = vmatprep.subr.bf16.mxu1 %v5868_v19  ;;  %v5878_v23 = vld [vmem:[#allocation54_spill] sm:$0xff]  ;;  %v5879_v19 = vld [vmem:[#allocation55_spill] sm:$0xff] }
 0x40e   :  { %1849 = vmatpush1.bf16.msra.mxu0 %v5869_v24  ;;  %1890 = vmatpush1.bf16.msra.mxu1 %v5870_v25  ;;  %v5880_v24 = vld [vmem:[#allocation56_spill] sm:$0xff]  ;;  %v5881_v25 = vld [vmem:[#allocation57_spill] sm:$0xff] }
 0x40f   :  { %1850 = vmatprep.subr.bf16.mxu0 %v5871_v31  ;;  %1891 = vmatprep.subr.bf16.mxu1 %v5872_v29  ;;  %v5882_v31 = vld [vmem:[#allocation58_spill] sm:$0xff]  ;;  %v5883_v29 = vld [vmem:[#allocation59_spill] sm:$0xff] }
 0x412   :  { %1851 = vmatpush1.bf16.msra.mxu0 %v5873_v10  ;;  %1892 = vmatpush1.bf16.msra.mxu1 %v5874_v14  ;;  %v5884_v10 = vld [vmem:[#allocation61_spill] sm:$0xff]  ;;  %v5885_v14 = vld [vmem:[#allocation60_spill] sm:$0xff] }
 0x413   :  { %1852 = vmatprep.subr.bf16.mxu0 %v5875_v51  ;;  %1893 = vmatprep.subr.bf16.mxu1 %v5876_v48  ;;  %v5886_v51 = vld [vmem:[#allocation62_spill] sm:$0xff]  ;;  %v5887_v48 = vld [vmem:[#allocation63_spill] sm:$0xff] }
 0x416   :  { %1853 = vmatpush1.bf16.msra.mxu0 %v5877_v13  ;;  %1894 = vmatpush1.bf16.msra.mxu1 %v5878_v23  ;;  %v5888_v13 = vld [vmem:[#allocation64_spill] sm:$0xff]  ;;  %v5889_v23 = vld [vmem:[#allocation65_spill] sm:$0xff] }
 0x417   :  { %1854 = vmatprep.subr.bf16.mxu0 %v5879_v19  ;;  %1895 = vmatprep.subr.bf16.mxu1 %v5880_v24  ;;  %v5890_v19 = vld [vmem:[#allocation66_spill] sm:$0xff]  ;;  %v5891_v24 = vld [vmem:[#allocation67_spill] sm:$0xff] }
 0x41a   :  { %1855 = vmatpush1.bf16.msra.mxu0 %v5881_v25  ;;  %1896 = vmatpush1.bf16.msra.mxu1 %v5882_v31  ;;  %v5892_v25 = vld [vmem:[#allocation68_spill] sm:$0xff]  ;;  %v5893_v31 = vld [vmem:[#allocation69_spill] sm:$0xff] }
 0x41b   :  { %1856 = vmatprep.subr.bf16.mxu0 %v5883_v29  ;;  %1897 = vmatprep.subr.bf16.mxu1 %v5884_v10  ;;  %v5894_v29 = vld [vmem:[#allocation70_spill] sm:$0xff]  ;;  %v5895_v10 = vld [vmem:[#allocation71_spill] sm:$0xff] }
 0x41e   :  { %1857 = vmatpush1.bf16.msra.mxu0 %v5885_v14  ;;  %1898 = vmatpush1.bf16.msra.mxu1 %v5886_v51  ;;  %v5896_v14 = vld [vmem:[#allocation72_spill] sm:$0xff]  ;;  %v5897_v51 = vld [vmem:[#allocation75_spill] sm:$0xff] }
 0x41f   :  { %1858 = vmatprep.subr.bf16.mxu0 %v5887_v48  ;;  %1899 = vmatprep.subr.bf16.mxu1 %v5888_v13  ;;  %v5898_v48 = vld [vmem:[#allocation147_spill] sm:$0xff] }
 0x420   :  { %v188_v26 = vadd.f32 %v5898_v48, %v5897_v51  ;;  %v5899_v13 = vld [vmem:[#allocation79_spill] sm:$0xff] }
 0x422   :  { %1859 = vmatpush1.bf16.msra.mxu0 %v5889_v23  ;;  %1900 = vmatpush1.bf16.msra.mxu1 %v5890_v19  ;;  %v261_v23 = vadd.f32 %v5900_v43, %v5899_v13  ;;  %v5902_v19 = vld [vmem:[#allocation149_spill] sm:$0xff] }
 0x423   :  { %1860 = vmatprep.subr.bf16.mxu0 %v5891_v24  ;;  %1901 = vmatprep.subr.bf16.mxu1 %v5892_v25  ;;  %v190_v30 = vadd.f32 %v5902_v19, %v5901_v11  ;;  %v5903_v24 = vld [vmem:[#allocation151_spill] sm:$0xff] }
 0x424   :  { %v263_v25 = vadd.f32 %v5903_v24, %v5698_v17 }
 0x426   :  { %1861 = vmatpush1.bf16.msra.mxu0 %v5893_v31  ;;  %1902 = vmatpush1.bf16.msra.mxu1 %v5894_v29 }
 0x427   :  { %1912 = vmatprep.subr.bf16.mxu0 %v5895_v10  ;;  %1953 = vmatprep.subr.bf16.mxu1 %v5896_v14 }
 0x47c   :  { %v1635_v27 = vpop.f32.mrb[32].mxu0  ;;  %v1676_v31 = vpop.f32.mrb[32].mxu1 }
 0x47d   :  { %v1800_v59 = vadd.f32 %v1635_v27, %v188_v26  ;;  %v1802_v29 = vadd.f32 %v1676_v31, %v261_v23  ;;  %v1637_v58 = vpop.f32.mrb[33].mxu0  ;;  %v1678_v10 = vpop.f32.mrb[33].mxu1 }
 0x47e   :  { %v1801_v42 = vadd.f32 %v1637_v58, %v190_v30  ;;  %v1803_v14 = vadd.f32 %v1678_v10, %v263_v25  ;;  %v1639_v4 = vpop.f32.mrb[34].mxu0  ;;  %v1680_v45 = vpop.f32.mrb[34].mxu1 }
 0x47f   :  { %v3127_v48 = vmul.f32 -1.442695, %v1800_v59  ;;  %v1640_v51 = vpop.f32.mrb[35].mxu0  ;;  %v1681_v12 = vpop.f32.mrb[35].mxu1 }
 0x480   :  { %v3128_v43 = vmul.f32 -1.442695, %v1801_v42 }
 0x481   :  { %3331 = vpow2.f32 %v3127_v48 }
 0x482   :  { %3333 = vpow2.f32 %v3128_v43  ;;  %v3129_v43 = vmul.f32 -1.442695, %v1802_v29 }
 0x483   :  { %3335 = vtanh.f32 %v1803_v14 }
 0x48b   :  { %v3332_v19 = vpop.eup %3331 }
 0x48c   :  { %v1813_v11 = vadd.f32 1.0, %v3332_v19  ;;  %v3334_v13 = vpop.eup %3333 }
 0x48d   :  { %v1814_v24 = vadd.f32 1.0, %v3334_v13  ;;  %v3336_v23 = vpop.eup %3335 }
 0x48e   :  { %3337 = vrcp.f32 %v1813_v11 }
 0x48f   :  { %3339 = vrcp.f32 %v1814_v24 }
 0x498   :  { %v3338_v31 = vpop.eup %3337 }
 0x499   :  { %v1824_v26 = vmul.f32 %v3338_v31, %v3336_v23  ;;  %v3340_v58 = vpop.eup %3339 }
 0x49a   :  { %v1823_v10 = vmul.f32 %v3340_v58, %v4366_v33 }
 0x49c   :  { %v4520_v25 = vadd.f32 %v1824_v26, %v1823_v10 }
 0x4bc   :  { %v1717_v30 = vpop.f32.mrb[36].mxu0  ;;  %v1758_v12 = vpop.f32.mrb[36].mxu1 }
 0x4bd   :  { %v1765_v42 = vadd.f32 %v1717_v30, %v5804_v34  ;;  %v1719_v51 = vpop.f32.mrb[37].mxu0  ;;  %v1760_v45 = vpop.f32.mrb[37].mxu1  ;;  %v1767_v33 = vadd.f32 %v1758_v12, %v4211_v16 }
 0x4be   :  { %v1766_v4 = vadd.f32 %v1719_v51, %v4205_v1  ;;  %v1721_v14 = vpop.f32.mrb[38].mxu0  ;;  %v1762_v11 = vpop.f32.mrb[38].mxu1  ;;  %v1768_v19 = vadd.f32 %v1760_v45, %v4215_v41 }
 0x4bf   :  { %v3124_v13 = vmul.f32 -1.442695, %v1765_v42  ;;  %v1722_v59 = vpop.f32.mrb[39].mxu0  ;;  %v1763_v27 = vpop.f32.mrb[39].mxu1  ;;  %v3126_v24 = vmul.f32 -1.442695, %v1767_v33 }
 0x4c0   :  { %v3125_v48 = vmul.f32 -1.442695, %v1766_v4 }
 0x4c1   :  { %3341 = vpow2.f32 %v3124_v13 }
 0x4c2   :  { %3343 = vpow2.f32 %v3125_v48 }
 0x4c3   :  { %3345 = vpow2.f32 %v3129_v43 }
 0x4c4   :  { %3347 = vtanh.f32 %v1768_v19 }
 0x4c5   :  { %3349 = vpow2.f32 %v3126_v24 }
 0x4cb   :  { %v3342_v23 = vpop.eup %3341 }
 0x4cc   :  { %v1778_v31 = vadd.f32 1.0, %v3342_v23  ;;  %v3344_v26 = vpop.eup %3343  ;;  %v5905_v23 = vld [vmem:[#allocation98_spill] sm:$0xff] }
 0x4cd   :  { %v1779_v58 = vadd.f32 1.0, %v3344_v26  ;;  %v3346_v10 = vpop.eup %3345  ;;  %v5907_v26 = vld [vmem:[#allocation100_spill] sm:$0xff] }
 0x4ce   :  { %3351 = vrcp.f32 %v1778_v31  ;;  %v3348_v30 = vpop.eup %3347  ;;  %v1815_v4 = vadd.f32 1.0, %v3346_v10  ;;  %v5906_v31 = vld [vmem:[#allocation99_spill] sm:$0xff]  ;;  %v5909_v10 = vld [vmem:[#allocation102_spill] sm:$0xff] }
 0x4cf   :  { %3353 = vrcp.f32 %v1779_v58  ;;  %v3350_v42 = vpop.eup %3349  ;;  %v5908_v58 = vld [vmem:[#allocation101_spill] sm:$0xff] }
 0x4d0   :  { %v1780_v29 = vadd.f32 1.0, %v3350_v42  ;;  %3355 = vtanh.f32 %v4520_v25  ;;  %v5911_v42 = vld [vmem:[#allocation104_spill] sm:$0xff] }
 0x4d1   :  { %3357 = vrcp.f32 %v1815_v4  ;;  %v5913_v4 = vld [vmem:[#allocation106_spill] sm:$0xff] }
 0x4d2   :  { %3359 = vrcp.f32 %v1780_v29  ;;  %v5916_v29 = vld [vmem:[#allocation112_spill] sm:$0xff] }
 0x4d8   :  { %v3352_v51 = vpop.eup %3351 }
 0x4d9   :  { %v1789_v14 = vmul.f32 %v3352_v51, %v3348_v30  ;;  %v3354_v12 = vpop.eup %3353  ;;  %v5910_v30 = vld [vmem:[#allocation103_spill] sm:$0xff]  ;;  %v5912_v51 = vld [vmem:[#allocation105_spill] sm:$0xff] }
 0x4da   :  { %v1788_v45 = vmul.f32 %v3354_v12, %v4374_v60  ;;  %v3356_v13 = vpop.eup %3355  ;;  %v5904_v60 = vld [vmem:[#allocation97_spill] sm:$0xff]  ;;  %v5915_v12 = vld [vmem:[#allocation111_spill] sm:$0xff] }
 0x4db   :  { %v3358_v59 = vpop.eup %3357 }
 0x4dc   :  { %v4528_v11 = vadd.f32 %v1789_v14, %v1788_v45  ;;  %v3360_v27 = vpop.eup %3359  ;;  %v1827_v33 = vmul.f32 %v3358_v59, %v3356_v13  ;;  %v5914_v14 = vld [vmem:[#allocation107_spill] sm:$0xff]  ;;  %v5918_v13 = vld [vmem:[#allocation116_spill] sm:$0xff] }
 0x4dd   :  { %v5917_v45 = vld [vmem:[#allocation115_spill] sm:$0xff]  ;;  %v5919_v59 = vld [vmem:[#allocation132_spill] sm:$0xff] }
 0x4de   :  { %3361 = vtanh.f32 %v4528_v11  ;;  %v4531_v24 = vpack.c.bf16 %v1827_v33, %v1827_v33  ;;  %v5922_v33 = vld [vmem:[#allocation135_spill] sm:$0xff] }
 0x4e8   :  { %v3362_v48 = vpop.eup %3361 }
 0x4e9   :  { %v1792_v43 = vmul.f32 %v3362_v48, %v3360_v27  ;;  %v5920_v27 = vld [vmem:[#allocation133_spill] sm:$0xff]  ;;  %v5921_v48 = vld [vmem:[#allocation134_spill] sm:$0xff] }
 0x4eb   :  { %v1829_v19 = vpack.c.bf16 %v1792_v43, %v1792_v43  ;;  %v5923_v43 = vld [vmem:[#allocation136_spill] sm:$0xff] }
 0x4ed   :  { %1862 = vmatprep.mubr.bf16.mxu0 %v1829_v19  ;;  %1903 = vmatprep.mubr.bf16.mxu1 %v1829_v19 }
 0x4ee   :  { %1863 = vmatmul.mubr.bf16.vlgmr.msra.gmra.mrb[40].mxu0 %v4531_v24  ;;  %1904 = vmatmul.mubr.bf16.vlgmr.msra.gmra.mrb[40].mxu1 %v4531_v24 }
 0x4ef   :  { %1913 = vmatpush1.bf16.msra.mxu0 %v3837_v49  ;;  %1954 = vmatpush1.bf16.msra.mxu1 %v5710_v53 }
 0x4f0   :  { %1944 = vmatprep.mubr.bf16.mxu0 %v1829_v19  ;;  %1985 = vmatprep.mubr.bf16.mxu1 %v1829_v19  ;;  %v5924_v19 = vld [vmem:[#allocation137_spill] sm:$0xff] }
 0x4f1   :  { %1914 = vmatprep.subr.bf16.mxu0 %v5711_v15  ;;  %1955 = vmatprep.subr.bf16.mxu1 %v5712_v18 }
 0x4f3   :  { %1915 = vmatpush1.bf16.msra.mxu0 %v5713_v8  ;;  %1956 = vmatpush1.bf16.msra.mxu1 %v5714_v20 }
 0x4f4   :  { %1916 = vmatprep.subr.bf16.mxu0 %v5805_v61  ;;  %1957 = vmatprep.subr.bf16.mxu1 %v5806_v62 }
 0x4f7   :  { %1917 = vmatpush1.bf16.msra.mxu0 %v5807_v38  ;;  %1958 = vmatpush1.bf16.msra.mxu1 %v5808_v37 }
 0x4f8   :  { %1918 = vmatprep.subr.bf16.mxu0 %v5809_v39  ;;  %1959 = vmatprep.subr.bf16.mxu1 %v5810_v44 }
 0x4fb   :  { %1919 = vmatpush1.bf16.msra.mxu0 %v5811_v52  ;;  %1960 = vmatpush1.bf16.msra.mxu1 %v5812_v5 }
 0x4fc   :  { %1920 = vmatprep.subr.bf16.mxu0 %v5813_v54  ;;  %1961 = vmatprep.subr.bf16.mxu1 %v5904_v60 }
 0x4ff   :  { %1921 = vmatpush1.bf16.msra.mxu0 %v5905_v23  ;;  %1962 = vmatpush1.bf16.msra.mxu1 %v5906_v31 }
 0x500   :  { %1922 = vmatprep.subr.bf16.mxu0 %v5907_v26  ;;  %1963 = vmatprep.subr.bf16.mxu1 %v5908_v58 }
 0x503   :  { %1923 = vmatpush1.bf16.msra.mxu0 %v5909_v10  ;;  %1964 = vmatpush1.bf16.msra.mxu1 %v5910_v30 }
 0x504   :  { %1924 = vmatprep.subr.bf16.mxu0 %v5911_v42  ;;  %1965 = vmatprep.subr.bf16.mxu1 %v5912_v51 }
 0x507   :  { %1925 = vmatpush1.bf16.msra.mxu0 %v5913_v4  ;;  %1966 = vmatpush1.bf16.msra.mxu1 %v5914_v14 }
 0x508   :  { %1926 = vmatprep.subr.bf16.mxu0 %v5825_v46  ;;  %1967 = vmatprep.subr.bf16.mxu1 %v5826_v32 }
 0x50b   :  { %1927 = vmatpush1.bf16.msra.mxu0 %v5827_v28  ;;  %1968 = vmatpush1.bf16.msra.mxu1 %v5915_v12 }
 0x50c   :  { %1928 = vmatprep.subr.bf16.mxu0 %v5916_v29  ;;  %1969 = vmatprep.subr.bf16.mxu1 %v5830_v56 }
 0x50f   :  { %1929 = vmatpush1.bf16.msra.mxu0 %v5831_v47  ;;  %1970 = vmatpush1.bf16.msra.mxu1 %v5917_v45 }
 0x510   :  { %1930 = vmatprep.subr.bf16.mxu0 %v5918_v13  ;;  %1971 = vmatprep.subr.bf16.mxu1 %v5834_v0 }
 0x513   :  { %1931 = vmatpush1.bf16.msra.mxu0 %v5835_v40  ;;  %1972 = vmatpush1.bf16.msra.mxu1 %v5746_v35 }
 0x514   :  { %1932 = vmatprep.subr.bf16.mxu0 %v5747_v50  ;;  %1973 = vmatprep.subr.bf16.mxu1 %v5748_v36 }
 0x517   :  { %1933 = vmatpush1.bf16.msra.mxu0 %v5836_v55  ;;  %1974 = vmatpush1.bf16.msra.mxu1 %v5837_v7 }
 0x518   :  { %1934 = vmatprep.subr.bf16.mxu0 %v5751_v21  ;;  %1975 = vmatprep.subr.bf16.mxu1 %v5752_v57  ;;  %v6001_v57 = vld [vmem:[#allocation76_spill] sm:$0xff] }
 0x51b   :  { %1935 = vmatpush1.bf16.msra.mxu0 %v5838_v9  ;;  %1976 = vmatpush1.bf16.msra.mxu1 %v5839_v63  ;;  %v5925_v63 = vld [vmem:[#allocation138_spill] sm:$0xff] }
 0x51c   :  { %1936 = vmatprep.subr.bf16.mxu0 %v5755_v2  ;;  %1977 = vmatprep.subr.bf16.mxu1 %v5756_v3  ;;  %v5926_v2 = vld [vmem:[#allocation139_spill] sm:$0xff]  ;;  %v5927_v3 = vld [vmem:[#allocation140_spill] sm:$0xff]  ;;  %v6000_v9 = vld [vmem:[#allocation154_spill] sm:$0xff] }
 0x51f   :  { %1937 = vmatpush1.bf16.msra.mxu0 %v4025_v6  ;;  %1978 = vmatpush1.bf16.msra.mxu1 %v4027_v22  ;;  %v5928_v6 = vld [vmem:[#allocation141_spill] sm:$0xff]  ;;  %v5929_v22 = vld [vmem:[#allocation143_spill] sm:$0xff] }
 0x520   :  { %1938 = vmatprep.subr.bf16.mxu0 %v5919_v59  ;;  %1979 = vmatprep.subr.bf16.mxu1 %v5920_v27  ;;  %v5930_v59 = vld [vmem:[#allocation144_spill] sm:$0xff]  ;;  %v5931_v27 = vld [vmem:[#allocation7_spill] sm:$0xff] }
 0x523   :  { %1939 = vmatpush1.bf16.msra.mxu0 %v5921_v48  ;;  %1980 = vmatpush1.bf16.msra.mxu1 %v5922_v33  ;;  %v5932_v48 = vld [vmem:[#allocation9_spill] sm:$0xff] }
 0x524   :  { %1940 = vmatprep.subr.bf16.mxu0 %v5923_v43  ;;  %1981 = vmatprep.subr.bf16.mxu1 %v5924_v19  ;;  %v5933_v19 = vld [vmem:[#allocation8_spill] sm:$0xff]  ;;  %v5942_v43 = vld [vmem:[#allocation19_spill] sm:$0xff] }
 0x527   :  { %1941 = vmatpush1.bf16.msra.mxu0 %v5925_v63  ;;  %1982 = vmatpush1.bf16.msra.mxu1 %v5926_v2  ;;  %v5934_v63 = vld [vmem:[#allocation11_spill] sm:$0xff]  ;;  %v5935_v2 = vld [vmem:[#allocation10_spill] sm:$0xff] }
 0x528   :  { %1942 = vmatprep.subr.bf16.mxu0 %v5927_v3  ;;  %1983 = vmatprep.subr.bf16.mxu1 %v5928_v6  ;;  %v5936_v3 = vld [vmem:[#allocation12_spill] sm:$0xff]  ;;  %v5937_v6 = vld [vmem:[#allocation13_spill] sm:$0xff] }
 0x52b   :  { %1943 = vmatpush1.bf16.msra.mxu0 %v5929_v22  ;;  %1984 = vmatpush1.bf16.msra.mxu1 %v5930_v59  ;;  %v5938_v22 = vld [vmem:[#allocation15_spill] sm:$0xff]  ;;  %v5939_v59 = vld [vmem:[#allocation14_spill] sm:$0xff] }
 0x52c   :  { %2059 = vmatprep.subr.bf16.mxu0 %v5931_v27  ;;  %2100 = vmatprep.subr.bf16.mxu1 %v5932_v48  ;;  %v5940_v27 = vld [vmem:[#allocation16_spill] sm:$0xff]  ;;  %v5941_v48 = vld [vmem:[#allocation17_spill] sm:$0xff] }
 0x52e   :  { %1945 = vmatmul.mubr.bf16.vlgmr.msra.gmra.mrb[44].mxu0 %v4531_v24  ;;  %1986 = vmatmul.mubr.bf16.vlgmr.msra.gmra.mrb[44].mxu1 %v4531_v24  ;;  %v5943_v24 = vld [vmem:[#allocation18_spill] sm:$0xff] }
 0x52f   :  { %2060 = vmatpush1.bf16.msra.mxu0 %v5933_v19  ;;  %2101 = vmatpush1.bf16.msra.mxu1 %v5934_v63  ;;  %v5944_v19 = vld [vmem:[#allocation20_spill] sm:$0xff]  ;;  %v5945_v63 = vld [vmem:[#allocation21_spill] sm:$0xff] }
 0x530   :  { %2061 = vmatprep.subr.bf16.mxu0 %v5935_v2  ;;  %2102 = vmatprep.subr.bf16.mxu1 %v5936_v3  ;;  %v5946_v2 = vld [vmem:[#allocation22_spill] sm:$0xff]  ;;  %v5947_v3 = vld [vmem:[#allocation23_spill] sm:$0xff] }
 0x533   :  { %2062 = vmatpush1.bf16.msra.mxu0 %v5937_v6  ;;  %2103 = vmatpush1.bf16.msra.mxu1 %v5938_v22  ;;  %v5948_v6 = vld [vmem:[#allocation24_spill] sm:$0xff]  ;;  %v5949_v22 = vld [vmem:[#allocation25_spill] sm:$0xff] }
 0x534   :  { %2063 = vmatprep.subr.bf16.mxu0 %v5939_v59  ;;  %2104 = vmatprep.subr.bf16.mxu1 %v5940_v27  ;;  %v5950_v59 = vld [vmem:[#allocation26_spill] sm:$0xff]  ;;  %v5951_v27 = vld [vmem:[#allocation27_spill] sm:$0xff] }
 0x537   :  { %2064 = vmatpush1.bf16.msra.mxu0 %v5941_v48  ;;  %2105 = vmatpush1.bf16.msra.mxu1 %v5942_v43  ;;  %v5952_v48 = vld [vmem:[#allocation28_spill] sm:$0xff]  ;;  %v5953_v43 = vld [vmem:[#allocation29_spill] sm:$0xff] }
 0x538   :  { %2065 = vmatprep.subr.bf16.mxu0 %v5943_v24  ;;  %2106 = vmatprep.subr.bf16.mxu1 %v5944_v19  ;;  %v5954_v24 = vld [vmem:[#allocation30_spill] sm:$0xff]  ;;  %v5955_v19 = vld [vmem:[#allocation31_spill] sm:$0xff] }
 0x53b   :  { %2066 = vmatpush1.bf16.msra.mxu0 %v5945_v63  ;;  %2107 = vmatpush1.bf16.msra.mxu1 %v5946_v2  ;;  %v5956_v63 = vld [vmem:[#allocation32_spill] sm:$0xff]  ;;  %v5957_v2 = vld [vmem:[#allocation33_spill] sm:$0xff] }
 0x53c   :  { %2067 = vmatprep.subr.bf16.mxu0 %v5947_v3  ;;  %2108 = vmatprep.subr.bf16.mxu1 %v5948_v6  ;;  %v5958_v3 = vld [vmem:[#allocation34_spill] sm:$0xff]  ;;  %v5959_v6 = vld [vmem:[#allocation35_spill] sm:$0xff] }
 0x53f   :  { %2068 = vmatpush1.bf16.msra.mxu0 %v5949_v22  ;;  %2109 = vmatpush1.bf16.msra.mxu1 %v5950_v59  ;;  %v5960_v22 = vld [vmem:[#allocation36_spill] sm:$0xff]  ;;  %v5961_v59 = vld [vmem:[#allocation37_spill] sm:$0xff] }
 0x540   :  { %2069 = vmatprep.subr.bf16.mxu0 %v5951_v27  ;;  %2110 = vmatprep.subr.bf16.mxu1 %v5952_v48  ;;  %v5962_v27 = vld [vmem:[#allocation38_spill] sm:$0xff]  ;;  %v5963_v48 = vld [vmem:[#allocation39_spill] sm:$0xff] }
 0x543   :  { %2070 = vmatpush1.bf16.msra.mxu0 %v5953_v43  ;;  %2111 = vmatpush1.bf16.msra.mxu1 %v5954_v24  ;;  %v5964_v43 = vld [vmem:[#allocation40_spill] sm:$0xff]  ;;  %v5965_v24 = vld [vmem:[#allocation41_spill] sm:$0xff] }
 0x544   :  { %2071 = vmatprep.subr.bf16.mxu0 %v5955_v19  ;;  %2112 = vmatprep.subr.bf16.mxu1 %v5956_v63  ;;  %v5966_v19 = vld [vmem:[#allocation42_spill] sm:$0xff]  ;;  %v5967_v63 = vld [vmem:[#allocation43_spill] sm:$0xff] }
 0x547   :  { %2072 = vmatpush1.bf16.msra.mxu0 %v5957_v2  ;;  %2113 = vmatpush1.bf16.msra.mxu1 %v5958_v3  ;;  %v5968_v2 = vld [vmem:[#allocation44_spill] sm:$0xff]  ;;  %v5969_v3 = vld [vmem:[#allocation45_spill] sm:$0xff] }
 0x548   :  { %2073 = vmatprep.subr.bf16.mxu0 %v5959_v6  ;;  %2114 = vmatprep.subr.bf16.mxu1 %v5960_v22  ;;  %v5970_v6 = vld [vmem:[#allocation46_spill] sm:$0xff]  ;;  %v5971_v22 = vld [vmem:[#allocation47_spill] sm:$0xff] }
 0x54b   :  { %2074 = vmatpush1.bf16.msra.mxu0 %v5961_v59  ;;  %2115 = vmatpush1.bf16.msra.mxu1 %v5962_v27  ;;  %v5972_v59 = vld [vmem:[#allocation48_spill] sm:$0xff]  ;;  %v5973_v27 = vld [vmem:[#allocation49_spill] sm:$0xff] }
 0x54c   :  { %2075 = vmatprep.subr.bf16.mxu0 %v5963_v48  ;;  %2116 = vmatprep.subr.bf16.mxu1 %v5964_v43  ;;  %v5974_v48 = vld [vmem:[#allocation50_spill] sm:$0xff]  ;;  %v5975_v43 = vld [vmem:[#allocation51_spill] sm:$0xff] }
 0x54f   :  { %2076 = vmatpush1.bf16.msra.mxu0 %v5965_v24  ;;  %2117 = vmatpush1.bf16.msra.mxu1 %v5966_v19  ;;  %v5976_v24 = vld [vmem:[#allocation52_spill] sm:$0xff]  ;;  %v5977_v19 = vld [vmem:[#allocation53_spill] sm:$0xff] }
 0x550   :  { %2077 = vmatprep.subr.bf16.mxu0 %v5967_v63  ;;  %2118 = vmatprep.subr.bf16.mxu1 %v5968_v2  ;;  %v5978_v63 = vld [vmem:[#allocation54_spill] sm:$0xff]  ;;  %v5979_v2 = vld [vmem:[#allocation55_spill] sm:$0xff] }
 0x553   :  { %2078 = vmatpush1.bf16.msra.mxu0 %v5969_v3  ;;  %2119 = vmatpush1.bf16.msra.mxu1 %v5970_v6  ;;  %v5980_v3 = vld [vmem:[#allocation56_spill] sm:$0xff]  ;;  %v5981_v6 = vld [vmem:[#allocation57_spill] sm:$0xff] }
 0x554   :  { %2079 = vmatprep.subr.bf16.mxu0 %v5971_v22  ;;  %2120 = vmatprep.subr.bf16.mxu1 %v5972_v59  ;;  %v5982_v22 = vld [vmem:[#allocation58_spill] sm:$0xff]  ;;  %v5983_v59 = vld [vmem:[#allocation59_spill] sm:$0xff] }
 0x557   :  { %2080 = vmatpush1.bf16.msra.mxu0 %v5973_v27  ;;  %2121 = vmatpush1.bf16.msra.mxu1 %v5974_v48  ;;  %v5984_v27 = vld [vmem:[#allocation61_spill] sm:$0xff]  ;;  %v5985_v48 = vld [vmem:[#allocation60_spill] sm:$0xff] }
 0x558   :  { %2081 = vmatprep.subr.bf16.mxu0 %v5975_v43  ;;  %2122 = vmatprep.subr.bf16.mxu1 %v5976_v24  ;;  %v5986_v43 = vld [vmem:[#allocation62_spill] sm:$0xff]  ;;  %v5987_v24 = vld [vmem:[#allocation63_spill] sm:$0xff] }
 0x55b   :  { %2082 = vmatpush1.bf16.msra.mxu0 %v5977_v19  ;;  %2123 = vmatpush1.bf16.msra.mxu1 %v5978_v63  ;;  %v5988_v19 = vld [vmem:[#allocation64_spill] sm:$0xff]  ;;  %v5989_v63 = vld [vmem:[#allocation65_spill] sm:$0xff] }
 0x55c   :  { %2083 = vmatprep.subr.bf16.mxu0 %v5979_v2  ;;  %2124 = vmatprep.subr.bf16.mxu1 %v5980_v3  ;;  %v5990_v2 = vld [vmem:[#allocation66_spill] sm:$0xff]  ;;  %v5991_v3 = vld [vmem:[#allocation67_spill] sm:$0xff] }
 0x55f   :  { %2084 = vmatpush1.bf16.msra.mxu0 %v5981_v6  ;;  %2125 = vmatpush1.bf16.msra.mxu1 %v5982_v22  ;;  %v5992_v6 = vld [vmem:[#allocation68_spill] sm:$0xff]  ;;  %v5993_v22 = vld [vmem:[#allocation69_spill] sm:$0xff] }
 0x560   :  { %2085 = vmatprep.subr.bf16.mxu0 %v5983_v59  ;;  %2126 = vmatprep.subr.bf16.mxu1 %v5984_v27  ;;  %v5994_v59 = vld [vmem:[#allocation70_spill] sm:$0xff]  ;;  %v5995_v27 = vld [vmem:[#allocation71_spill] sm:$0xff] }
 0x563   :  { %2086 = vmatpush1.bf16.msra.mxu0 %v5985_v48  ;;  %2127 = vmatpush1.bf16.msra.mxu1 %v5986_v43  ;;  %v5996_v48 = vld [vmem:[#allocation72_spill] sm:$0xff]  ;;  %v5997_v43 = vld [vmem:[#allocation75_spill] sm:$0xff] }
 0x564   :  { %2087 = vmatprep.subr.bf16.mxu0 %v5987_v24  ;;  %2128 = vmatprep.subr.bf16.mxu1 %v5988_v19  ;;  %v5998_v24 = vld [vmem:[#allocation152_spill] sm:$0xff]  ;;  %v5999_v19 = vld [vmem:[#allocation79_spill] sm:$0xff] }
 0x565   :  { %v194_v33 = vadd.f32 %v5998_v24, %v5997_v43 }
 0x567   :  { %2088 = vmatpush1.bf16.msra.mxu0 %v5989_v63  ;;  %2129 = vmatpush1.bf16.msra.mxu1 %v5990_v2  ;;  %v267_v63 = vadd.f32 %v6000_v9, %v5999_v19  ;;  %v6002_v2 = vld [vmem:[#allocation153_spill] sm:$0xff] }
 0x568   :  { %2089 = vmatprep.subr.bf16.mxu0 %v5991_v3  ;;  %2130 = vmatprep.subr.bf16.mxu1 %v5992_v6  ;;  %v196_v21 = vadd.f32 %v6002_v2, %v6001_v57  ;;  %v6003_v3 = vld [vmem:[#allocation156_spill] sm:$0xff] }
 0x569   :  { %v269_v6 = vadd.f32 %v6003_v3, %v5698_v17 }
 0x56b   :  { %2090 = vmatpush1.bf16.msra.mxu0 %v5993_v22  ;;  %2131 = vmatpush1.bf16.msra.mxu1 %v5994_v59 }
 0x56c   :  { %2141 = vmatprep.subr.bf16.mxu0 %v5995_v27  ;;  %2182 = vmatprep.subr.bf16.mxu1 %v5996_v48 }
 0x5c1   :  { %v1864_v7 = vpop.f32.mrb[40].mxu0  ;;  %v1905_v22 = vpop.f32.mrb[40].mxu1 }
 0x5c2   :  { %v2029_v55 = vadd.f32 %v1864_v7, %v194_v33  ;;  %v2031_v59 = vadd.f32 %v1905_v22, %v267_v63  ;;  %v1866_v36 = vpop.f32.mrb[41].mxu0  ;;  %v1907_v27 = vpop.f32.mrb[41].mxu1 }
 0x5c3   :  { %v2030_v50 = vadd.f32 %v1866_v36, %v196_v21  ;;  %v2032_v48 = vadd.f32 %v1907_v27, %v269_v6  ;;  %v1868_v35 = vpop.f32.mrb[42].mxu0  ;;  %v1909_v40 = vpop.f32.mrb[42].mxu1 }
 0x5c4   :  { %v3133_v24 = vmul.f32 -1.442695, %v2029_v55  ;;  %v1869_v43 = vpop.f32.mrb[43].mxu0  ;;  %v1910_v0 = vpop.f32.mrb[43].mxu1 }
 0x5c5   :  { %v3134_v9 = vmul.f32 -1.442695, %v2030_v50 }
 0x5c6   :  { %3363 = vpow2.f32 %v3133_v24 }
 0x5c7   :  { %3365 = vpow2.f32 %v3134_v9  ;;  %v3135_v9 = vmul.f32 -1.442695, %v2031_v59 }
 0x5c8   :  { %3367 = vtanh.f32 %v2032_v48 }
 0x5d0   :  { %v3364_v2 = vpop.eup %3363 }
 0x5d1   :  { %v2042_v57 = vadd.f32 1.0, %v3364_v2  ;;  %v3366_v19 = vpop.eup %3365 }
 0x5d2   :  { %v2043_v3 = vadd.f32 1.0, %v3366_v19  ;;  %v3368_v22 = vpop.eup %3367 }
 0x5d3   :  { %3369 = vrcp.f32 %v2042_v57 }
 0x5d4   :  { %3371 = vrcp.f32 %v2043_v3 }
 0x5dd   :  { %v3370_v7 = vpop.eup %3369 }
 0x5de   :  { %v2053_v63 = vmul.f32 %v3370_v7, %v3368_v22  ;;  %v3372_v36 = vpop.eup %3371 }
 0x5df   :  { %v2052_v6 = vmul.f32 %v3372_v36, %v4520_v25 }
 0x5e1   :  { %v4674_v21 = vadd.f32 %v2053_v63, %v2052_v6 }
 0x601   :  { %v1946_v35 = vpop.f32.mrb[44].mxu0  ;;  %v1987_v55 = vpop.f32.mrb[44].mxu1 }
 0x602   :  { %v1994_v50 = vadd.f32 %v1946_v35, %v5804_v34  ;;  %v1948_v0 = vpop.f32.mrb[45].mxu0  ;;  %v1989_v40 = vpop.f32.mrb[45].mxu1  ;;  %v1996_v25 = vadd.f32 %v1987_v55, %v4211_v16 }
 0x603   :  { %v1995_v27 = vadd.f32 %v1948_v0, %v4205_v1  ;;  %v1950_v48 = vpop.f32.mrb[46].mxu0  ;;  %v1991_v57 = vpop.f32.mrb[46].mxu1  ;;  %v1997_v2 = vadd.f32 %v1989_v40, %v4215_v41 }
 0x604   :  { %v3130_v33 = vmul.f32 -1.442695, %v1994_v50  ;;  %v1951_v43 = vpop.f32.mrb[47].mxu0  ;;  %v1992_v19 = vpop.f32.mrb[47].mxu1  ;;  %v3132_v3 = vmul.f32 -1.442695, %v1996_v25 }
 0x605   :  { %v3131_v24 = vmul.f32 -1.442695, %v1995_v27 }
 0x606   :  { %3373 = vpow2.f32 %v3130_v33 }
 0x607   :  { %3375 = vpow2.f32 %v3131_v24 }
 0x608   :  { %3377 = vpow2.f32 %v3135_v9 }
 0x609   :  { %3379 = vtanh.f32 %v1997_v2 }
 0x60a   :  { %3381 = vpow2.f32 %v3132_v3 }
 0x610   :  { %v3374_v22 = vpop.eup %3373 }
 0x611   :  { %v2007_v7 = vadd.f32 1.0, %v3374_v22  ;;  %v3376_v63 = vpop.eup %3375  ;;  %v6005_v22 = vld [vmem:[#allocation118_spill] sm:$0xff] }
 0x612   :  { %v2008_v36 = vadd.f32 1.0, %v3376_v63  ;;  %v3378_v6 = vpop.eup %3377  ;;  %v6007_v63 = vld [vmem:[#allocation120_spill] sm:$0xff] }
 0x613   :  { %3383 = vrcp.f32 %v2007_v7  ;;  %v3380_v35 = vpop.eup %3379  ;;  %v2044_v27 = vadd.f32 1.0, %v3378_v6  ;;  %v6006_v7 = vld [vmem:[#allocation119_spill] sm:$0xff]  ;;  %v6009_v6 = vld [vmem:[#allocation122_spill] sm:$0xff] }
 0x614   :  { %3385 = vrcp.f32 %v2008_v36  ;;  %v3382_v50 = vpop.eup %3381  ;;  %v6008_v36 = vld [vmem:[#allocation121_spill] sm:$0xff] }
 0x615   :  { %v2009_v59 = vadd.f32 1.0, %v3382_v50  ;;  %3387 = vtanh.f32 %v4674_v21  ;;  %v6011_v50 = vld [vmem:[#allocation124_spill] sm:$0xff] }
 0x616   :  { %3389 = vrcp.f32 %v2044_v27  ;;  %v6013_v27 = vld [vmem:[#allocation126_spill] sm:$0xff] }
 0x617   :  { %3391 = vrcp.f32 %v2009_v59  ;;  %v6016_v59 = vld [vmem:[#allocation129_spill] sm:$0xff] }
 0x61d   :  { %v3384_v0 = vpop.eup %3383 }
 0x61e   :  { %v2018_v48 = vmul.f32 %v3384_v0, %v3380_v35  ;;  %v3386_v55 = vpop.eup %3385  ;;  %v6010_v35 = vld [vmem:[#allocation123_spill] sm:$0xff]  ;;  %v6012_v0 = vld [vmem:[#allocation125_spill] sm:$0xff] }
 0x61f   :  { %v2017_v40 = vmul.f32 %v3386_v55, %v4528_v11  ;;  %v3388_v33 = vpop.eup %3387  ;;  %v6004_v11 = vld [vmem:[#allocation117_spill] sm:$0xff]  ;;  %v6015_v55 = vld [vmem:[#allocation128_spill] sm:$0xff] }
 0x620   :  { %v3390_v43 = vpop.eup %3389 }
 0x621   :  { %v4682_v57 = vadd.f32 %v2018_v48, %v2017_v40  ;;  %v3392_v19 = vpop.eup %3391  ;;  %v2056_v25 = vmul.f32 %v3390_v43, %v3388_v33  ;;  %v6014_v48 = vld [vmem:[#allocation127_spill] sm:$0xff]  ;;  %v6017_v40 = vld [vmem:[#allocation130_spill] sm:$0xff]  ;;  %v6019_v43 = vld [vmem:[#allocation132_spill] sm:$0xff] }
 0x622   :  { %v6018_v33 = vld [vmem:[#allocation131_spill] sm:$0xff] }
 0x623   :  { %3393 = vtanh.f32 %v4682_v57  ;;  %v4685_v3 = vpack.c.bf16 %v2056_v25, %v2056_v25  ;;  %v6022_v25 = vld [vmem:[#allocation135_spill] sm:$0xff] }
 0x62d   :  { %v3394_v24 = vpop.eup %3393 }
 0x62e   :  { %v2021_v9 = vmul.f32 %v3394_v24, %v3392_v19  ;;  %v6020_v19 = vld [vmem:[#allocation133_spill] sm:$0xff]  ;;  %v6021_v24 = vld [vmem:[#allocation134_spill] sm:$0xff] }
 0x630   :  { %v2058_v2 = vpack.c.bf16 %v2021_v9, %v2021_v9  ;;  %v6023_v9 = vld [vmem:[#allocation136_spill] sm:$0xff] }
 0x632   :  { %2091 = vmatprep.mubr.bf16.mxu0 %v2058_v2  ;;  %2132 = vmatprep.mubr.bf16.mxu1 %v2058_v2 }
 0x633   :  { %2092 = vmatmul.mubr.bf16.vlgmr.msra.gmra.mrb[48].mxu0 %v4685_v3  ;;  %2133 = vmatmul.mubr.bf16.vlgmr.msra.gmra.mrb[48].mxu1 %v4685_v3 }
 0x634   :  { %2142 = vmatpush1.bf16.msra.mxu0 %v3837_v49  ;;  %2183 = vmatpush1.bf16.msra.mxu1 %v5710_v53 }
 0x635   :  { %2173 = vmatprep.mubr.bf16.mxu0 %v2058_v2  ;;  %2214 = vmatprep.mubr.bf16.mxu1 %v2058_v2  ;;  %v6024_v2 = vld [vmem:[#allocation137_spill] sm:$0xff] }
 0x636   :  { %2143 = vmatprep.subr.bf16.mxu0 %v5711_v15  ;;  %2184 = vmatprep.subr.bf16.mxu1 %v5712_v18 }
 0x638   :  { %2144 = vmatpush1.bf16.msra.mxu0 %v5713_v8  ;;  %2185 = vmatpush1.bf16.msra.mxu1 %v5714_v20 }
 0x639   :  { %2145 = vmatprep.subr.bf16.mxu0 %v5805_v61  ;;  %2186 = vmatprep.subr.bf16.mxu1 %v5806_v62 }
 0x63c   :  { %2146 = vmatpush1.bf16.msra.mxu0 %v5807_v38  ;;  %2187 = vmatpush1.bf16.msra.mxu1 %v5808_v37 }
 0x63d   :  { %2147 = vmatprep.subr.bf16.mxu0 %v5809_v39  ;;  %2188 = vmatprep.subr.bf16.mxu1 %v5810_v44 }
 0x640   :  { %2148 = vmatpush1.bf16.msra.mxu0 %v5811_v52  ;;  %2189 = vmatpush1.bf16.msra.mxu1 %v5812_v5 }
 0x641   :  { %2149 = vmatprep.subr.bf16.mxu0 %v5813_v54  ;;  %2190 = vmatprep.subr.bf16.mxu1 %v5904_v60 }
 0x644   :  { %2150 = vmatpush1.bf16.msra.mxu0 %v5905_v23  ;;  %2191 = vmatpush1.bf16.msra.mxu1 %v5906_v31 }
 0x645   :  { %2151 = vmatprep.subr.bf16.mxu0 %v5907_v26  ;;  %2192 = vmatprep.subr.bf16.mxu1 %v5908_v58 }
 0x648   :  { %2152 = vmatpush1.bf16.msra.mxu0 %v5909_v10  ;;  %2193 = vmatpush1.bf16.msra.mxu1 %v5910_v30 }
 0x649   :  { %2153 = vmatprep.subr.bf16.mxu0 %v5911_v42  ;;  %2194 = vmatprep.subr.bf16.mxu1 %v5912_v51 }
 0x64c   :  { %2154 = vmatpush1.bf16.msra.mxu0 %v5913_v4  ;;  %2195 = vmatpush1.bf16.msra.mxu1 %v5914_v14 }
 0x64d   :  { %2155 = vmatprep.subr.bf16.mxu0 %v5825_v46  ;;  %2196 = vmatprep.subr.bf16.mxu1 %v5826_v32 }
 0x650   :  { %2156 = vmatpush1.bf16.msra.mxu0 %v5827_v28  ;;  %2197 = vmatpush1.bf16.msra.mxu1 %v5915_v12 }
 0x651   :  { %2157 = vmatprep.subr.bf16.mxu0 %v5916_v29  ;;  %2198 = vmatprep.subr.bf16.mxu1 %v5830_v56 }
 0x654   :  { %2158 = vmatpush1.bf16.msra.mxu0 %v5831_v47  ;;  %2199 = vmatpush1.bf16.msra.mxu1 %v5917_v45 }
 0x655   :  { %2159 = vmatprep.subr.bf16.mxu0 %v5918_v13  ;;  %2200 = vmatprep.subr.bf16.mxu1 %v6004_v11 }
 0x658   :  { %2160 = vmatpush1.bf16.msra.mxu0 %v6005_v22  ;;  %2201 = vmatpush1.bf16.msra.mxu1 %v6006_v7 }
 0x659   :  { %2161 = vmatprep.subr.bf16.mxu0 %v6007_v63  ;;  %2202 = vmatprep.subr.bf16.mxu1 %v6008_v36 }
 0x65c   :  { %2162 = vmatpush1.bf16.msra.mxu0 %v6009_v6  ;;  %2203 = vmatpush1.bf16.msra.mxu1 %v6010_v35 }
 0x65d   :  { %2163 = vmatprep.subr.bf16.mxu0 %v6011_v50  ;;  %2204 = vmatprep.subr.bf16.mxu1 %v6012_v0  ;;  %v6101_v0 = vld [vmem:[#allocation76_spill] sm:$0xff] }
 0x660   :  { %2164 = vmatpush1.bf16.msra.mxu0 %v6013_v27  ;;  %2205 = vmatpush1.bf16.msra.mxu1 %v6014_v48  ;;  %v6025_v48 = vld [vmem:[#allocation138_spill] sm:$0xff] }
 0x661   :  { %2165 = vmatprep.subr.bf16.mxu0 %v6015_v55  ;;  %2206 = vmatprep.subr.bf16.mxu1 %v6016_v59  ;;  %v6026_v55 = vld [vmem:[#allocation139_spill] sm:$0xff]  ;;  %v6027_v59 = vld [vmem:[#allocation140_spill] sm:$0xff]  ;;  %v6100_v27 = vld [vmem:[#allocation158_spill] sm:$0xff] }
 0x664   :  { %2166 = vmatpush1.bf16.msra.mxu0 %v6017_v40  ;;  %2207 = vmatpush1.bf16.msra.mxu1 %v6018_v33  ;;  %v6028_v40 = vld [vmem:[#allocation141_spill] sm:$0xff]  ;;  %v6029_v33 = vld [vmem:[#allocation143_spill] sm:$0xff] }
 0x665   :  { %2167 = vmatprep.subr.bf16.mxu0 %v6019_v43  ;;  %2208 = vmatprep.subr.bf16.mxu1 %v6020_v19  ;;  %v6030_v43 = vld [vmem:[#allocation144_spill] sm:$0xff]  ;;  %v6031_v19 = vld [vmem:[#allocation7_spill] sm:$0xff] }
 0x668   :  { %2168 = vmatpush1.bf16.msra.mxu0 %v6021_v24  ;;  %2209 = vmatpush1.bf16.msra.mxu1 %v6022_v25  ;;  %v6032_v24 = vld [vmem:[#allocation9_spill] sm:$0xff] }
 0x669   :  { %2169 = vmatprep.subr.bf16.mxu0 %v6023_v9  ;;  %2210 = vmatprep.subr.bf16.mxu1 %v6024_v2  ;;  %v6033_v2 = vld [vmem:[#allocation8_spill] sm:$0xff]  ;;  %v6042_v9 = vld [vmem:[#allocation19_spill] sm:$0xff] }
 0x66c   :  { %2170 = vmatpush1.bf16.msra.mxu0 %v6025_v48  ;;  %2211 = vmatpush1.bf16.msra.mxu1 %v6026_v55  ;;  %v6034_v48 = vld [vmem:[#allocation11_spill] sm:$0xff]  ;;  %v6035_v55 = vld [vmem:[#allocation10_spill] sm:$0xff] }
 0x66d   :  { %2171 = vmatprep.subr.bf16.mxu0 %v6027_v59  ;;  %2212 = vmatprep.subr.bf16.mxu1 %v6028_v40  ;;  %v6036_v59 = vld [vmem:[#allocation12_spill] sm:$0xff]  ;;  %v6037_v40 = vld [vmem:[#allocation13_spill] sm:$0xff] }
 0x670   :  { %2172 = vmatpush1.bf16.msra.mxu0 %v6029_v33  ;;  %2213 = vmatpush1.bf16.msra.mxu1 %v6030_v43  ;;  %v6038_v33 = vld [vmem:[#allocation15_spill] sm:$0xff]  ;;  %v6039_v43 = vld [vmem:[#allocation14_spill] sm:$0xff] }
 0x671   :  { %2288 = vmatprep.subr.bf16.mxu0 %v6031_v19  ;;  %2329 = vmatprep.subr.bf16.mxu1 %v6032_v24  ;;  %v6040_v19 = vld [vmem:[#allocation16_spill] sm:$0xff]  ;;  %v6041_v24 = vld [vmem:[#allocation17_spill] sm:$0xff] }
 0x673   :  { %2174 = vmatmul.mubr.bf16.vlgmr.msra.gmra.mrb[52].mxu0 %v4685_v3  ;;  %2215 = vmatmul.mubr.bf16.vlgmr.msra.gmra.mrb[52].mxu1 %v4685_v3  ;;  %v6043_v3 = vld [vmem:[#allocation18_spill] sm:$0xff] }
 0x674   :  { %2289 = vmatpush1.bf16.msra.mxu0 %v6033_v2  ;;  %2330 = vmatpush1.bf16.msra.mxu1 %v6034_v48  ;;  %v6044_v2 = vld [vmem:[#allocation20_spill] sm:$0xff]  ;;  %v6045_v48 = vld [vmem:[#allocation21_spill] sm:$0xff] }
 0x675   :  { %2290 = vmatprep.subr.bf16.mxu0 %v6035_v55  ;;  %2331 = vmatprep.subr.bf16.mxu1 %v6036_v59  ;;  %v6046_v55 = vld [vmem:[#allocation22_spill] sm:$0xff]  ;;  %v6047_v59 = vld [vmem:[#allocation23_spill] sm:$0xff] }
 0x678   :  { %2291 = vmatpush1.bf16.msra.mxu0 %v6037_v40  ;;  %2332 = vmatpush1.bf16.msra.mxu1 %v6038_v33  ;;  %v6048_v40 = vld [vmem:[#allocation24_spill] sm:$0xff]  ;;  %v6049_v33 = vld [vmem:[#allocation25_spill] sm:$0xff] }
 0x679   :  { %2292 = vmatprep.subr.bf16.mxu0 %v6039_v43  ;;  %2333 = vmatprep.subr.bf16.mxu1 %v6040_v19  ;;  %v6050_v43 = vld [vmem:[#allocation26_spill] sm:$0xff]  ;;  %v6051_v19 = vld [vmem:[#allocation27_spill] sm:$0xff] }
 0x67c   :  { %2293 = vmatpush1.bf16.msra.mxu0 %v6041_v24  ;;  %2334 = vmatpush1.bf16.msra.mxu1 %v6042_v9  ;;  %v6052_v24 = vld [vmem:[#allocation28_spill] sm:$0xff]  ;;  %v6053_v9 = vld [vmem:[#allocation29_spill] sm:$0xff] }
 0x67d   :  { %2294 = vmatprep.subr.bf16.mxu0 %v6043_v3  ;;  %2335 = vmatprep.subr.bf16.mxu1 %v6044_v2  ;;  %v6054_v3 = vld [vmem:[#allocation30_spill] sm:$0xff]  ;;  %v6055_v2 = vld [vmem:[#allocation31_spill] sm:$0xff] }
 0x680   :  { %2295 = vmatpush1.bf16.msra.mxu0 %v6045_v48  ;;  %2336 = vmatpush1.bf16.msra.mxu1 %v6046_v55  ;;  %v6056_v48 = vld [vmem:[#allocation32_spill] sm:$0xff]  ;;  %v6057_v55 = vld [vmem:[#allocation33_spill] sm:$0xff] }
 0x681   :  { %2296 = vmatprep.subr.bf16.mxu0 %v6047_v59  ;;  %2337 = vmatprep.subr.bf16.mxu1 %v6048_v40  ;;  %v6058_v59 = vld [vmem:[#allocation34_spill] sm:$0xff]  ;;  %v6059_v40 = vld [vmem:[#allocation35_spill] sm:$0xff] }
 0x684   :  { %2297 = vmatpush1.bf16.msra.mxu0 %v6049_v33  ;;  %2338 = vmatpush1.bf16.msra.mxu1 %v6050_v43  ;;  %v6060_v33 = vld [vmem:[#allocation36_spill] sm:$0xff]  ;;  %v6061_v43 = vld [vmem:[#allocation37_spill] sm:$0xff] }
 0x685   :  { %2298 = vmatprep.subr.bf16.mxu0 %v6051_v19  ;;  %2339 = vmatprep.subr.bf16.mxu1 %v6052_v24  ;;  %v6062_v19 = vld [vmem:[#allocation38_spill] sm:$0xff]  ;;  %v6063_v24 = vld [vmem:[#allocation39_spill] sm:$0xff] }
 0x688   :  { %2299 = vmatpush1.bf16.msra.mxu0 %v6053_v9  ;;  %2340 = vmatpush1.bf16.msra.mxu1 %v6054_v3  ;;  %v6064_v9 = vld [vmem:[#allocation40_spill] sm:$0xff]  ;;  %v6065_v3 = vld [vmem:[#allocation41_spill] sm:$0xff] }
 0x689   :  { %2300 = vmatprep.subr.bf16.mxu0 %v6055_v2  ;;  %2341 = vmatprep.subr.bf16.mxu1 %v6056_v48  ;;  %v6066_v2 = vld [vmem:[#allocation42_spill] sm:$0xff]  ;;  %v6067_v48 = vld [vmem:[#allocation43_spill] sm:$0xff] }
 0x68c   :  { %2301 = vmatpush1.bf16.msra.mxu0 %v6057_v55  ;;  %2342 = vmatpush1.bf16.msra.mxu1 %v6058_v59  ;;  %v6068_v55 = vld [vmem:[#allocation44_spill] sm:$0xff]  ;;  %v6069_v59 = vld [vmem:[#allocation45_spill] sm:$0xff] }
 0x68d   :  { %2302 = vmatprep.subr.bf16.mxu0 %v6059_v40  ;;  %2343 = vmatprep.subr.bf16.mxu1 %v6060_v33  ;;  %v6070_v40 = vld [vmem:[#allocation46_spill] sm:$0xff]  ;;  %v6071_v33 = vld [vmem:[#allocation47_spill] sm:$0xff] }
 0x690   :  { %2303 = vmatpush1.bf16.msra.mxu0 %v6061_v43  ;;  %2344 = vmatpush1.bf16.msra.mxu1 %v6062_v19  ;;  %v6072_v43 = vld [vmem:[#allocation48_spill] sm:$0xff]  ;;  %v6073_v19 = vld [vmem:[#allocation49_spill] sm:$0xff] }
 0x691   :  { %2304 = vmatprep.subr.bf16.mxu0 %v6063_v24  ;;  %2345 = vmatprep.subr.bf16.mxu1 %v6064_v9  ;;  %v6074_v24 = vld [vmem:[#allocation50_spill] sm:$0xff]  ;;  %v6075_v9 = vld [vmem:[#allocation51_spill] sm:$0xff] }
 0x694   :  { %2305 = vmatpush1.bf16.msra.mxu0 %v6065_v3  ;;  %2346 = vmatpush1.bf16.msra.mxu1 %v6066_v2  ;;  %v6076_v3 = vld [vmem:[#allocation52_spill] sm:$0xff]  ;;  %v6077_v2 = vld [vmem:[#allocation53_spill] sm:$0xff] }
 0x695   :  { %2306 = vmatprep.subr.bf16.mxu0 %v6067_v48  ;;  %2347 = vmatprep.subr.bf16.mxu1 %v6068_v55  ;;  %v6078_v48 = vld [vmem:[#allocation54_spill] sm:$0xff]  ;;  %v6079_v55 = vld [vmem:[#allocation55_spill] sm:$0xff] }
 0x698   :  { %2307 = vmatpush1.bf16.msra.mxu0 %v6069_v59  ;;  %2348 = vmatpush1.bf16.msra.mxu1 %v6070_v40  ;;  %v6080_v59 = vld [vmem:[#allocation56_spill] sm:$0xff]  ;;  %v6081_v40 = vld [vmem:[#allocation57_spill] sm:$0xff] }
 0x699   :  { %2308 = vmatprep.subr.bf16.mxu0 %v6071_v33  ;;  %2349 = vmatprep.subr.bf16.mxu1 %v6072_v43  ;;  %v6082_v33 = vld [vmem:[#allocation58_spill] sm:$0xff]  ;;  %v6083_v43 = vld [vmem:[#allocation59_spill] sm:$0xff] }
 0x69c   :  { %2309 = vmatpush1.bf16.msra.mxu0 %v6073_v19  ;;  %2350 = vmatpush1.bf16.msra.mxu1 %v6074_v24  ;;  %v6084_v19 = vld [vmem:[#allocation61_spill] sm:$0xff]  ;;  %v6085_v24 = vld [vmem:[#allocation60_spill] sm:$0xff] }
 0x69d   :  { %2310 = vmatprep.subr.bf16.mxu0 %v6075_v9  ;;  %2351 = vmatprep.subr.bf16.mxu1 %v6076_v3  ;;  %v6086_v9 = vld [vmem:[#allocation62_spill] sm:$0xff]  ;;  %v6087_v3 = vld [vmem:[#allocation63_spill] sm:$0xff] }
 0x6a0   :  { %2311 = vmatpush1.bf16.msra.mxu0 %v6077_v2  ;;  %2352 = vmatpush1.bf16.msra.mxu1 %v6078_v48  ;;  %v6088_v2 = vld [vmem:[#allocation64_spill] sm:$0xff]  ;;  %v6089_v48 = vld [vmem:[#allocation65_spill] sm:$0xff] }
 0x6a1   :  { %2312 = vmatprep.subr.bf16.mxu0 %v6079_v55  ;;  %2353 = vmatprep.subr.bf16.mxu1 %v6080_v59  ;;  %v6090_v55 = vld [vmem:[#allocation66_spill] sm:$0xff]  ;;  %v6091_v59 = vld [vmem:[#allocation67_spill] sm:$0xff] }
 0x6a4   :  { %2313 = vmatpush1.bf16.msra.mxu0 %v6081_v40  ;;  %2354 = vmatpush1.bf16.msra.mxu1 %v6082_v33  ;;  %v6092_v40 = vld [vmem:[#allocation68_spill] sm:$0xff]  ;;  %v6093_v33 = vld [vmem:[#allocation69_spill] sm:$0xff] }
 0x6a5   :  { %2314 = vmatprep.subr.bf16.mxu0 %v6083_v43  ;;  %2355 = vmatprep.subr.bf16.mxu1 %v6084_v19  ;;  %v6094_v43 = vld [vmem:[#allocation70_spill] sm:$0xff]  ;;  %v6095_v19 = vld [vmem:[#allocation71_spill] sm:$0xff] }
 0x6a8   :  { %2315 = vmatpush1.bf16.msra.mxu0 %v6085_v24  ;;  %2356 = vmatpush1.bf16.msra.mxu1 %v6086_v9  ;;  %v6096_v24 = vld [vmem:[#allocation72_spill] sm:$0xff]  ;;  %v6097_v9 = vld [vmem:[#allocation75_spill] sm:$0xff] }
 0x6a9   :  { %2316 = vmatprep.subr.bf16.mxu0 %v6087_v3  ;;  %2357 = vmatprep.subr.bf16.mxu1 %v6088_v2  ;;  %v6098_v3 = vld [vmem:[#allocation155_spill] sm:$0xff] }
 0x6aa   :  { %v198_v25 = vadd.f32 %v6098_v3, %v6097_v9  ;;  %v6099_v2 = vld [vmem:[#allocation79_spill] sm:$0xff] }
 0x6ac   :  { %2317 = vmatpush1.bf16.msra.mxu0 %v6089_v48  ;;  %2358 = vmatpush1.bf16.msra.mxu1 %v6090_v55  ;;  %v271_v48 = vadd.f32 %v6100_v27, %v6099_v2  ;;  %v6102_v55 = vld [vmem:[#allocation157_spill] sm:$0xff] }
 0x6ad   :  { %2318 = vmatprep.subr.bf16.mxu0 %v6091_v59  ;;  %2359 = vmatprep.subr.bf16.mxu1 %v6092_v40  ;;  %v200_v50 = vadd.f32 %v6102_v55, %v6101_v0  ;;  %v6103_v59 = vld [vmem:[#allocation159_spill] sm:$0xff] }
 0x6ae   :  { %v273_v40 = vadd.f32 %v6103_v59, %v5698_v17 }
 0x6b0   :  { %2319 = vmatpush1.bf16.msra.mxu0 %v6093_v33  ;;  %2360 = vmatpush1.bf16.msra.mxu1 %v6094_v43 }
 0x6b1   :  { %2370 = vmatprep.subr.bf16.mxu0 %v6095_v19  ;;  %2411 = vmatprep.subr.bf16.mxu1 %v6096_v24 }
 0x706   :  { %v2093_v35 = vpop.f32.mrb[48].mxu0  ;;  %v2134_v33 = vpop.f32.mrb[48].mxu1 }
 0x707   :  { %v2258_v6 = vadd.f32 %v2093_v35, %v198_v25  ;;  %v2260_v43 = vadd.f32 %v2134_v33, %v271_v48  ;;  %v2095_v36 = vpop.f32.mrb[49].mxu0  ;;  %v2136_v19 = vpop.f32.mrb[49].mxu1 }
 0x708   :  { %v2259_v63 = vadd.f32 %v2095_v36, %v200_v50  ;;  %v2261_v24 = vadd.f32 %v2136_v19, %v273_v40  ;;  %v2097_v7 = vpop.f32.mrb[50].mxu0  ;;  %v2138_v22 = vpop.f32.mrb[50].mxu1 }
 0x709   :  { %v3139_v3 = vmul.f32 -1.442695, %v2258_v6  ;;  %v2098_v9 = vpop.f32.mrb[51].mxu0  ;;  %v2139_v11 = vpop.f32.mrb[51].mxu1 }
 0x70a   :  { %v3140_v27 = vmul.f32 -1.442695, %v2259_v63 }
 0x70b   :  { %3395 = vpow2.f32 %v3139_v3 }
 0x70c   :  { %3397 = vpow2.f32 %v3140_v27  ;;  %v3141_v27 = vmul.f32 -1.442695, %v2260_v43 }
 0x70d   :  { %3399 = vtanh.f32 %v2261_v24 }
 0x715   :  { %v3396_v55 = vpop.eup %3395 }
 0x716   :  { %v2271_v0 = vadd.f32 1.0, %v3396_v55  ;;  %v3398_v2 = vpop.eup %3397 }
 0x717   :  { %v2272_v59 = vadd.f32 1.0, %v3398_v2  ;;  %v3400_v35 = vpop.eup %3399 }
 0x718   :  { %3401 = vrcp.f32 %v2271_v0 }
 0x719   :  { %3403 = vrcp.f32 %v2272_v59 }
 0x722   :  { %v3402_v48 = vpop.eup %3401 }
 0x723   :  { %v2282_v33 = vmul.f32 %v3402_v48, %v3400_v35  ;;  %v3404_v36 = vpop.eup %3403 }
 0x724   :  { %v2281_v7 = vmul.f32 %v3404_v36, %v4674_v21 }
 0x726   :  { %v4828_v22 = vadd.f32 %v2282_v33, %v2281_v7 }
 0x746   :  { %v2175_v6 = vpop.f32.mrb[52].mxu0  ;;  %v2216_v11 = vpop.f32.mrb[52].mxu1 }
 0x747   :  { %v2223_v63 = vadd.f32 %v2175_v6, %v5804_v34  ;;  %v2177_v50 = vpop.f32.mrb[53].mxu0  ;;  %v2218_v40 = vpop.f32.mrb[53].mxu1  ;;  %v2225_v21 = vadd.f32 %v2216_v11, %v4211_v16 }
 0x748   :  { %v2224_v19 = vadd.f32 %v2177_v50, %v4205_v1  ;;  %v2179_v24 = vpop.f32.mrb[54].mxu0  ;;  %v2220_v0 = vpop.f32.mrb[54].mxu1  ;;  %v2226_v55 = vadd.f32 %v2218_v40, %v4215_v41 }
 0x749   :  { %v3136_v25 = vmul.f32 -1.442695, %v2223_v63  ;;  %v2180_v9 = vpop.f32.mrb[55].mxu0  ;;  %v2221_v2 = vpop.f32.mrb[55].mxu1  ;;  %v3138_v59 = vmul.f32 -1.442695, %v2225_v21 }
 0x74a   :  { %v3137_v3 = vmul.f32 -1.442695, %v2224_v19 }
 0x74b   :  { %3405 = vpow2.f32 %v3136_v25 }
 0x74c   :  { %3407 = vpow2.f32 %v3137_v3 }
 0x74d   :  { %3409 = vpow2.f32 %v3141_v27 }
 0x74e   :  { %3411 = vtanh.f32 %v2226_v55 }
 0x74f   :  { %3413 = vpow2.f32 %v3138_v59 }
 0x755   :  { %v3406_v35 = vpop.eup %3405 }
 0x756   :  { %v2236_v48 = vadd.f32 1.0, %v3406_v35  ;;  %v3408_v33 = vpop.eup %3407  ;;  %v6105_v35 = vld [vmem:[#allocation118_spill] sm:$0xff] }
 0x757   :  { %v2237_v36 = vadd.f32 1.0, %v3408_v33  ;;  %v3410_v7 = vpop.eup %3409  ;;  %v6107_v33 = vld [vmem:[#allocation120_spill] sm:$0xff] }
 0x758   :  { %3415 = vrcp.f32 %v2236_v48  ;;  %v3412_v6 = vpop.eup %3411  ;;  %v2273_v19 = vadd.f32 1.0, %v3410_v7  ;;  %v6106_v48 = vld [vmem:[#allocation119_spill] sm:$0xff]  ;;  %v6109_v7 = vld [vmem:[#allocation122_spill] sm:$0xff] }
 0x759   :  { %3417 = vrcp.f32 %v2237_v36  ;;  %v3414_v63 = vpop.eup %3413  ;;  %v6108_v36 = vld [vmem:[#allocation121_spill] sm:$0xff] }
 0x75a   :  { %v2238_v43 = vadd.f32 1.0, %v3414_v63  ;;  %3419 = vtanh.f32 %v4828_v22  ;;  %v6111_v63 = vld [vmem:[#allocation124_spill] sm:$0xff] }
 0x75b   :  { %3421 = vrcp.f32 %v2273_v19  ;;  %v6113_v19 = vld [vmem:[#allocation126_spill] sm:$0xff] }
 0x75c   :  { %3423 = vrcp.f32 %v2238_v43  ;;  %v6116_v43 = vld [vmem:[#allocation129_spill] sm:$0xff] }
 0x762   :  { %v3416_v50 = vpop.eup %3415 }
 0x763   :  { %v2247_v24 = vmul.f32 %v3416_v50, %v3412_v6  ;;  %v3418_v11 = vpop.eup %3417  ;;  %v6110_v6 = vld [vmem:[#allocation123_spill] sm:$0xff]  ;;  %v6112_v50 = vld [vmem:[#allocation125_spill] sm:$0xff] }
 0x764   :  { %v2246_v40 = vmul.f32 %v3418_v11, %v4682_v57  ;;  %v3420_v25 = vpop.eup %3419  ;;  %v6104_v57 = vld [vmem:[#allocation117_spill] sm:$0xff]  ;;  %v6115_v11 = vld [vmem:[#allocation128_spill] sm:$0xff] }
 0x765   :  { %v3422_v9 = vpop.eup %3421 }
 0x766   :  { %v4836_v0 = vadd.f32 %v2247_v24, %v2246_v40  ;;  %v3424_v2 = vpop.eup %3423  ;;  %v2285_v21 = vmul.f32 %v3422_v9, %v3420_v25  ;;  %v6114_v24 = vld [vmem:[#allocation127_spill] sm:$0xff]  ;;  %v6117_v40 = vld [vmem:[#allocation130_spill] sm:$0xff]  ;;  %v6119_v9 = vld [vmem:[#allocation132_spill] sm:$0xff] }
 0x767   :  { %v6118_v25 = vld [vmem:[#allocation131_spill] sm:$0xff] }
 0x768   :  { %3425 = vtanh.f32 %v4836_v0  ;;  %v4839_v59 = vpack.c.bf16 %v2285_v21, %v2285_v21  ;;  %v6122_v21 = vld [vmem:[#allocation135_spill] sm:$0xff] }
 0x772   :  { %v3426_v3 = vpop.eup %3425 }
 0x773   :  { %v2250_v27 = vmul.f32 %v3426_v3, %v3424_v2  ;;  %v6120_v2 = vld [vmem:[#allocation133_spill] sm:$0xff]  ;;  %v6121_v3 = vld [vmem:[#allocation134_spill] sm:$0xff] }
 0x775   :  { %v2287_v55 = vpack.c.bf16 %v2250_v27, %v2250_v27  ;;  %v6123_v27 = vld [vmem:[#allocation136_spill] sm:$0xff] }
 0x777   :  { %2320 = vmatprep.mubr.bf16.mxu0 %v2287_v55  ;;  %2361 = vmatprep.mubr.bf16.mxu1 %v2287_v55 }
 0x778   :  { %2321 = vmatmul.mubr.bf16.vlgmr.msra.gmra.mrb[56].mxu0 %v4839_v59  ;;  %2362 = vmatmul.mubr.bf16.vlgmr.msra.gmra.mrb[56].mxu1 %v4839_v59 }
 0x779   :  { %2371 = vmatpush1.bf16.msra.mxu0 %v3837_v49  ;;  %2412 = vmatpush1.bf16.msra.mxu1 %v5710_v53 }
 0x77a   :  { %2402 = vmatprep.mubr.bf16.mxu0 %v2287_v55  ;;  %2443 = vmatprep.mubr.bf16.mxu1 %v2287_v55  ;;  %v6124_v55 = vld [vmem:[#allocation137_spill] sm:$0xff] }
 0x77b   :  { %2372 = vmatprep.subr.bf16.mxu0 %v5711_v15  ;;  %2413 = vmatprep.subr.bf16.mxu1 %v5712_v18 }
 0x77d   :  { %2373 = vmatpush1.bf16.msra.mxu0 %v5713_v8  ;;  %2414 = vmatpush1.bf16.msra.mxu1 %v5714_v20 }
 0x77e   :  { %2374 = vmatprep.subr.bf16.mxu0 %v5805_v61  ;;  %2415 = vmatprep.subr.bf16.mxu1 %v5806_v62 }
 0x781   :  { %2375 = vmatpush1.bf16.msra.mxu0 %v5807_v38  ;;  %2416 = vmatpush1.bf16.msra.mxu1 %v5808_v37 }
 0x782   :  { %2376 = vmatprep.subr.bf16.mxu0 %v5809_v39  ;;  %2417 = vmatprep.subr.bf16.mxu1 %v5810_v44 }
 0x785   :  { %2377 = vmatpush1.bf16.msra.mxu0 %v5811_v52  ;;  %2418 = vmatpush1.bf16.msra.mxu1 %v5812_v5 }
 0x786   :  { %2378 = vmatprep.subr.bf16.mxu0 %v5813_v54  ;;  %2419 = vmatprep.subr.bf16.mxu1 %v5904_v60 }
 0x789   :  { %2379 = vmatpush1.bf16.msra.mxu0 %v5905_v23  ;;  %2420 = vmatpush1.bf16.msra.mxu1 %v5906_v31 }
 0x78a   :  { %2380 = vmatprep.subr.bf16.mxu0 %v5907_v26  ;;  %2421 = vmatprep.subr.bf16.mxu1 %v5908_v58 }
 0x78d   :  { %2381 = vmatpush1.bf16.msra.mxu0 %v5909_v10  ;;  %2422 = vmatpush1.bf16.msra.mxu1 %v5910_v30 }
 0x78e   :  { %2382 = vmatprep.subr.bf16.mxu0 %v5911_v42  ;;  %2423 = vmatprep.subr.bf16.mxu1 %v5912_v51 }
 0x791   :  { %2383 = vmatpush1.bf16.msra.mxu0 %v5913_v4  ;;  %2424 = vmatpush1.bf16.msra.mxu1 %v5914_v14 }
 0x792   :  { %2384 = vmatprep.subr.bf16.mxu0 %v5825_v46  ;;  %2425 = vmatprep.subr.bf16.mxu1 %v5826_v32 }
 0x795   :  { %2385 = vmatpush1.bf16.msra.mxu0 %v5827_v28  ;;  %2426 = vmatpush1.bf16.msra.mxu1 %v5915_v12 }
 0x796   :  { %2386 = vmatprep.subr.bf16.mxu0 %v5916_v29  ;;  %2427 = vmatprep.subr.bf16.mxu1 %v5830_v56 }
 0x799   :  { %2387 = vmatpush1.bf16.msra.mxu0 %v5831_v47  ;;  %2428 = vmatpush1.bf16.msra.mxu1 %v5917_v45 }
 0x79a   :  { %2388 = vmatprep.subr.bf16.mxu0 %v5918_v13  ;;  %2429 = vmatprep.subr.bf16.mxu1 %v6104_v57 }
 0x79d   :  { %2389 = vmatpush1.bf16.msra.mxu0 %v6105_v35  ;;  %2430 = vmatpush1.bf16.msra.mxu1 %v6106_v48 }
 0x79e   :  { %2390 = vmatprep.subr.bf16.mxu0 %v6107_v33  ;;  %2431 = vmatprep.subr.bf16.mxu1 %v6108_v36 }
 0x7a1   :  { %2391 = vmatpush1.bf16.msra.mxu0 %v6109_v7  ;;  %2432 = vmatpush1.bf16.msra.mxu1 %v6110_v6 }
 0x7a2   :  { %2392 = vmatprep.subr.bf16.mxu0 %v6111_v63  ;;  %2433 = vmatprep.subr.bf16.mxu1 %v6112_v50  ;;  %v6201_v50 = vld [vmem:[#allocation76_spill] sm:$0xff] }
 0x7a5   :  { %2393 = vmatpush1.bf16.msra.mxu0 %v6113_v19  ;;  %2434 = vmatpush1.bf16.msra.mxu1 %v6114_v24  ;;  %v6125_v24 = vld [vmem:[#allocation138_spill] sm:$0xff]  ;;  %v6200_v19 = vld [vmem:[#allocation163_spill] sm:$0xff] }
 0x7a6   :  { %2394 = vmatprep.subr.bf16.mxu0 %v6115_v11  ;;  %2435 = vmatprep.subr.bf16.mxu1 %v6116_v43  ;;  %v6126_v11 = vld [vmem:[#allocation139_spill] sm:$0xff]  ;;  %v6127_v43 = vld [vmem:[#allocation140_spill] sm:$0xff] }
 0x7a9   :  { %2395 = vmatpush1.bf16.msra.mxu0 %v6117_v40  ;;  %2436 = vmatpush1.bf16.msra.mxu1 %v6118_v25  ;;  %v6128_v40 = vld [vmem:[#allocation141_spill] sm:$0xff]  ;;  %v6129_v25 = vld [vmem:[#allocation143_spill] sm:$0xff] }
 0x7aa   :  { %2396 = vmatprep.subr.bf16.mxu0 %v6119_v9  ;;  %2437 = vmatprep.subr.bf16.mxu1 %v6120_v2  ;;  %v6130_v9 = vld [vmem:[#allocation144_spill] sm:$0xff]  ;;  %v6131_v2 = vld [vmem:[#allocation7_spill] sm:$0xff] }
 0x7ad   :  { %2397 = vmatpush1.bf16.msra.mxu0 %v6121_v3  ;;  %2438 = vmatpush1.bf16.msra.mxu1 %v6122_v21  ;;  %v6132_v3 = vld [vmem:[#allocation9_spill] sm:$0xff] }
 0x7ae   :  { %2398 = vmatprep.subr.bf16.mxu0 %v6123_v27  ;;  %2439 = vmatprep.subr.bf16.mxu1 %v6124_v55  ;;  %v6133_v55 = vld [vmem:[#allocation8_spill] sm:$0xff]  ;;  %v6142_v27 = vld [vmem:[#allocation19_spill] sm:$0xff] }
 0x7b1   :  { %2399 = vmatpush1.bf16.msra.mxu0 %v6125_v24  ;;  %2440 = vmatpush1.bf16.msra.mxu1 %v6126_v11  ;;  %v6134_v24 = vld [vmem:[#allocation11_spill] sm:$0xff]  ;;  %v6135_v11 = vld [vmem:[#allocation10_spill] sm:$0xff] }
 0x7b2   :  { %2400 = vmatprep.subr.bf16.mxu0 %v6127_v43  ;;  %2441 = vmatprep.subr.bf16.mxu1 %v6128_v40  ;;  %v6136_v43 = vld [vmem:[#allocation12_spill] sm:$0xff]  ;;  %v6137_v40 = vld [vmem:[#allocation13_spill] sm:$0xff] }
 0x7b5   :  { %2401 = vmatpush1.bf16.msra.mxu0 %v6129_v25  ;;  %2442 = vmatpush1.bf16.msra.mxu1 %v6130_v9  ;;  %v6138_v25 = vld [vmem:[#allocation15_spill] sm:$0xff]  ;;  %v6139_v9 = vld [vmem:[#allocation14_spill] sm:$0xff] }
 0x7b6   :  { %2517 = vmatprep.subr.bf16.mxu0 %v6131_v2  ;;  %2558 = vmatprep.subr.bf16.mxu1 %v6132_v3  ;;  %v6140_v2 = vld [vmem:[#allocation16_spill] sm:$0xff]  ;;  %v6141_v3 = vld [vmem:[#allocation17_spill] sm:$0xff] }
 0x7b8   :  { %2403 = vmatmul.mubr.bf16.vlgmr.msra.gmra.mrb[60].mxu0 %v4839_v59  ;;  %2444 = vmatmul.mubr.bf16.vlgmr.msra.gmra.mrb[60].mxu1 %v4839_v59  ;;  %v6143_v59 = vld [vmem:[#allocation18_spill] sm:$0xff] }
 0x7b9   :  { %2518 = vmatpush1.bf16.msra.mxu0 %v6133_v55  ;;  %2559 = vmatpush1.bf16.msra.mxu1 %v6134_v24  ;;  %v6144_v55 = vld [vmem:[#allocation20_spill] sm:$0xff]  ;;  %v6145_v24 = vld [vmem:[#allocation21_spill] sm:$0xff] }
 0x7ba   :  { %2519 = vmatprep.subr.bf16.mxu0 %v6135_v11  ;;  %2560 = vmatprep.subr.bf16.mxu1 %v6136_v43  ;;  %v6146_v11 = vld [vmem:[#allocation22_spill] sm:$0xff]  ;;  %v6147_v43 = vld [vmem:[#allocation23_spill] sm:$0xff] }
 0x7bd   :  { %2520 = vmatpush1.bf16.msra.mxu0 %v6137_v40  ;;  %2561 = vmatpush1.bf16.msra.mxu1 %v6138_v25  ;;  %v6148_v40 = vld [vmem:[#allocation24_spill] sm:$0xff]  ;;  %v6149_v25 = vld [vmem:[#allocation25_spill] sm:$0xff] }
 0x7be   :  { %2521 = vmatprep.subr.bf16.mxu0 %v6139_v9  ;;  %2562 = vmatprep.subr.bf16.mxu1 %v6140_v2  ;;  %v6150_v9 = vld [vmem:[#allocation26_spill] sm:$0xff]  ;;  %v6151_v2 = vld [vmem:[#allocation27_spill] sm:$0xff] }
 0x7c1   :  { %2522 = vmatpush1.bf16.msra.mxu0 %v6141_v3  ;;  %2563 = vmatpush1.bf16.msra.mxu1 %v6142_v27  ;;  %v6152_v3 = vld [vmem:[#allocation28_spill] sm:$0xff]  ;;  %v6153_v27 = vld [vmem:[#allocation29_spill] sm:$0xff] }
 0x7c2   :  { %2523 = vmatprep.subr.bf16.mxu0 %v6143_v59  ;;  %2564 = vmatprep.subr.bf16.mxu1 %v6144_v55  ;;  %v6154_v59 = vld [vmem:[#allocation30_spill] sm:$0xff]  ;;  %v6155_v55 = vld [vmem:[#allocation31_spill] sm:$0xff] }
 0x7c5   :  { %2524 = vmatpush1.bf16.msra.mxu0 %v6145_v24  ;;  %2565 = vmatpush1.bf16.msra.mxu1 %v6146_v11  ;;  %v6156_v24 = vld [vmem:[#allocation32_spill] sm:$0xff]  ;;  %v6157_v11 = vld [vmem:[#allocation33_spill] sm:$0xff] }
 0x7c6   :  { %2525 = vmatprep.subr.bf16.mxu0 %v6147_v43  ;;  %2566 = vmatprep.subr.bf16.mxu1 %v6148_v40  ;;  %v6158_v43 = vld [vmem:[#allocation34_spill] sm:$0xff]  ;;  %v6159_v40 = vld [vmem:[#allocation35_spill] sm:$0xff] }
 0x7c9   :  { %2526 = vmatpush1.bf16.msra.mxu0 %v6149_v25  ;;  %2567 = vmatpush1.bf16.msra.mxu1 %v6150_v9  ;;  %v6160_v25 = vld [vmem:[#allocation36_spill] sm:$0xff]  ;;  %v6161_v9 = vld [vmem:[#allocation37_spill] sm:$0xff] }
 0x7ca   :  { %2527 = vmatprep.subr.bf16.mxu0 %v6151_v2  ;;  %2568 = vmatprep.subr.bf16.mxu1 %v6152_v3  ;;  %v6162_v2 = vld [vmem:[#allocation38_spill] sm:$0xff]  ;;  %v6163_v3 = vld [vmem:[#allocation39_spill] sm:$0xff] }
 0x7cd   :  { %2528 = vmatpush1.bf16.msra.mxu0 %v6153_v27  ;;  %2569 = vmatpush1.bf16.msra.mxu1 %v6154_v59  ;;  %v6164_v27 = vld [vmem:[#allocation40_spill] sm:$0xff]  ;;  %v6165_v59 = vld [vmem:[#allocation41_spill] sm:$0xff] }
 0x7ce   :  { %2529 = vmatprep.subr.bf16.mxu0 %v6155_v55  ;;  %2570 = vmatprep.subr.bf16.mxu1 %v6156_v24  ;;  %v6166_v55 = vld [vmem:[#allocation42_spill] sm:$0xff]  ;;  %v6167_v24 = vld [vmem:[#allocation43_spill] sm:$0xff] }
 0x7d1   :  { %2530 = vmatpush1.bf16.msra.mxu0 %v6157_v11  ;;  %2571 = vmatpush1.bf16.msra.mxu1 %v6158_v43  ;;  %v6168_v11 = vld [vmem:[#allocation44_spill] sm:$0xff]  ;;  %v6169_v43 = vld [vmem:[#allocation45_spill] sm:$0xff] }
 0x7d2   :  { %2531 = vmatprep.subr.bf16.mxu0 %v6159_v40  ;;  %2572 = vmatprep.subr.bf16.mxu1 %v6160_v25  ;;  %v6170_v40 = vld [vmem:[#allocation46_spill] sm:$0xff]  ;;  %v6171_v25 = vld [vmem:[#allocation47_spill] sm:$0xff] }
 0x7d5   :  { %2532 = vmatpush1.bf16.msra.mxu0 %v6161_v9  ;;  %2573 = vmatpush1.bf16.msra.mxu1 %v6162_v2  ;;  %v6172_v9 = vld [vmem:[#allocation48_spill] sm:$0xff]  ;;  %v6173_v2 = vld [vmem:[#allocation49_spill] sm:$0xff] }
 0x7d6   :  { %2533 = vmatprep.subr.bf16.mxu0 %v6163_v3  ;;  %2574 = vmatprep.subr.bf16.mxu1 %v6164_v27  ;;  %v6174_v3 = vld [vmem:[#allocation50_spill] sm:$0xff]  ;;  %v6175_v27 = vld [vmem:[#allocation51_spill] sm:$0xff] }
 0x7d9   :  { %2534 = vmatpush1.bf16.msra.mxu0 %v6165_v59  ;;  %2575 = vmatpush1.bf16.msra.mxu1 %v6166_v55  ;;  %v6176_v59 = vld [vmem:[#allocation52_spill] sm:$0xff]  ;;  %v6177_v55 = vld [vmem:[#allocation53_spill] sm:$0xff] }
 0x7da   :  { %2535 = vmatprep.subr.bf16.mxu0 %v6167_v24  ;;  %2576 = vmatprep.subr.bf16.mxu1 %v6168_v11  ;;  %v6178_v24 = vld [vmem:[#allocation54_spill] sm:$0xff]  ;;  %v6179_v11 = vld [vmem:[#allocation55_spill] sm:$0xff] }
 0x7dd   :  { %2536 = vmatpush1.bf16.msra.mxu0 %v6169_v43  ;;  %2577 = vmatpush1.bf16.msra.mxu1 %v6170_v40  ;;  %v6180_v43 = vld [vmem:[#allocation56_spill] sm:$0xff]  ;;  %v6181_v40 = vld [vmem:[#allocation57_spill] sm:$0xff] }
 0x7de   :  { %2537 = vmatprep.subr.bf16.mxu0 %v6171_v25  ;;  %2578 = vmatprep.subr.bf16.mxu1 %v6172_v9  ;;  %v6182_v25 = vld [vmem:[#allocation58_spill] sm:$0xff]  ;;  %v6183_v9 = vld [vmem:[#allocation59_spill] sm:$0xff] }
 0x7e1   :  { %2538 = vmatpush1.bf16.msra.mxu0 %v6173_v2  ;;  %2579 = vmatpush1.bf16.msra.mxu1 %v6174_v3  ;;  %v6184_v2 = vld [vmem:[#allocation61_spill] sm:$0xff]  ;;  %v6185_v3 = vld [vmem:[#allocation60_spill] sm:$0xff] }
 0x7e2   :  { %2539 = vmatprep.subr.bf16.mxu0 %v6175_v27  ;;  %2580 = vmatprep.subr.bf16.mxu1 %v6176_v59  ;;  %v6186_v27 = vld [vmem:[#allocation62_spill] sm:$0xff]  ;;  %v6187_v59 = vld [vmem:[#allocation63_spill] sm:$0xff] }
 0x7e5   :  { %2540 = vmatpush1.bf16.msra.mxu0 %v6177_v55  ;;  %2581 = vmatpush1.bf16.msra.mxu1 %v6178_v24  ;;  %v6188_v55 = vld [vmem:[#allocation64_spill] sm:$0xff]  ;;  %v6189_v24 = vld [vmem:[#allocation65_spill] sm:$0xff] }
 0x7e6   :  { %2541 = vmatprep.subr.bf16.mxu0 %v6179_v11  ;;  %2582 = vmatprep.subr.bf16.mxu1 %v6180_v43  ;;  %v6190_v11 = vld [vmem:[#allocation66_spill] sm:$0xff]  ;;  %v6191_v43 = vld [vmem:[#allocation67_spill] sm:$0xff] }
 0x7e9   :  { %2542 = vmatpush1.bf16.msra.mxu0 %v6181_v40  ;;  %2583 = vmatpush1.bf16.msra.mxu1 %v6182_v25  ;;  %v6192_v40 = vld [vmem:[#allocation68_spill] sm:$0xff]  ;;  %v6193_v25 = vld [vmem:[#allocation69_spill] sm:$0xff] }
 0x7ea   :  { %2543 = vmatprep.subr.bf16.mxu0 %v6183_v9  ;;  %2584 = vmatprep.subr.bf16.mxu1 %v6184_v2  ;;  %v6194_v9 = vld [vmem:[#allocation70_spill] sm:$0xff]  ;;  %v6195_v2 = vld [vmem:[#allocation71_spill] sm:$0xff] }
 0x7ed   :  { %2544 = vmatpush1.bf16.msra.mxu0 %v6185_v3  ;;  %2585 = vmatpush1.bf16.msra.mxu1 %v6186_v27  ;;  %v6196_v3 = vld [vmem:[#allocation72_spill] sm:$0xff]  ;;  %v6197_v27 = vld [vmem:[#allocation75_spill] sm:$0xff] }
 0x7ee   :  { %2545 = vmatprep.subr.bf16.mxu0 %v6187_v59  ;;  %2586 = vmatprep.subr.bf16.mxu1 %v6188_v55  ;;  %v6198_v59 = vld [vmem:[#allocation160_spill] sm:$0xff]  ;;  %v6199_v55 = vld [vmem:[#allocation79_spill] sm:$0xff] }
 0x7ef   :  { %v204_v21 = vadd.f32 %v6198_v59, %v6197_v27 }
 0x7f1   :  { %2546 = vmatpush1.bf16.msra.mxu0 %v6189_v24  ;;  %2587 = vmatpush1.bf16.msra.mxu1 %v6190_v11  ;;  %v277_v24 = vadd.f32 %v6200_v19, %v6199_v55  ;;  %v6202_v11 = vld [vmem:[#allocation161_spill] sm:$0xff] }
 0x7f2   :  { %2547 = vmatprep.subr.bf16.mxu0 %v6191_v43  ;;  %2588 = vmatprep.subr.bf16.mxu1 %v6192_v40  ;;  %v206_v63 = vadd.f32 %v6202_v11, %v6201_v50  ;;  %v6203_v43 = vld [vmem:[#allocation165_spill] sm:$0xff] }
 0x7f3   :  { %v279_v40 = vadd.f32 %v6203_v43, %v5698_v17  ;;  %v6233_v17 = vld [vmem:[#allocation71_spill] sm:$0xff] }
 0x7f5   :  { %2548 = vmatpush1.bf16.msra.mxu0 %v6193_v25  ;;  %2589 = vmatpush1.bf16.msra.mxu1 %v6194_v9 }
 0x7f6   :  { %2599 = vmatprep.subr.bf16.mxu0 %v6195_v2  ;;  %2640 = vmatprep.subr.bf16.mxu1 %v6196_v3 }
 0x84b   :  { %v2322_v6 = vpop.f32.mrb[56].mxu0  ;;  %v2363_v25 = vpop.f32.mrb[56].mxu1 }
 0x84c   :  { %v2487_v7 = vadd.f32 %v2322_v6, %v204_v21  ;;  %v2489_v9 = vadd.f32 %v2363_v25, %v277_v24  ;;  %v2324_v36 = vpop.f32.mrb[57].mxu0  ;;  %v2365_v2 = vpop.f32.mrb[57].mxu1 }
 0x84d   :  { %v2488_v33 = vadd.f32 %v2324_v36, %v206_v63  ;;  %v2490_v3 = vadd.f32 %v2365_v2, %v279_v40  ;;  %v2326_v48 = vpop.f32.mrb[58].mxu0  ;;  %v2367_v35 = vpop.f32.mrb[58].mxu1 }
 0x84e   :  { %v3145_v59 = vmul.f32 -1.442695, %v2487_v7  ;;  %v2327_v27 = vpop.f32.mrb[59].mxu0  ;;  %v2368_v57 = vpop.f32.mrb[59].mxu1 }
 0x84f   :  { %v3146_v19 = vmul.f32 -1.442695, %v2488_v33 }
 0x850   :  { %3427 = vpow2.f32 %v3145_v59 }
 0x851   :  { %3429 = vpow2.f32 %v3146_v19  ;;  %v3147_v19 = vmul.f32 -1.442695, %v2489_v9 }
 0x852   :  { %3431 = vtanh.f32 %v2490_v3 }
 0x85a   :  { %v3428_v11 = vpop.eup %3427 }
 0x85b   :  { %v2500_v50 = vadd.f32 1.0, %v3428_v11  ;;  %v3430_v55 = vpop.eup %3429 }
 0x85c   :  { %v2501_v43 = vadd.f32 1.0, %v3430_v55  ;;  %v3432_v6 = vpop.eup %3431 }
 0x85d   :  { %3433 = vrcp.f32 %v2500_v50 }
 0x85e   :  { %3435 = vrcp.f32 %v2501_v43 }
 0x867   :  { %v3434_v21 = vpop.eup %3433 }
 0x868   :  { %v2511_v24 = vmul.f32 %v3434_v21, %v3432_v6  ;;  %v3436_v36 = vpop.eup %3435 }
 0x869   :  { %v2510_v48 = vmul.f32 %v3436_v36, %v4828_v22 }
 0x86b   :  { %v4982_v35 = vadd.f32 %v2511_v24, %v2510_v48 }
 0x86d   :  { %6204 = vst [vmem:[#allocation83_spill] sm:$0xff] %v4982_v35 }
 0x88b   :  { %v2404_v7 = vpop.f32.mrb[60].mxu0  ;;  %v2445_v57 = vpop.f32.mrb[60].mxu1 }
 0x88c   :  { %v2452_v33 = vadd.f32 %v2404_v7, %v5804_v34  ;;  %v2406_v63 = vpop.f32.mrb[61].mxu0  ;;  %v2447_v2 = vpop.f32.mrb[61].mxu1  ;;  %v2454_v22 = vadd.f32 %v2445_v57, %v4211_v16  ;;  %v6229_v16 = vld [vmem:[#allocation140_spill] sm:$0xff]  ;;  %v6231_v34 = vld [vmem:[#allocation143_spill] sm:$0xff] }
 0x88d   :  { %v2453_v27 = vadd.f32 %v2406_v63, %v4205_v1  ;;  %v2408_v3 = vpop.f32.mrb[62].mxu0  ;;  %v2449_v50 = vpop.f32.mrb[62].mxu1  ;;  %v2455_v11 = vadd.f32 %v2447_v2, %v4215_v41  ;;  %v6228_v41 = vld [vmem:[#allocation139_spill] sm:$0xff]  ;;  %v6230_v1 = vld [vmem:[#allocation141_spill] sm:$0xff] }
 0x88e   :  { %v3142_v55 = vmul.f32 -1.442695, %v2452_v33  ;;  %v2409_v40 = vpop.f32.mrb[63].mxu0  ;;  %v2450_v25 = vpop.f32.mrb[63].mxu1  ;;  %v3144_v43 = vmul.f32 -1.442695, %v2454_v22 }
 0x88f   :  { %v3143_v59 = vmul.f32 -1.442695, %v2453_v27 }
 0x890   :  { %3437 = vpow2.f32 %v3142_v55 }
 0x891   :  { %3439 = vpow2.f32 %v3143_v59 }
 0x892   :  { %3441 = vpow2.f32 %v3147_v19 }
 0x893   :  { %3443 = vtanh.f32 %v2455_v11 }
 0x894   :  { %3445 = vpow2.f32 %v3144_v43 }
 0x89a   :  { %v3438_v6 = vpop.eup %3437 }
 0x89b   :  { %v2465_v21 = vadd.f32 1.0, %v3438_v6  ;;  %v3440_v24 = vpop.eup %3439  ;;  %v6207_v6 = vld [vmem:[#allocation118_spill] sm:$0xff] }
 0x89c   :  { %v2466_v36 = vadd.f32 1.0, %v3440_v24  ;;  %v3442_v48 = vpop.eup %3441  ;;  %v6209_v24 = vld [vmem:[#allocation120_spill] sm:$0xff] }
 0x89d   :  { %3447 = vrcp.f32 %v2465_v21  ;;  %v3444_v7 = vpop.eup %3443  ;;  %v2502_v27 = vadd.f32 1.0, %v3442_v48  ;;  %v6208_v21 = vld [vmem:[#allocation119_spill] sm:$0xff]  ;;  %v6211_v48 = vld [vmem:[#allocation122_spill] sm:$0xff] }
 0x89e   :  { %3449 = vrcp.f32 %v2466_v36  ;;  %v3446_v33 = vpop.eup %3445  ;;  %v6210_v36 = vld [vmem:[#allocation121_spill] sm:$0xff] }
 0x89f   :  { %v2467_v9 = vadd.f32 1.0, %v3446_v33  ;;  %3451 = vtanh.f32 %v4982_v35  ;;  %v6213_v33 = vld [vmem:[#allocation124_spill] sm:$0xff] }
 0x8a0   :  { %3453 = vrcp.f32 %v2502_v27  ;;  %v6215_v27 = vld [vmem:[#allocation126_spill] sm:$0xff]  ;;  %v6232_v35 = vld [vmem:[#allocation144_spill] sm:$0xff] }
 0x8a1   :  { %3455 = vrcp.f32 %v2467_v9  ;;  %v6218_v9 = vld [vmem:[#allocation129_spill] sm:$0xff] }
 0x8a7   :  { %v3448_v63 = vpop.eup %3447 }
 0x8a8   :  { %v2476_v3 = vmul.f32 %v3448_v63, %v3444_v7  ;;  %v3450_v57 = vpop.eup %3449  ;;  %v6212_v7 = vld [vmem:[#allocation123_spill] sm:$0xff]  ;;  %v6214_v63 = vld [vmem:[#allocation125_spill] sm:$0xff] }
 0x8a9   :  { %v2475_v2 = vmul.f32 %v3450_v57, %v4836_v0  ;;  %v3452_v55 = vpop.eup %3451  ;;  %v6206_v0 = vld [vmem:[#allocation117_spill] sm:$0xff]  ;;  %v6217_v57 = vld [vmem:[#allocation128_spill] sm:$0xff] }
 0x8aa   :  { %v3454_v40 = vpop.eup %3453 }
 0x8ab   :  { %v4990_v50 = vadd.f32 %v2476_v3, %v2475_v2  ;;  %v3456_v25 = vpop.eup %3455  ;;  %v2514_v22 = vmul.f32 %v3454_v40, %v3452_v55  ;;  %v6216_v3 = vld [vmem:[#allocation127_spill] sm:$0xff]  ;;  %v6219_v2 = vld [vmem:[#allocation130_spill] sm:$0xff]  ;;  %v6221_v40 = vld [vmem:[#allocation132_spill] sm:$0xff] }
 0x8ac   :  { %v6220_v55 = vld [vmem:[#allocation131_spill] sm:$0xff] }
 0x8ad   :  { %6205 = vst [vmem:[#allocation74_spill] sm:$0xff] %v4990_v50  ;;  %3457 = vtanh.f32 %v4990_v50  ;;  %v4993_v43 = vpack.c.bf16 %v2514_v22, %v2514_v22  ;;  %v6224_v22 = vld [vmem:[#allocation135_spill] sm:$0xff]  ;;  %v6227_v50 = vld [vmem:[#allocation138_spill] sm:$0xff] }
 0x8b7   :  { %v3458_v59 = vpop.eup %3457 }
 0x8b8   :  { %v2479_v19 = vmul.f32 %v3458_v59, %v3456_v25  ;;  %v6222_v25 = vld [vmem:[#allocation133_spill] sm:$0xff]  ;;  %v6223_v59 = vld [vmem:[#allocation134_spill] sm:$0xff] }
 0x8ba   :  { %v2516_v11 = vpack.c.bf16 %v2479_v19, %v2479_v19  ;;  %v6225_v19 = vld [vmem:[#allocation136_spill] sm:$0xff] }
 0x8bc   :  { %2549 = vmatprep.mubr.bf16.mxu0 %v2516_v11  ;;  %2590 = vmatprep.mubr.bf16.mxu1 %v2516_v11 }
 0x8bd   :  { %2550 = vmatmul.mubr.bf16.vlgmr.msra.gmra.mrb[64].mxu0 %v4993_v43  ;;  %2591 = vmatmul.mubr.bf16.vlgmr.msra.gmra.mrb[64].mxu1 %v4993_v43 }
 0x8be   :  { %2600 = vmatpush1.bf16.msra.mxu0 %v3837_v49  ;;  %2641 = vmatpush1.bf16.msra.mxu1 %v5710_v53 }
 0x8bf   :  { %2631 = vmatprep.mubr.bf16.mxu0 %v2516_v11  ;;  %2672 = vmatprep.mubr.bf16.mxu1 %v2516_v11  ;;  %v6226_v11 = vld [vmem:[#allocation137_spill] sm:$0xff] }
 0x8c0   :  { %2601 = vmatprep.subr.bf16.mxu0 %v5711_v15  ;;  %2642 = vmatprep.subr.bf16.mxu1 %v5712_v18 }
 0x8c2   :  { %2602 = vmatpush1.bf16.msra.mxu0 %v5713_v8  ;;  %2643 = vmatpush1.bf16.msra.mxu1 %v5714_v20 }
 0x8c3   :  { %2603 = vmatprep.subr.bf16.mxu0 %v5805_v61  ;;  %2644 = vmatprep.subr.bf16.mxu1 %v5806_v62 }
 0x8c6   :  { %2604 = vmatpush1.bf16.msra.mxu0 %v5807_v38  ;;  %2645 = vmatpush1.bf16.msra.mxu1 %v5808_v37 }
 0x8c7   :  { %2605 = vmatprep.subr.bf16.mxu0 %v5809_v39  ;;  %2646 = vmatprep.subr.bf16.mxu1 %v5810_v44 }
 0x8ca   :  { %2606 = vmatpush1.bf16.msra.mxu0 %v5811_v52  ;;  %2647 = vmatpush1.bf16.msra.mxu1 %v5812_v5 }
 0x8cb   :  { %2607 = vmatprep.subr.bf16.mxu0 %v5813_v54  ;;  %2648 = vmatprep.subr.bf16.mxu1 %v5904_v60 }
 0x8ce   :  { %2608 = vmatpush1.bf16.msra.mxu0 %v5905_v23  ;;  %2649 = vmatpush1.bf16.msra.mxu1 %v5906_v31 }
 0x8cf   :  { %2609 = vmatprep.subr.bf16.mxu0 %v5907_v26  ;;  %2650 = vmatprep.subr.bf16.mxu1 %v5908_v58 }
 0x8d2   :  { %2610 = vmatpush1.bf16.msra.mxu0 %v5909_v10  ;;  %2651 = vmatpush1.bf16.msra.mxu1 %v5910_v30 }
 0x8d3   :  { %2611 = vmatprep.subr.bf16.mxu0 %v5911_v42  ;;  %2652 = vmatprep.subr.bf16.mxu1 %v5912_v51 }
 0x8d6   :  { %2612 = vmatpush1.bf16.msra.mxu0 %v5913_v4  ;;  %2653 = vmatpush1.bf16.msra.mxu1 %v5914_v14 }
 0x8d7   :  { %2613 = vmatprep.subr.bf16.mxu0 %v5825_v46  ;;  %2654 = vmatprep.subr.bf16.mxu1 %v5826_v32 }
 0x8da   :  { %2614 = vmatpush1.bf16.msra.mxu0 %v5827_v28  ;;  %2655 = vmatpush1.bf16.msra.mxu1 %v5915_v12 }
 0x8db   :  { %2615 = vmatprep.subr.bf16.mxu0 %v5916_v29  ;;  %2656 = vmatprep.subr.bf16.mxu1 %v5830_v56 }
 0x8de   :  { %2616 = vmatpush1.bf16.msra.mxu0 %v5831_v47  ;;  %2657 = vmatpush1.bf16.msra.mxu1 %v5917_v45 }
 0x8df   :  { %2617 = vmatprep.subr.bf16.mxu0 %v5918_v13  ;;  %2658 = vmatprep.subr.bf16.mxu1 %v6206_v0 }
 0x8e2   :  { %2618 = vmatpush1.bf16.msra.mxu0 %v6207_v6  ;;  %2659 = vmatpush1.bf16.msra.mxu1 %v6208_v21 }
 0x8e3   :  { %2619 = vmatprep.subr.bf16.mxu0 %v6209_v24  ;;  %2660 = vmatprep.subr.bf16.mxu1 %v6210_v36 }
 0x8e6   :  { %2620 = vmatpush1.bf16.msra.mxu0 %v6211_v48  ;;  %2661 = vmatpush1.bf16.msra.mxu1 %v6212_v7 }
 0x8e7   :  { %2621 = vmatprep.subr.bf16.mxu0 %v6213_v33  ;;  %2662 = vmatprep.subr.bf16.mxu1 %v6214_v63 }
 0x8ea   :  { %2622 = vmatpush1.bf16.msra.mxu0 %v6215_v27  ;;  %2663 = vmatpush1.bf16.msra.mxu1 %v6216_v3 }
 0x8eb   :  { %2623 = vmatprep.subr.bf16.mxu0 %v6217_v57  ;;  %2664 = vmatprep.subr.bf16.mxu1 %v6218_v9 }
 0x8ee   :  { %2624 = vmatpush1.bf16.msra.mxu0 %v6219_v2  ;;  %2665 = vmatpush1.bf16.msra.mxu1 %v6220_v55 }
 0x8ef   :  { %2625 = vmatprep.subr.bf16.mxu0 %v6221_v40  ;;  %2666 = vmatprep.subr.bf16.mxu1 %v6222_v25 }
 0x8f2   :  { %2626 = vmatpush1.bf16.msra.mxu0 %v6223_v59  ;;  %2667 = vmatpush1.bf16.msra.mxu1 %v6224_v22  ;;  %v6234_v59 = vld [vmem:[#allocation72_spill] sm:$0xff] }
 0x8f3   :  { %2627 = vmatprep.subr.bf16.mxu0 %v6225_v19  ;;  %2668 = vmatprep.subr.bf16.mxu1 %v6226_v11 }
 0x8f6   :  { %2628 = vmatpush1.bf16.msra.mxu0 %v6227_v50  ;;  %2669 = vmatpush1.bf16.msra.mxu1 %v6228_v41 }
 0x8f7   :  { %2629 = vmatprep.subr.bf16.mxu0 %v6229_v16  ;;  %2670 = vmatprep.subr.bf16.mxu1 %v6230_v1 }
 0x8fa   :  { %2630 = vmatpush1.bf16.msra.mxu0 %v6231_v34  ;;  %2671 = vmatpush1.bf16.msra.mxu1 %v6232_v35 }
 0x8fb   :  { %2746 = vmatprep.subr.bf16.mxu0 %v6233_v17  ;;  %2787 = vmatprep.subr.bf16.mxu1 %v6234_v59  ;;  %v6236_v17 = vld [vmem:[#allocation75_spill] sm:$0xff]  ;;  %v6248_v59 = vld [vmem:[#allocation81_spill] sm:$0xff] }
 0x8fd   :  { %2632 = vmatmul.mubr.bf16.vlgmr.msra.gmra.mrb[68].mxu0 %v4993_v43  ;;  %2673 = vmatmul.mubr.bf16.vlgmr.msra.gmra.mrb[68].mxu1 %v4993_v43 }
 0x8fe   :  { %2747 = vmatpush1.bf16.msra.mxu0 %v3837_v49  ;;  %2788 = vmatpush1.bf16.msra.mxu1 %v5710_v53  ;;  %v6235_v49 = vld [vmem:[#allocation134_spill] sm:$0xff] }
 0x8ff   :  { %2748 = vmatprep.subr.bf16.mxu0 %v5711_v15  ;;  %2789 = vmatprep.subr.bf16.mxu1 %v5712_v18  ;;  %v6237_v53 = vld [vmem:[#allocation162_spill] sm:$0xff]  ;;  %v6238_v18 = vld [vmem:[#allocation79_spill] sm:$0xff] }
 0x900   :  { %v208_v15 = vadd.f32 %v6237_v53, %v6236_v17 }
 0x902   :  { %2749 = vmatpush1.bf16.msra.mxu0 %v5713_v8  ;;  %2790 = vmatpush1.bf16.msra.mxu1 %v5714_v20  ;;  %v6239_v8 = vld [vmem:[#allocation166_spill] sm:$0xff] }
 0x903   :  { %2750 = vmatprep.subr.bf16.mxu0 %v5805_v61  ;;  %2791 = vmatprep.subr.bf16.mxu1 %v5806_v62  ;;  %v281_v20 = vadd.f32 %v6239_v8, %v6238_v18  ;;  %v6240_v61 = vld [vmem:[#allocation76_spill] sm:$0xff] }
 0x904   :  { %v6241_v62 = vld [vmem:[#allocation164_spill] sm:$0xff] }
 0x906   :  { %2751 = vmatpush1.bf16.msra.mxu0 %v5807_v38  ;;  %2792 = vmatpush1.bf16.msra.mxu1 %v5808_v37  ;;  %v210_v38 = vadd.f32 %v6241_v62, %v6240_v61  ;;  %v6242_v37 = vld [vmem:[#allocation82_spill] sm:$0xff] }
 0x907   :  { %2752 = vmatprep.subr.bf16.mxu0 %v5809_v39  ;;  %2793 = vmatprep.subr.bf16.mxu1 %v5810_v44  ;;  %v6243_v39 = vld [vmem:[#allocation167_spill] sm:$0xff] }
 0x90a   :  { %2753 = vmatpush1.bf16.msra.mxu0 %v5811_v52  ;;  %2794 = vmatpush1.bf16.msra.mxu1 %v5812_v5 }
 0x90b   :  { %2754 = vmatprep.subr.bf16.mxu0 %v5813_v54  ;;  %2795 = vmatprep.subr.bf16.mxu1 %v5904_v60 }
 0x90e   :  { %2755 = vmatpush1.bf16.msra.mxu0 %v5905_v23  ;;  %2796 = vmatpush1.bf16.msra.mxu1 %v5906_v31 }
 0x90f   :  { %2756 = vmatprep.subr.bf16.mxu0 %v5907_v26  ;;  %2797 = vmatprep.subr.bf16.mxu1 %v5908_v58 }
 0x912   :  { %2757 = vmatpush1.bf16.msra.mxu0 %v5909_v10  ;;  %2798 = vmatpush1.bf16.msra.mxu1 %v5910_v30 }
 0x913   :  { %2758 = vmatprep.subr.bf16.mxu0 %v5911_v42  ;;  %2799 = vmatprep.subr.bf16.mxu1 %v5912_v51 }
 0x916   :  { %2759 = vmatpush1.bf16.msra.mxu0 %v5913_v4  ;;  %2800 = vmatpush1.bf16.msra.mxu1 %v5914_v14 }
 0x917   :  { %2760 = vmatprep.subr.bf16.mxu0 %v5825_v46  ;;  %2801 = vmatprep.subr.bf16.mxu1 %v5826_v32 }
 0x91a   :  { %2761 = vmatpush1.bf16.msra.mxu0 %v5827_v28  ;;  %2802 = vmatpush1.bf16.msra.mxu1 %v5915_v12 }
 0x91b   :  { %2762 = vmatprep.subr.bf16.mxu0 %v5916_v29  ;;  %2803 = vmatprep.subr.bf16.mxu1 %v5830_v56 }
 0x91e   :  { %2763 = vmatpush1.bf16.msra.mxu0 %v5831_v47  ;;  %2804 = vmatpush1.bf16.msra.mxu1 %v5917_v45  ;;  %v6244_v45 = vld [vmem:[#allocation83_spill] sm:$0xff] }
 0x91f   :  { %2764 = vmatprep.subr.bf16.mxu0 %v5918_v13  ;;  %2805 = vmatprep.subr.bf16.mxu1 %v6206_v0 }
 0x922   :  { %2765 = vmatpush1.bf16.msra.mxu0 %v6207_v6  ;;  %2806 = vmatpush1.bf16.msra.mxu1 %v6208_v21 }
 0x923   :  { %2766 = vmatprep.subr.bf16.mxu0 %v6209_v24  ;;  %2807 = vmatprep.subr.bf16.mxu1 %v6210_v36  ;;  %v6245_v24 = vld [vmem:[#allocation77_spill] sm:$0xff] }
 0x926   :  { %2767 = vmatpush1.bf16.msra.mxu0 %v6211_v48  ;;  %2808 = vmatpush1.bf16.msra.mxu1 %v6212_v7 }
 0x927   :  { %2768 = vmatprep.subr.bf16.mxu0 %v6213_v33  ;;  %2809 = vmatprep.subr.bf16.mxu1 %v6214_v63  ;;  %v6246_v33 = vld [vmem:[#allocation80_spill] sm:$0xff] }
 0x92a   :  { %2769 = vmatpush1.bf16.msra.mxu0 %v6215_v27  ;;  %2810 = vmatpush1.bf16.msra.mxu1 %v6216_v3 }
 0x92b   :  { %2770 = vmatprep.subr.bf16.mxu0 %v6217_v57  ;;  %2811 = vmatprep.subr.bf16.mxu1 %v6218_v9 }
 0x92e   :  { %2771 = vmatpush1.bf16.msra.mxu0 %v6219_v2  ;;  %2812 = vmatpush1.bf16.msra.mxu1 %v6220_v55 }
 0x92f   :  { %2772 = vmatprep.subr.bf16.mxu0 %v6221_v40  ;;  %2813 = vmatprep.subr.bf16.mxu1 %v6222_v25  ;;  %v6247_v40 = vld [vmem:[#allocation78_spill] sm:$0xff] }
 0x932   :  { %2773 = vmatpush1.bf16.msra.mxu0 %v6235_v49  ;;  %2814 = vmatpush1.bf16.msra.mxu1 %v6224_v22 }
 0x933   :  { %2774 = vmatprep.subr.bf16.mxu0 %v6225_v19  ;;  %2815 = vmatprep.subr.bf16.mxu1 %v6226_v11 }
 0x936   :  { %2775 = vmatpush1.bf16.msra.mxu0 %v6227_v50  ;;  %2816 = vmatpush1.bf16.msra.mxu1 %v6228_v41  ;;  %v283_v41 = vadd.f32 %v6243_v39, %v6242_v37 }
 0x937   :  { %2776 = vmatprep.subr.bf16.mxu0 %v6229_v16  ;;  %2817 = vmatprep.subr.bf16.mxu1 %v6230_v1 }
 0x93a   :  { %2777 = vmatpush1.bf16.msra.mxu0 %v6231_v34  ;;  %2818 = vmatpush1.bf16.msra.mxu1 %v6232_v35 }
 0x990   :  { %v2551_v44 = vpop.f32.mrb[64].mxu0  ;;  %v2592_v16 = vpop.f32.mrb[64].mxu1 }
 0x991   :  { %v2716_v52 = vadd.f32 %v2551_v44, %v208_v15  ;;  %v2718_v1 = vadd.f32 %v2592_v16, %v281_v20  ;;  %v2553_v5 = vpop.f32.mrb[65].mxu0  ;;  %v2594_v34 = vpop.f32.mrb[65].mxu1 }
 0x992   :  { %v2717_v54 = vadd.f32 %v2553_v5, %v210_v38  ;;  %v2719_v46 = vadd.f32 %v2594_v34, %v283_v41  ;;  %v2555_v32 = vpop.f32.mrb[66].mxu0  ;;  %v2596_v28 = vpop.f32.mrb[66].mxu1  ;;  %v6249_v38 = vld [vmem:[#allocation74_spill] sm:$0xff]  ;;  %v2857_v34 = vld [vmem:[%s5203_s5 + $0x8] sm:$0xff] }
 0x993   :  { %v3151_v56 = vmul.f32 -1.442695, %v2716_v52  ;;  %v2556_v47 = vpop.f32.mrb[67].mxu0  ;;  %v2597_v60 = vpop.f32.mrb[67].mxu1  ;;  %v3153_v31 = vmul.f32 -1.442695, %v2718_v1 }
 0x994   :  { %v3152_v23 = vmul.f32 -1.442695, %v2717_v54  ;;  %v2856_v5 = vld [vmem:[%s5203_s5] sm:$0xff]  ;;  %v2858_v32 = vld [vmem:[%s5203_s5 + $0x10] sm:$0xff]  ;;  %v2859_v28 = vld [vmem:[%s5203_s5 + $0x18] sm:$0xff] }
 0x995   :  { %3459 = vpow2.f32 %v3151_v56  ;;  %v3211_v54 = vpack.c.bf16 %v2857_v34, %v2856_v5  ;;  %v3214_v56 = vpack.c.bf16 %v2859_v28, %v2858_v32  ;;  %v2860_v47 = vld [vmem:[%s5203_s5 + $0x20] sm:$0xff]  ;;  %v2861_v60 = vld [vmem:[%s5203_s5 + $0x28] sm:$0xff] }
 0x996   :  { %3461 = vpow2.f32 %v3152_v23  ;;  %v3217_v23 = vpack.c.bf16 %v2861_v60, %v2860_v47 }
 0x997   :  { %3463 = vtanh.f32 %v2719_v46  ;;  %v3535_v46 = vmov 0.0|0.0  }
 0x998   :  { %3465 = vpow2.f32 %v3153_v31  ;;  %3210 = vmatprep.subr.bf16.mxu0 %v3535_v46  ;;  %v2862_v31 = vld [vmem:[%s5203_s5 + $0x30] sm:$0xff] }
 0x99f   :  { %v3460_v26 = vpop.eup %3459 }
 0x9a0   :  { %v2729_v58 = vadd.f32 1.0, %v3460_v26  ;;  %v3462_v10 = vpop.eup %3461  ;;  %v2863_v26 = vld [vmem:[%s5203_s5 + $0x38] sm:$0xff] }
 0x9a1   :  { %v2730_v30 = vadd.f32 1.0, %v3462_v10  ;;  %v3464_v42 = vpop.eup %3463  ;;  %v2864_v10 = vld [vmem:[%s5203_s5 + $0x40] sm:$0xff] }
 0x9a2   :  { %3467 = vrcp.f32 %v2729_v58  ;;  %v3466_v51 = vpop.eup %3465  ;;  %v3220_v58 = vpack.c.bf16 %v2863_v26, %v2862_v31 }
 0x9a3   :  { %3469 = vrcp.f32 %v2730_v30  ;;  %v2731_v29 = vadd.f32 1.0, %v3466_v51  ;;  %v2865_v30 = vld [vmem:[%s5203_s5 + $0x48] sm:$0xff]  ;;  %v2866_v51 = vld [vmem:[%s5203_s5 + $0x50] sm:$0xff] }
 0x9a5   :  { %3471 = vrcp.f32 %v2731_v29  ;;  %v2869_v29 = vld [vmem:[%s5203_s5 + $0x68] sm:$0xff] }
 0x9ac   :  { %v3468_v4 = vpop.eup %3467 }
 0x9ad   :  { %v2740_v14 = vmul.f32 %v3468_v4, %v3464_v42  ;;  %v3470_v12 = vpop.eup %3469  ;;  %v3223_v42 = vpack.c.bf16 %v2865_v30, %v2864_v10  ;;  %v2867_v4 = vld [vmem:[%s5203_s5 + $0x58] sm:$0xff] }
 0x9ae   :  { %v2739_v13 = vmul.f32 %v3470_v12, %v6244_v45  ;;  %v2868_v12 = vld [vmem:[%s5203_s5 + $0x60] sm:$0xff]  ;;  %v3537_v45 = vmov 0.0  }
 0x9af   :  { %v3472_v50 = vpop.eup %3471 }
 0x9b0   :  { %v2741_v35 = vadd.f32 %v2740_v14, %v2739_v13  ;;  %v3226_v14 = vpack.c.bf16 %v2867_v4, %v2866_v51  ;;  %v3229_v13 = vpack.c.bf16 %v2869_v29, %v2868_v12 }
 0x9b2   :  { %3473 = vtanh.f32 %v2741_v35  ;;  %v2870_v35 = vld [vmem:[%s5203_s5 + $0x70] sm:$0xff] }
 0x9bc   :  { %v3474_v43 = vpop.eup %3473 }
 0x9bd   :  { %v2743_v0 = vmul.f32 %v3474_v43, %v3472_v50  ;;  %v2871_v50 = vld [vmem:[%s5203_s5 + $0x78] sm:$0xff] }
 0x9be   :  { %v3232_v43 = vpack.c.bf16 %v2871_v50, %v2870_v35 }
 0x9bf   :  { %v2744_v1 = vpack.c.bf16 %v2743_v0, %v2743_v0 }
 0x9d0   :  { %v2633_v6 = vpop.f32.mrb[68].mxu0  ;;  %v2674_v21 = vpop.f32.mrb[68].mxu1 }
 0x9d1   :  { %v2681_v36 = vadd.f32 %v2633_v6, %v6245_v24  ;;  %v2635_v48 = vpop.f32.mrb[69].mxu0  ;;  %v2676_v7 = vpop.f32.mrb[69].mxu1  ;;  %v2683_v25 = vadd.f32 %v2674_v21, %v6247_v40 }
 0x9d2   :  { %v2682_v63 = vadd.f32 %v2635_v48, %v6246_v33  ;;  %v2637_v27 = vpop.f32.mrb[70].mxu0  ;;  %v2678_v3 = vpop.f32.mrb[70].mxu1  ;;  %v2684_v22 = vadd.f32 %v2676_v7, %v6248_v59 }
 0x9d3   :  { %v3148_v57 = vmul.f32 -1.442695, %v2681_v36  ;;  %v2638_v9 = vpop.f32.mrb[71].mxu0  ;;  %v2679_v2 = vpop.f32.mrb[71].mxu1  ;;  %v3150_v19 = vmul.f32 -1.442695, %v2683_v25 }
 0x9d4   :  { %v3149_v55 = vmul.f32 -1.442695, %v2682_v63 }
 0x9d5   :  { %3475 = vpow2.f32 %v3148_v57 }
 0x9d6   :  { %3477 = vpow2.f32 %v3149_v55 }
 0x9d7   :  { %3479 = vtanh.f32 %v2684_v22 }
 0x9d8   :  { %3481 = vpow2.f32 %v3150_v19 }
 0x9df   :  { %v3476_v11 = vpop.eup %3475 }
 0x9e0   :  { %v2694_v49 = vadd.f32 1.0, %v3476_v11  ;;  %v3478_v17 = vpop.eup %3477 }
 0x9e1   :  { %v2695_v53 = vadd.f32 1.0, %v3478_v17  ;;  %v3480_v15 = vpop.eup %3479 }
 0x9e2   :  { %3483 = vrcp.f32 %v2694_v49  ;;  %v3482_v18 = vpop.eup %3481 }
 0x9e3   :  { %3485 = vrcp.f32 %v2695_v53  ;;  %v2696_v62 = vadd.f32 1.0, %v3482_v18 }
 0x9e5   :  { %3487 = vrcp.f32 %v2696_v62 }
 0x9ec   :  { %v3484_v8 = vpop.eup %3483 }
 0x9ed   :  { %v2705_v20 = vmul.f32 %v3484_v8, %v3480_v15  ;;  %v3486_v61 = vpop.eup %3485 }
 0x9ee   :  { %v2704_v37 = vmul.f32 %v3486_v61, %v6249_v38  ;;  %v3157_v38 = vld [vmem:[#allocation3] ss:$0 sm:$0xff] }
 0x9ef   :  { %v3488_v41 = vpop.eup %3487 }
 0x9f0   :  { %v5139_v39 = vadd.f32 %v2705_v20, %v2704_v37 }
 0x9f2   :  { %3489 = vtanh.f32 %v5139_v39 }
 0x9fc   :  { %v3490_v44 = vpop.eup %3489 }
 0x9fd   :  { %v2708_v16 = vmul.f32 %v3490_v44, %v3488_v41 }
 0x9ff   :  { %v2745_v52 = vpack.c.bf16 %v2708_v16, %v2708_v16 }
 0xa01   :  { %2778 = vmatprep.mubr.bf16.mxu0 %v2745_v52  ;;  %2819 = vmatprep.mubr.bf16.mxu1 %v2745_v52 }
 0xa02   :  { %2779 = vmatmul.mubr.bf16.vlgmr.msra.gmra.mrb[72].mxu0 %v2744_v1  ;;  %2820 = vmatmul.mubr.bf16.vlgmr.msra.gmra.mrb[72].mxu1 %v2744_v1 }
 0xa03   :  { %3212 = vmatpush3.bf16.msra.mxu0 %v3211_v54  ;;  %3207 = vmatprep.mubr.msk.f32.mxu0 %vm3536_vm2, %v3537_v45 }
 0xa04   :  { %3213 = vmatprep.subr.bf16.mxu0 %v3535_v46 }
 0xa07   :  { %3215 = vmatpush3.bf16.msra.mxu0 %v3214_v56 }
 0xa08   :  { %3216 = vmatprep.subr.bf16.mxu0 %v3535_v46 }
 0xa0b   :  { %3218 = vmatpush3.bf16.msra.mxu0 %v3217_v23 }
 0xa0c   :  { %3219 = vmatprep.subr.bf16.mxu0 %v3535_v46 }
 0xa0f   :  { %3221 = vmatpush3.bf16.msra.mxu0 %v3220_v58 }
 0xa10   :  { %3222 = vmatprep.subr.bf16.mxu0 %v3535_v46 }
 0xa13   :  { %3224 = vmatpush3.bf16.msra.mxu0 %v3223_v42 }
 0xa14   :  { %3225 = vmatprep.subr.bf16.mxu0 %v3535_v46 }
 0xa17   :  { %3227 = vmatpush3.bf16.msra.mxu0 %v3226_v14 }
 0xa18   :  { %3228 = vmatprep.subr.bf16.mxu0 %v3535_v46 }
 0xa1b   :  { %3230 = vmatpush3.bf16.msra.mxu0 %v3229_v13 }
 0xa1c   :  { %3231 = vmatprep.subr.bf16.mxu0 %v3535_v46 }
 0xa1f   :  { %3233 = vmatpush3.bf16.msra.mxu0 %v3232_v43 }
 0xad5   :  { %v2780_v0 = vpop.f32.mrb[72].mxu0  ;;  %v2821_v6 = vpop.f32.mrb[72].mxu1 }
 0xad6   :  { %v2828_v21 = vadd.f32 %v2780_v0, %v6245_v24  ;;  %v2782_v36 = vpop.f32.mrb[73].mxu0  ;;  %v2823_v48 = vpop.f32.mrb[73].mxu1  ;;  %v2830_v55 = vadd.f32 %v2821_v6, %v6247_v40 }
 0xad7   :  { %v2829_v7 = vadd.f32 %v2782_v36, %v6246_v33  ;;  %v2784_v63 = vpop.f32.mrb[74].mxu0  ;;  %v2825_v27 = vpop.f32.mrb[74].mxu1  ;;  %v2831_v25 = vadd.f32 %v2823_v48, %v6248_v59 }
 0xad8   :  { %v3154_v3 = vmul.f32 -1.442695, %v2828_v21  ;;  %v2785_v57 = vpop.f32.mrb[75].mxu0  ;;  %v2826_v9 = vpop.f32.mrb[75].mxu1  ;;  %v3156_v22 = vmul.f32 -1.442695, %v2830_v55 }
 0xad9   :  { %v3155_v2 = vmul.f32 -1.442695, %v2829_v7 }
 0xada   :  { %3491 = vpow2.f32 %v3154_v3 }
 0xadb   :  { %3493 = vpow2.f32 %v3155_v2 }
 0xadc   :  { %3495 = vtanh.f32 %v2831_v25 }
 0xadd   :  { %3497 = vpow2.f32 %v3156_v22 }
 0xae4   :  { %v3492_v19 = vpop.eup %3491 }
 0xae5   :  { %v2841_v11 = vadd.f32 1.0, %v3492_v19  ;;  %v3494_v24 = vpop.eup %3493 }
 0xae6   :  { %v2842_v33 = vadd.f32 1.0, %v3494_v24  ;;  %v3496_v49 = vpop.eup %3495 }
 0xae7   :  { %3499 = vrcp.f32 %v2841_v11  ;;  %v3498_v17 = vpop.eup %3497 }
 0xae8   :  { %3501 = vrcp.f32 %v2842_v33  ;;  %v2843_v8 = vadd.f32 1.0, %v3498_v17 }
 0xaea   :  { %3503 = vrcp.f32 %v2843_v8 }
 0xaf1   :  { %v3500_v53 = vpop.eup %3499 }
 0xaf2   :  { %v2852_v15 = vmul.f32 %v3500_v53, %v3496_v49  ;;  %v3502_v18 = vpop.eup %3501 }
 0xaf3   :  { %v2851_v20 = vmul.f32 %v3502_v18, %v5139_v39 }
 0xaf4   :  { %v3504_v59 = vpop.eup %3503 }
 0xaf5   :  { %v2853_v40 = vadd.f32 %v2852_v15, %v2851_v20 }
 0xaf7   :  { %3505 = vtanh.f32 %v2853_v40 }
 0xb01   :  { %v3506_v61 = vpop.eup %3505 }
 0xb02   :  { %v2855_v62 = vmul.f32 %v3506_v61, %v3504_v59 }
 0xb04   :  { %3208 = vmatmul.mubr.f32.vlgmr.msra.gmra.mrb[76].mxu0 %v2855_v62 }
 0xbd7   :  { %v2945_v37 = vpop.f32.mrb[76].mxu0 }
 0xbd8   :  { %v2946_v41 = vadd.f32 %v3157_v38, %v2945_v37  ;;  %v3209_v44 = vpop.f32.mrb[77].mxu0 }
 0xbda   :  { %2950 = vst.msk [vmem:[%s5205_s7] sm:$0xff] %vm2949_vm3, %v2946_v41 }
 0xbdb   :  { %2955 = vsyncpa [#allocation5], 1 }

</bundles_post_ra>
